<compile_context>
chip_gen: v7x
topology: tpu7x:2x2x1
jax: 0.10.0
libtpu: 0.0.40
codegen_flags: <defaults>
</compile_context>

<pallas_src>
import jax
import jax.numpy as jnp
from jax.experimental import pallas as pl
from jax.experimental.pallas import tpu as pltpu


MXU_DTYPE = jnp.bfloat16   # MXU operand dtype; accumulation is always f32


def _round_up(x, m):
    return ((x + m - 1) // m) * m


def _pad2(a, rows, cols):
    out = jnp.zeros((rows, cols), a.dtype)
    return out.at[: a.shape[0], : a.shape[1]].set(a)


def _mxu_dot(a, b):
    """bf16 x bf16 -> f32 accumulate on the MXU."""
    return jnp.dot(a.astype(MXU_DTYPE), b.astype(MXU_DTYPE),
                   preferred_element_type=jnp.float32)


def _l2_normalize(x):
    # torch.nn.functional.normalize(p=2, dim=1): x / max(||x||, 1e-12)
    sq = jnp.sum(x * x, axis=-1, keepdims=True)
    return x * jax.lax.rsqrt(jnp.maximum(sq, 1e-24))


def _norm_adj(edge_index, edge_weight, num_nodes, out_size):
    """PyG gcn_norm as a dense zero-padded (out_size, out_size) matrix.

    Mirrors add_remaining_self_loops: every real node gets exactly one
    self-loop; nodes that already have one keep its weight, others get 1.
    """
    src, dst = edge_index[0], edge_index[1]
    w = edge_weight.astype(jnp.float32)
    is_self = src == dst
    a = jnp.zeros((out_size, out_size), jnp.float32)
    a = a.at[dst, src].add(jnp.where(is_self, 0.0, w))
    diag = (jnp.arange(out_size) < num_nodes).astype(jnp.float32)
    diag = diag.at[jnp.where(is_self, src, out_size)].set(w, mode="drop")
    idx = jnp.arange(out_size)
    a = a.at[idx, idx].add(diag)
    deg = jnp.sum(a, axis=1)
    d_inv_sqrt = jnp.where(deg > 0, jax.lax.rsqrt(deg), 0.0)
    return d_inv_sqrt[:, None] * a * d_inv_sqrt[None, :]


# -----------------------------------------------------------------------------
# Fused per-graph kernel: 3x GCN -> pool -> fc_mu -> reparameterize -> decoder
# Grid = (B,); all weights VMEM-resident (constant index maps) across graphs.
# -----------------------------------------------------------------------------
def _vae_fwd_kernel(nnodes_ref,                       # SMEM (B,) int32 (prefetch)
                    a_ref, x_ref,
                    w1_ref, b1_ref, w2_ref, b2_ref, w3_ref, b3_ref,
                    wmu_max_ref, wmu_mean_ref, wmu_y_ref, bmu_ref,
                    wd1z_ref, wd1y_ref, bd1_ref, wd2_ref, bd2_ref,
                    ycf_ref, beta_ref, eps_ref,
                    mu_ref, recon_ref):
    g = pl.program_id(0)
    n_g = nnodes_ref[g]                               # real node count of graph g
    a = a_ref[...]                                    # (Np, Np) bf16, cast once on host

    def gcn_layer(h, w_ref, b_ref):
        hw = jnp.dot(h.astype(MXU_DTYPE), w_ref[...],
                     preferred_element_type=jnp.float32)          # X W
        agg = jnp.dot(a, hw.astype(MXU_DTYPE),
                      preferred_element_type=jnp.float32) + b_ref[...]
        return jnp.maximum(_l2_normalize(agg), 0.0)               # normalize + ReLU

    h = gcn_layer(x_ref[...], w1_ref, b1_ref)         # (Np, 1024)
    h = gcn_layer(h, w2_ref, b2_ref)                  # (Np, 512)
    z = gcn_layer(h, w3_ref, b3_ref)                  # (Np, 256)

    # mask padding rows, then global max / mean pool over the real nodes
    rows = jax.lax.broadcasted_iota(jnp.int32, z.shape, 0)
    z = jnp.where(rows < n_g, z, 0.0)
    maxp = jnp.max(z, axis=0, keepdims=True)          # relu >= 0 => pad rows safe
    meanp = jnp.sum(z, axis=0, keepdims=True) * (1.0 / n_g.astype(jnp.float32))

    # fc_mu( cat([maxpool, meanpool, y_cf]) ) as split matmuls
    ycf = ycf_ref[...]                                # (1, 1)
    mu = (jnp.dot(maxp.astype(MXU_DTYPE), wmu_max_ref[...],
                  preferred_element_type=jnp.float32)
          + jnp.dot(meanp.astype(MXU_DTYPE), wmu_mean_ref[...],
                    preferred_element_type=jnp.float32)
          + ycf * wmu_y_ref[...]
          + bmu_ref[...])                             # (1, 512) f32
    mu_ref[...] = mu

    # reparameterize(mu, beta * logvar); torch module uses fc_mu for BOTH heads,
    # so logvar == mu.
    std = jnp.exp(0.5 * (beta_ref[...] * mu))
    z_lat = mu + (eps_ref[...] * 0.01) * std

    # decoder: Linear(513,513) -> ReLU -> Linear(513,out) -> sigmoid
    hdec = (jnp.dot(z_lat.astype(MXU_DTYPE), wd1z_ref[...],
                    preferred_element_type=jnp.float32)
            + ycf * wd1y_ref[...] + bd1_ref[...])
    hdec = jnp.maximum(hdec, 0.0)                     # padded lanes stay exactly 0
    out = (jnp.dot(hdec.astype(MXU_DTYPE), wd2_ref[...],
                   preferred_element_type=jnp.float32) + bd2_ref[...])
    recon_ref[...] = pl.reciprocal(1.0 + jnp.exp(-out), approx=True)  # sigmoid


# -----------------------------------------------------------------------------
# Wrapper (parameters + preprocessing + single batched pallas_call)
# -----------------------------------------------------------------------------
class GNNMLPVAEPallas:
    HID1, HID2, HID3 = 1024, 512, 256
    LATENT = 512
    DEC_IN = LATENT + 1            # 513
    DEC_IN_PAD = 640               # round_up(513, 128)

    def __init__(self, feature_size, output_size, max_nodes=16, key=None):
        self.feature_size = feature_size
        self.output_size = output_size
        self.f_pad = _round_up(feature_size, 128)
        self.out_pad = _round_up(output_size, 128)
        self.n_pad = _round_up(max(max_nodes, 8), 8)
        if key is None:
            key = jax.random.PRNGKey(0)

        def lin(k, fan_in, fan_out):
            kw, kb = jax.random.split(k)
            bound = 1.0 / (fan_in ** 0.5)
            w = jax.random.uniform(kw, (fan_in, fan_out), jnp.float32, -bound, bound)
            b = jax.random.uniform(kb, (fan_out,), jnp.float32, -bound, bound)
            return w, b

        keys = jax.random.split(key, 6)

        # GCN layers (weights stored (in, out), zero-padded, bf16 for the MXU)
        w1, b1 = lin(keys[0], feature_size, self.HID1)
        w2, b2 = lin(keys[1], self.HID1, self.HID2)
        w3, b3 = lin(keys[2], self.HID2, self.HID3)
        self.w1 = _pad2(w1, self.f_pad, self.HID1).astype(MXU_DTYPE)
        self.b1 = b1.reshape(1, self.HID1)
        self.w2 = w2.astype(MXU_DTYPE)
        self.b2 = b2.reshape(1, self.HID2)
        self.w3 = w3.astype(MXU_DTYPE)
        self.b3 = b3.reshape(1, self.HID3)

        # fc_mu : Linear(2*256 + 1, 512). (fc_logvar exists in the torch module
        # but encode() uses fc_mu for both heads, so it is never exercised.)
        wmu, bmu = lin(keys[3], 2 * self.HID3 + 1, self.LATENT)
        self.wmu_max = wmu[: self.HID3].astype(MXU_DTYPE)                   # (256, 512)
        self.wmu_mean = wmu[self.HID3: 2 * self.HID3].astype(MXU_DTYPE)     # (256, 512)
        self.wmu_y = wmu[2 * self.HID3: 2 * self.HID3 + 1]                  # (1, 512) f32
        self.bmu = bmu.reshape(1, self.LATENT)

        # decoder: Linear(513, 513) -> ReLU -> Linear(513, output_size)
        wd1, bd1 = lin(keys[4], self.DEC_IN, self.DEC_IN)
        self.wd1_z = _pad2(wd1[: self.LATENT], self.LATENT, self.DEC_IN_PAD).astype(MXU_DTYPE)
        self.wd1_y = _pad2(wd1[self.LATENT: self.DEC_IN], 1, self.DEC_IN_PAD)   # f32
        self.bd1 = _pad2(bd1.reshape(1, self.DEC_IN), 1, self.DEC_IN_PAD)
        wd2, bd2 = lin(keys[5], self.DEC_IN, output_size)
        self.wd2 = _pad2(wd2, self.DEC_IN_PAD, self.out_pad).astype(MXU_DTYPE)
        self.bd2 = _pad2(bd2.reshape(1, output_size), 1, self.out_pad)

        self._pallas_forward = jax.jit(self._pallas_forward_impl)

    # ---- batched Pallas forward ----------------------------------------------
    def _pallas_forward_impl(self, nnodes, a_b, x_b, ycf_b, beta_arr, eps_b):
        B, Np, _ = a_b.shape

        def w_spec(shape):                       # weights: constant index map => resident
            return pl.BlockSpec(shape, lambda g, nn: (0, 0))

        def g_spec(shape):                       # per-graph block, squeezed leading dim
            return pl.BlockSpec((None,) + shape, lambda g, nn: (g, 0, 0))

        grid_spec = pltpu.PrefetchScalarGridSpec(
            num_scalar_prefetch=1,               # nnodes -> SMEM
            grid=(B,),
            in_specs=[
                g_spec((Np, Np)),                        # A_hat (bf16)
                g_spec((Np, self.f_pad)),                # X     (bf16)
                w_spec((self.f_pad, self.HID1)), w_spec((1, self.HID1)),
                w_spec((self.HID1, self.HID2)), w_spec((1, self.HID2)),
                w_spec((self.HID2, self.HID3)), w_spec((1, self.HID3)),
                w_spec((self.HID3, self.LATENT)), w_spec((self.HID3, self.LATENT)),
                w_spec((1, self.LATENT)), w_spec((1, self.LATENT)),
                w_spec((self.LATENT, self.DEC_IN_PAD)), w_spec((1, self.DEC_IN_PAD)),
                w_spec((1, self.DEC_IN_PAD)),
                w_spec((self.DEC_IN_PAD, self.out_pad)), w_spec((1, self.out_pad)),
                g_spec((1, 1)),                          # y_cf
                w_spec((1, 1)),                          # beta
                g_spec((1, self.LATENT)),                # eps
            ],
            out_specs=[
                g_spec((1, self.LATENT)),                # mu
                g_spec((1, self.out_pad)),               # recon (padded lanes)
            ],
        )

        mu3, recon3 = pl.pallas_call(
            _vae_fwd_kernel,
            grid_spec=grid_spec,
            out_shape=(jax.ShapeDtypeStruct((B, 1, self.LATENT), jnp.float32),
                       jax.ShapeDtypeStruct((B, 1, self.out_pad), jnp.float32)),
            compiler_params=pltpu.CompilerParams(
                dimension_semantics=("parallel",),       # shards batch over v7x TCs
                vmem_limit_bytes=32 * 1024 * 1024),
        )(nnodes, a_b, x_b,
          self.w1, self.b1, self.w2, self.b2, self.w3, self.b3,
          self.wmu_max, self.wmu_mean, self.wmu_y, self.bmu,
          self.wd1_z, self.wd1_y, self.bd1, self.wd2, self.bd2,
          ycf_b, beta_arr, eps_b)
        return mu3, recon3

    def __call__(self, xs, edge_indexes, edge_weights, y_cf, beta, eps):
        """xs/edge_indexes/edge_weights are per-graph lists; y_cf (B,), eps (B, 512)."""
        B = len(xs)
        a_list, x_list, n_list = [], [], []
        for x, ei, ew in zip(xs, edge_indexes, edge_weights):
            n = x.shape[0]
            # build A_hat already padded + bf16 (no separate pad / f32 round trip)
            a_list.append(_norm_adj(ei, ew, n, self.n_pad).astype(MXU_DTYPE))
            xp = jnp.zeros((self.n_pad, self.f_pad), MXU_DTYPE)
            xp = xp.at[:n, : x.shape[1]].set(x.astype(MXU_DTYPE))
            x_list.append(xp)
            n_list.append(n)
        a_b = jnp.stack(a_list)                                   # (B, Np, Np) bf16
        x_b = jnp.stack(x_list)                                   # (B, Np, Fpad) bf16
        nnodes = jnp.asarray(n_list, jnp.int32)                   # (B,) SMEM prefetch
        ycf_b = jnp.reshape(jnp.asarray(y_cf, jnp.float32), (B, 1, 1))
        beta_arr = jnp.reshape(jnp.asarray(beta, jnp.float32), (1, 1))
        eps_b = jnp.reshape(jnp.asarray(eps, jnp.float32), (B, 1, self.LATENT))

        mu3, recon3 = self._pallas_forward(nnodes, a_b, x_b, ycf_b, beta_arr, eps_b)
        mu = mu3.reshape(B, self.LATENT)
        recon = recon3.reshape(B, self.out_pad)[:, : self.output_size]
        logvar = mu                     # module applies fc_mu for both heads
        return recon, mu, logvar

    # ---- pure-JAX reference (same bf16-MXU numerics, per-graph loop) ---------
    def reference(self, xs, edge_indexes, edge_weights, y_cf, beta, eps):
        beta = jnp.asarray(beta, jnp.float32)
        y_cf = jnp.asarray(y_cf, jnp.float32)
        recons, mus = [], []
        for i, (x, ei, ew) in enumerate(zip(xs, edge_indexes, edge_weights)):
            n = x.shape[0]
            a_hat = _norm_adj(ei, ew, n, n)
            h = _pad2(x.astype(jnp.float32), n, self.f_pad)
            for w, b in ((self.w1, self.b1), (self.w2, self.b2), (self.w3, self.b3)):
                agg = _mxu_dot(a_hat, _mxu_dot(h, w)) + b
                h = jnp.maximum(_l2_normalize(agg), 0.0)
            maxp = jnp.max(h, axis=0, keepdims=True)
            meanp = jnp.mean(h, axis=0, keepdims=True)
            ycf = jnp.reshape(y_cf[i], (1, 1))
            mu = (_mxu_dot(maxp, self.wmu_max) + _mxu_dot(meanp, self.wmu_mean)
                  + ycf * self.wmu_y + self.bmu)
            std = jnp.exp(0.5 * (beta * mu))
            z_lat = mu + (jnp.reshape(eps[i].astype(jnp.float32), (1, -1)) * 0.01) * std
            hdec = jnp.maximum(_mxu_dot(z_lat, self.wd1_z) + ycf * self.wd1_y + self.bd1, 0.0)
            out = _mxu_dot(hdec, self.wd2) + self.bd2
            recons.append(jax.nn.sigmoid(out)[:, : self.output_size])
            mus.append(mu)
        recon = jnp.concatenate(recons, axis=0)
        mu = jnp.concatenate(mus, axis=0)
        return recon, mu, mu


if __name__ == "__main__":
    key = jax.random.PRNGKey(0)
    k_params, k_data = jax.random.split(key)

    feature_size, output_size = 16, 8
    graph_sizes = [(12, 36), (9, 20), (16, 40)]    # (num_nodes, num_edges) per graph
    B = len(graph_sizes)
    max_nodes = max(n for n, _ in graph_sizes)

    model = GNNMLPVAEPallas(feature_size, output_size, max_nodes=max_nodes, key=k_params)

    xs, eis, ews = [], [], []
    dk = k_data
    for n, e in graph_sizes:
        dk, kx, ki, kw = jax.random.split(dk, 4)
        xs.append(jax.random.normal(kx, (n, feature_size), jnp.float32))
        eis.append(jax.random.randint(ki, (2, e), 0, n, jnp.int32))
        ews.append(jax.random.uniform(kw, (e,), jnp.float32, 0.5, 1.5))
    dk, k_eps = jax.random.split(dk)
    y_cf = jnp.array([1.0, 0.0, 1.0], jnp.float32)   # counterfactual label per graph
    beta = jnp.float32(0.7)
    # eps plays the role of torch.randn_like(std) inside reparameterize()
    eps = jax.random.normal(k_eps, (B, GNNMLPVAEPallas.LATENT), jnp.float32)

    recon, mu, logvar = model(xs, eis, ews, y_cf, beta, eps)
    recon = jax.block_until_ready(recon)

    r_recon, r_mu, r_logvar = model.reference(xs, eis, ews, y_cf, beta, eps)

    assert recon.shape == (B, output_size)
    assert mu.shape == (B, GNNMLPVAEPallas.LATENT)
    assert logvar.shape == (B, GNNMLPVAEPallas.LATENT)
    assert jnp.allclose(mu, r_mu, atol=5e-3, rtol=5e-3), "mu mismatch vs reference"
    assert jnp.allclose(recon, r_recon, atol=5e-3, rtol=5e-3), "recon mismatch vs reference"

    print("KERNEL_OK")
</pallas_src>

<mosaic_0001>
module attributes {stable_mosaic.version = 11 : i64} {
  func.func @_vae_fwd_kernel(%arg0: i32, %arg1: memref<3xi32, #tpu.memory_space<smem>>, %arg2: memref<1x16x16xbf16, #tpu.memory_space<vmem>>, %arg3: memref<1x16x128xbf16, #tpu.memory_space<vmem>>, %arg4: memref<128x1024xbf16, #tpu.memory_space<vmem>>, %arg5: memref<1x1024xf32, #tpu.memory_space<vmem>>, %arg6: memref<1024x512xbf16, #tpu.memory_space<vmem>>, %arg7: memref<1x512xf32, #tpu.memory_space<vmem>>, %arg8: memref<512x256xbf16, #tpu.memory_space<vmem>>, %arg9: memref<1x256xf32, #tpu.memory_space<vmem>>, %arg10: memref<256x512xbf16, #tpu.memory_space<vmem>>, %arg11: memref<256x512xbf16, #tpu.memory_space<vmem>>, %arg12: memref<1x512xf32, #tpu.memory_space<vmem>>, %arg13: memref<1x512xf32, #tpu.memory_space<vmem>>, %arg14: memref<512x640xbf16, #tpu.memory_space<vmem>>, %arg15: memref<1x640xf32, #tpu.memory_space<vmem>>, %arg16: memref<1x640xf32, #tpu.memory_space<vmem>>, %arg17: memref<640x128xbf16, #tpu.memory_space<vmem>>, %arg18: memref<1x128xf32, #tpu.memory_space<vmem>>, %arg19: memref<1x1x1xf32, #tpu.memory_space<vmem>>, %arg20: memref<1x1xf32, #tpu.memory_space<vmem>>, %arg21: memref<1x1x512xf32, #tpu.memory_space<vmem>>, %arg22: memref<1x1x512xf32, #tpu.memory_space<vmem>>, %arg23: memref<1x1x128xf32, #tpu.memory_space<vmem>>) attributes {dimension_semantics = [#tpu.dimension_semantics<parallel>], iteration_bounds = array<i64: 3>, scalar_prefetch = 1 : i64, scratch_operands = 0 : i64, tpu.core_type = #tpu.core_type<tc>, window_params = [{transform_indices = @transform_0, window_bounds = array<i64: 1, 16, 16>}, {transform_indices = @transform_1, window_bounds = array<i64: 1, 16, 128>}, {pipeline_mode = #tpu.pipeline_mode<synchronous>, transform_indices = @transform_2, window_bounds = array<i64: 128, 1024>}, {pipeline_mode = #tpu.pipeline_mode<synchronous>, transform_indices = @transform_3, window_bounds = array<i64: 1, 1024>}, {pipeline_mode = #tpu.pipeline_mode<synchronous>, transform_indices = @transform_4, window_bounds = array<i64: 1024, 512>}, {pipeline_mode = #tpu.pipeline_mode<synchronous>, transform_indices = @transform_5, window_bounds = array<i64: 1, 512>}, {pipeline_mode = #tpu.pipeline_mode<synchronous>, transform_indices = @transform_6, window_bounds = array<i64: 512, 256>}, {pipeline_mode = #tpu.pipeline_mode<synchronous>, transform_indices = @transform_7, window_bounds = array<i64: 1, 256>}, {pipeline_mode = #tpu.pipeline_mode<synchronous>, transform_indices = @transform_8, window_bounds = array<i64: 256, 512>}, {pipeline_mode = #tpu.pipeline_mode<synchronous>, transform_indices = @transform_9, window_bounds = array<i64: 256, 512>}, {pipeline_mode = #tpu.pipeline_mode<synchronous>, transform_indices = @transform_10, window_bounds = array<i64: 1, 512>}, {pipeline_mode = #tpu.pipeline_mode<synchronous>, transform_indices = @transform_11, window_bounds = array<i64: 1, 512>}, {pipeline_mode = #tpu.pipeline_mode<synchronous>, transform_indices = @transform_12, window_bounds = array<i64: 512, 640>}, {pipeline_mode = #tpu.pipeline_mode<synchronous>, transform_indices = @transform_13, window_bounds = array<i64: 1, 640>}, {pipeline_mode = #tpu.pipeline_mode<synchronous>, transform_indices = @transform_14, window_bounds = array<i64: 1, 640>}, {pipeline_mode = #tpu.pipeline_mode<synchronous>, transform_indices = @transform_15, window_bounds = array<i64: 640, 128>}, {pipeline_mode = #tpu.pipeline_mode<synchronous>, transform_indices = @transform_16, window_bounds = array<i64: 1, 128>}, {transform_indices = @transform_17, window_bounds = array<i64: 1, 1, 1>}, {pipeline_mode = #tpu.pipeline_mode<synchronous>, transform_indices = @transform_18, window_bounds = array<i64: 1, 1>}, {transform_indices = @transform_19, window_bounds = array<i64: 1, 1, 512>}, {transform_indices = @transform_20, window_bounds = array<i64: 1, 1, 512>}, {transform_indices = @transform_21, window_bounds = array<i64: 1, 1, 128>}]} {
    %0 = arith.index_cast %arg0 : i32 to index
    %1 = memref.load %arg1[%0] : memref<3xi32, #tpu.memory_space<smem>>
    %c0 = arith.constant 0 : index
    %c0_0 = arith.constant 0 : index
    %c0_1 = arith.constant 0 : index
    %2 = vector.load %arg2[%c0, %c0_0, %c0_1] : memref<1x16x16xbf16, #tpu.memory_space<vmem>>, vector<1x16x16xbf16>
    %3 = vector.shape_cast %2 : vector<1x16x16xbf16> to vector<16x16xbf16>
    %c0_2 = arith.constant 0 : index
    %c0_3 = arith.constant 0 : index
    %c0_4 = arith.constant 0 : index
    %4 = vector.load %arg3[%c0_2, %c0_3, %c0_4] : memref<1x16x128xbf16, #tpu.memory_space<vmem>>, vector<1x16x128xbf16>
    %5 = vector.shape_cast %4 : vector<1x16x128xbf16> to vector<16x128xbf16>
    %c0_5 = arith.constant 0 : index
    %c0_6 = arith.constant 0 : index
    %6 = vector.load %arg4[%c0_5, %c0_6] : memref<128x1024xbf16, #tpu.memory_space<vmem>>, vector<128x1024xbf16>
    %cst = arith.constant dense<0.000000e+00> : vector<16x1024xf32>
    %7 = tpu.matmul %5, %6, %cst {dimension_numbers = #tpu.dot_dimension_numbers<[1], [0], [0], [1], [0, 0, 1, 1], [], []>} : vector<16x128xbf16>, vector<128x1024xbf16>, vector<16x1024xf32> -> vector<16x1024xf32>
    %8 = arith.truncf %7 : vector<16x1024xf32> to vector<16x1024xbf16>
    %cst_7 = arith.constant dense<0.000000e+00> : vector<16x1024xf32>
    %9 = tpu.matmul %3, %8, %cst_7 {dimension_numbers = #tpu.dot_dimension_numbers<[1], [0], [0], [1], [0, 0, 1, 1], [], []>} : vector<16x16xbf16>, vector<16x1024xbf16>, vector<16x1024xf32> -> vector<16x1024xf32>
    %c0_8 = arith.constant 0 : index
    %c0_9 = arith.constant 0 : index
    %10 = vector.load %arg5[%c0_8, %c0_9] : memref<1x1024xf32, #tpu.memory_space<vmem>>, vector<1x1024xf32>
    %11 = vector.broadcast %10 : vector<1x1024xf32> to vector<16x1024xf32>
    %12 = arith.addf %9, %11 : vector<16x1024xf32>
    %13 = arith.mulf %12, %12 : vector<16x1024xf32>
    %cst_10 = arith.constant dense<0.000000e+00> : vector<16xf32>
    %14 = vector.multi_reduction <add>, %13, %cst_10 [1] : vector<16x1024xf32> to vector<16xf32>
    %15 = vector.shape_cast %14 : vector<16xf32> to vector<16x1xf32>
    %cst_11 = arith.constant 1.000000e-24 : f32
    %16 = vector.broadcast %cst_11 : f32 to vector<16x1xf32>
    %17 = arith.maximumf %15, %16 : vector<16x1xf32>
    %18 = math.rsqrt %17 : vector<16x1xf32>
    %19 = vector.broadcast %18 : vector<16x1xf32> to vector<16x1024xf32>
    %20 = arith.mulf %12, %19 : vector<16x1024xf32>
    %cst_12 = arith.constant 0.000000e+00 : f32
    %21 = vector.broadcast %cst_12 : f32 to vector<16x1024xf32>
    %22 = arith.maximumf %20, %21 : vector<16x1024xf32>
    %23 = arith.truncf %22 : vector<16x1024xf32> to vector<16x1024xbf16>
    %c0_13 = arith.constant 0 : index
    %c0_14 = arith.constant 0 : index
    %24 = vector.load %arg6[%c0_13, %c0_14] : memref<1024x512xbf16, #tpu.memory_space<vmem>>, vector<1024x512xbf16>
    %cst_15 = arith.constant dense<0.000000e+00> : vector<16x512xf32>
    %25 = tpu.matmul %23, %24, %cst_15 {dimension_numbers = #tpu.dot_dimension_numbers<[1], [0], [0], [1], [0, 0, 1, 1], [], []>} : vector<16x1024xbf16>, vector<1024x512xbf16>, vector<16x512xf32> -> vector<16x512xf32>
    %26 = arith.truncf %25 : vector<16x512xf32> to vector<16x512xbf16>
    %cst_16 = arith.constant dense<0.000000e+00> : vector<16x512xf32>
    %27 = tpu.matmul %3, %26, %cst_16 {dimension_numbers = #tpu.dot_dimension_numbers<[1], [0], [0], [1], [0, 0, 1, 1], [], []>} : vector<16x16xbf16>, vector<16x512xbf16>, vector<16x512xf32> -> vector<16x512xf32>
    %c0_17 = arith.constant 0 : index
    %c0_18 = arith.constant 0 : index
    %28 = vector.load %arg7[%c0_17, %c0_18] : memref<1x512xf32, #tpu.memory_space<vmem>>, vector<1x512xf32>
    %29 = vector.broadcast %28 : vector<1x512xf32> to vector<16x512xf32>
    %30 = arith.addf %27, %29 : vector<16x512xf32>
    %31 = arith.mulf %30, %30 : vector<16x512xf32>
    %cst_19 = arith.constant dense<0.000000e+00> : vector<16xf32>
    %32 = vector.multi_reduction <add>, %31, %cst_19 [1] : vector<16x512xf32> to vector<16xf32>
    %33 = vector.shape_cast %32 : vector<16xf32> to vector<16x1xf32>
    %cst_20 = arith.constant 1.000000e-24 : f32
    %34 = vector.broadcast %cst_20 : f32 to vector<16x1xf32>
    %35 = arith.maximumf %33, %34 : vector<16x1xf32>
    %36 = math.rsqrt %35 : vector<16x1xf32>
    %37 = vector.broadcast %36 : vector<16x1xf32> to vector<16x512xf32>
    %38 = arith.mulf %30, %37 : vector<16x512xf32>
    %cst_21 = arith.constant 0.000000e+00 : f32
    %39 = vector.broadcast %cst_21 : f32 to vector<16x512xf32>
    %40 = arith.maximumf %38, %39 : vector<16x512xf32>
    %41 = arith.truncf %40 : vector<16x512xf32> to vector<16x512xbf16>
    %c0_22 = arith.constant 0 : index
    %c0_23 = arith.constant 0 : index
    %42 = vector.load %arg8[%c0_22, %c0_23] : memref<512x256xbf16, #tpu.memory_space<vmem>>, vector<512x256xbf16>
    %cst_24 = arith.constant dense<0.000000e+00> : vector<16x256xf32>
    %43 = tpu.matmul %41, %42, %cst_24 {dimension_numbers = #tpu.dot_dimension_numbers<[1], [0], [0], [1], [0, 0, 1, 1], [], []>} : vector<16x512xbf16>, vector<512x256xbf16>, vector<16x256xf32> -> vector<16x256xf32>
    %44 = arith.truncf %43 : vector<16x256xf32> to vector<16x256xbf16>
    %cst_25 = arith.constant dense<0.000000e+00> : vector<16x256xf32>
    %45 = tpu.matmul %3, %44, %cst_25 {dimension_numbers = #tpu.dot_dimension_numbers<[1], [0], [0], [1], [0, 0, 1, 1], [], []>} : vector<16x16xbf16>, vector<16x256xbf16>, vector<16x256xf32> -> vector<16x256xf32>
    %c0_26 = arith.constant 0 : index
    %c0_27 = arith.constant 0 : index
    %46 = vector.load %arg9[%c0_26, %c0_27] : memref<1x256xf32, #tpu.memory_space<vmem>>, vector<1x256xf32>
    %47 = vector.broadcast %46 : vector<1x256xf32> to vector<16x256xf32>
    %48 = arith.addf %45, %47 : vector<16x256xf32>
    %49 = arith.mulf %48, %48 : vector<16x256xf32>
    %cst_28 = arith.constant dense<0.000000e+00> : vector<16xf32>
    %50 = vector.multi_reduction <add>, %49, %cst_28 [1] : vector<16x256xf32> to vector<16xf32>
    %51 = vector.shape_cast %50 : vector<16xf32> to vector<16x1xf32>
    %cst_29 = arith.constant 1.000000e-24 : f32
    %52 = vector.broadcast %cst_29 : f32 to vector<16x1xf32>
    %53 = arith.maximumf %51, %52 : vector<16x1xf32>
    %54 = math.rsqrt %53 : vector<16x1xf32>
    %55 = vector.broadcast %54 : vector<16x1xf32> to vector<16x256xf32>
    %56 = arith.mulf %48, %55 : vector<16x256xf32>
    %cst_30 = arith.constant 0.000000e+00 : f32
    %57 = vector.broadcast %cst_30 : f32 to vector<16x256xf32>
    %58 = arith.maximumf %56, %57 : vector<16x256xf32>
    %59 = tpu.iota {dimensions = array<i32: 0>} : vector<16x256xi32>
    %60 = vector.broadcast %1 : i32 to vector<16x256xi32>
    %61 = arith.cmpi slt, %59, %60 : vector<16x256xi32>
    %cst_31 = arith.constant 0.000000e+00 : f32
    %62 = vector.broadcast %cst_31 : f32 to vector<16x256xf32>
    %63 = arith.select %61, %58, %62 : vector<16x256xi1>, vector<16x256xf32>
    %cst_32 = arith.constant dense<0xFF800000> : vector<256xf32>
    %64 = vector.multi_reduction <maximumf>, %63, %cst_32 [0] : vector<16x256xf32> to vector<256xf32>
    %65 = vector.shape_cast %64 : vector<256xf32> to vector<1x256xf32>
    %cst_33 = arith.constant dense<0.000000e+00> : vector<256xf32>
    %66 = vector.multi_reduction <add>, %63, %cst_33 [0] : vector<16x256xf32> to vector<256xf32>
    %67 = vector.shape_cast %66 : vector<256xf32> to vector<1x256xf32>
    %68 = arith.sitofp %1 : i32 to f32
    %cst_34 = arith.constant 1.000000e+00 : f32
    %69 = arith.divf %cst_34, %68 : f32
    %70 = vector.broadcast %69 : f32 to vector<1x256xf32>
    %71 = arith.mulf %67, %70 : vector<1x256xf32>
    %c0_35 = arith.constant 0 : index
    %c0_36 = arith.constant 0 : index
    %c0_37 = arith.constant 0 : index
    %72 = vector.load %arg19[%c0_35, %c0_36, %c0_37] : memref<1x1x1xf32, #tpu.memory_space<vmem>>, vector<1x1x1xf32>
    %73 = vector.shape_cast %72 : vector<1x1x1xf32> to vector<1x1xf32>
    %74 = arith.truncf %65 : vector<1x256xf32> to vector<1x256xbf16>
    %c0_38 = arith.constant 0 : index
    %c0_39 = arith.constant 0 : index
    %75 = vector.load %arg10[%c0_38, %c0_39] : memref<256x512xbf16, #tpu.memory_space<vmem>>, vector<256x512xbf16>
    %cst_40 = arith.constant dense<0.000000e+00> : vector<1x512xf32>
    %76 = tpu.matmul %74, %75, %cst_40 {dimension_numbers = #tpu.dot_dimension_numbers<[1], [0], [0], [1], [0, 0, 1, 1], [], []>} : vector<1x256xbf16>, vector<256x512xbf16>, vector<1x512xf32> -> vector<1x512xf32>
    %77 = arith.truncf %71 : vector<1x256xf32> to vector<1x256xbf16>
    %c0_41 = arith.constant 0 : index
    %c0_42 = arith.constant 0 : index
    %78 = vector.load %arg11[%c0_41, %c0_42] : memref<256x512xbf16, #tpu.memory_space<vmem>>, vector<256x512xbf16>
    %cst_43 = arith.constant dense<0.000000e+00> : vector<1x512xf32>
    %79 = tpu.matmul %77, %78, %cst_43 {dimension_numbers = #tpu.dot_dimension_numbers<[1], [0], [0], [1], [0, 0, 1, 1], [], []>} : vector<1x256xbf16>, vector<256x512xbf16>, vector<1x512xf32> -> vector<1x512xf32>
    %80 = arith.addf %76, %79 : vector<1x512xf32>
    %c0_44 = arith.constant 0 : index
    %c0_45 = arith.constant 0 : index
    %81 = vector.load %arg12[%c0_44, %c0_45] : memref<1x512xf32, #tpu.memory_space<vmem>>, vector<1x512xf32>
    %82 = vector.broadcast %73 : vector<1x1xf32> to vector<1x512xf32>
    %83 = arith.mulf %82, %81 : vector<1x512xf32>
    %84 = arith.addf %80, %83 : vector<1x512xf32>
    %c0_46 = arith.constant 0 : index
    %c0_47 = arith.constant 0 : index
    %85 = vector.load %arg13[%c0_46, %c0_47] : memref<1x512xf32, #tpu.memory_space<vmem>>, vector<1x512xf32>
    %86 = arith.addf %84, %85 : vector<1x512xf32>
    %c0_48 = arith.constant 0 : index
    %c0_49 = arith.constant 0 : index
    %c0_50 = arith.constant 0 : index
    %87 = vector.load %arg22[%c0_48, %c0_49, %c0_50] : memref<1x1x512xf32, #tpu.memory_space<vmem>>, vector<1x1x512xf32>
    %88 = vector.shape_cast %87 : vector<1x1x512xf32> to vector<1x512xf32>
    %89 = vector.shape_cast %86 : vector<1x512xf32> to vector<1x1x512xf32>
    tpu.vector_store %arg22[%c0_48, %c0_49, %c0_50], %89 {strides = array<i32>} : memref<1x1x512xf32, #tpu.memory_space<vmem>>, vector<1x1x512xf32>,
    %c0_51 = arith.constant 0 : index
    %c0_52 = arith.constant 0 : index
    %90 = vector.load %arg20[%c0_51, %c0_52] : memref<1x1xf32, #tpu.memory_space<vmem>>, vector<1x1xf32>
    %91 = vector.broadcast %90 : vector<1x1xf32> to vector<1x512xf32>
    %92 = arith.mulf %91, %86 : vector<1x512xf32>
    %cst_53 = arith.constant 5.000000e-01 : f32
    %93 = vector.broadcast %cst_53 : f32 to vector<1x512xf32>
    %94 = arith.mulf %93, %92 : vector<1x512xf32>
    %95 = math.exp %94 : vector<1x512xf32>
    %c0_54 = arith.constant 0 : index
    %c0_55 = arith.constant 0 : index
    %c0_56 = arith.constant 0 : index
    %96 = vector.load %arg21[%c0_54, %c0_55, %c0_56] : memref<1x1x512xf32, #tpu.memory_space<vmem>>, vector<1x1x512xf32>
    %97 = vector.shape_cast %96 : vector<1x1x512xf32> to vector<1x512xf32>
    %cst_57 = arith.constant 0.00999999977 : f32
    %98 = vector.broadcast %cst_57 : f32 to vector<1x512xf32>
    %99 = arith.mulf %97, %98 : vector<1x512xf32>
    %100 = arith.mulf %99, %95 : vector<1x512xf32>
    %101 = arith.addf %86, %100 : vector<1x512xf32>
    %102 = arith.truncf %101 : vector<1x512xf32> to vector<1x512xbf16>
    %c0_58 = arith.constant 0 : index
    %c0_59 = arith.constant 0 : index
    %103 = vector.load %arg14[%c0_58, %c0_59] : memref<512x640xbf16, #tpu.memory_space<vmem>>, vector<512x640xbf16>
    %cst_60 = arith.constant dense<0.000000e+00> : vector<1x640xf32>
    %104 = tpu.matmul %102, %103, %cst_60 {dimension_numbers = #tpu.dot_dimension_numbers<[1], [0], [0], [1], [0, 0, 1, 1], [], []>} : vector<1x512xbf16>, vector<512x640xbf16>, vector<1x640xf32> -> vector<1x640xf32>
    %c0_61 = arith.constant 0 : index
    %c0_62 = arith.constant 0 : index
    %105 = vector.load %arg15[%c0_61, %c0_62] : memref<1x640xf32, #tpu.memory_space<vmem>>, vector<1x640xf32>
    %106 = vector.broadcast %73 : vector<1x1xf32> to vector<1x640xf32>
    %107 = arith.mulf %106, %105 : vector<1x640xf32>
    %108 = arith.addf %104, %107 : vector<1x640xf32>
    %c0_63 = arith.constant 0 : index
    %c0_64 = arith.constant 0 : index
    %109 = vector.load %arg16[%c0_63, %c0_64] : memref<1x640xf32, #tpu.memory_space<vmem>>, vector<1x640xf32>
    %110 = arith.addf %108, %109 : vector<1x640xf32>
    %cst_65 = arith.constant 0.000000e+00 : f32
    %111 = vector.broadcast %cst_65 : f32 to vector<1x640xf32>
    %112 = arith.maximumf %110, %111 : vector<1x640xf32>
    %113 = arith.truncf %112 : vector<1x640xf32> to vector<1x640xbf16>
    %c0_66 = arith.constant 0 : index
    %c0_67 = arith.constant 0 : index
    %114 = vector.load %arg17[%c0_66, %c0_67] : memref<640x128xbf16, #tpu.memory_space<vmem>>, vector<640x128xbf16>
    %cst_68 = arith.constant dense<0.000000e+00> : vector<1x128xf32>
    %115 = tpu.matmul %113, %114, %cst_68 {dimension_numbers = #tpu.dot_dimension_numbers<[1], [0], [0], [1], [0, 0, 1, 1], [], []>} : vector<1x640xbf16>, vector<640x128xbf16>, vector<1x128xf32> -> vector<1x128xf32>
    %c0_69 = arith.constant 0 : index
    %c0_70 = arith.constant 0 : index
    %116 = vector.load %arg18[%c0_69, %c0_70] : memref<1x128xf32, #tpu.memory_space<vmem>>, vector<1x128xf32>
    %117 = arith.addf %115, %116 : vector<1x128xf32>
    %cst_71 = arith.constant 0.000000e+00 : f32
    %118 = vector.broadcast %cst_71 : f32 to vector<1x128xf32>
    %119 = arith.subf %118, %117 : vector<1x128xf32>
    %120 = math.exp %119 : vector<1x128xf32>
    %cst_72 = arith.constant 1.000000e+00 : f32
    %121 = vector.broadcast %cst_72 : f32 to vector<1x128xf32>
    %122 = arith.addf %121, %120 : vector<1x128xf32>
    %123 = tpu.reciprocal %122 {approx = true} : vector<1x128xf32> -> vector<1x128xf32>
    %c0_73 = arith.constant 0 : index
    %c0_74 = arith.constant 0 : index
    %c0_75 = arith.constant 0 : index
    %124 = vector.load %arg23[%c0_73, %c0_74, %c0_75] : memref<1x1x128xf32, #tpu.memory_space<vmem>>, vector<1x1x128xf32>
    %125 = vector.shape_cast %124 : vector<1x1x128xf32> to vector<1x128xf32>
    %126 = vector.shape_cast %123 : vector<1x128xf32> to vector<1x1x128xf32>
    tpu.vector_store %arg23[%c0_73, %c0_74, %c0_75], %126 {strides = array<i32>} : memref<1x1x128xf32, #tpu.memory_space<vmem>>, vector<1x1x128xf32>,
    return
  }
  func.func @transform_0(%arg0: i32, %arg1: memref<3xi32, #tpu.memory_space<smem>>) -> (i32, i32, i32) {
    %c0_i32 = arith.constant 0 : i32
    %c0_i32_0 = arith.constant 0 : i32
    %c0_i32_1 = arith.constant 0 : i32
    return %arg0, %c0_i32, %c0_i32_0 : i32, i32, i32
  }
  func.func @transform_1(%arg0: i32, %arg1: memref<3xi32, #tpu.memory_space<smem>>) -> (i32, i32, i32) {
    %c0_i32 = arith.constant 0 : i32
    %c0_i32_0 = arith.constant 0 : i32
    %c0_i32_1 = arith.constant 0 : i32
    return %arg0, %c0_i32, %c0_i32_0 : i32, i32, i32
  }
  func.func @transform_2(%arg0: i32, %arg1: memref<3xi32, #tpu.memory_space<smem>>) -> (i32, i32) {
    %c0_i32 = arith.constant 0 : i32
    %c0_i32_0 = arith.constant 0 : i32
    %c0_i32_1 = arith.constant 0 : i32
    return %c0_i32, %c0_i32_0 : i32, i32
  }
  func.func @transform_3(%arg0: i32, %arg1: memref<3xi32, #tpu.memory_space<smem>>) -> (i32, i32) {
    %c0_i32 = arith.constant 0 : i32
    %c0_i32_0 = arith.constant 0 : i32
    %c0_i32_1 = arith.constant 0 : i32
    return %c0_i32, %c0_i32_0 : i32, i32
  }
  func.func @transform_4(%arg0: i32, %arg1: memref<3xi32, #tpu.memory_space<smem>>) -> (i32, i32) {
    %c0_i32 = arith.constant 0 : i32
    %c0_i32_0 = arith.constant 0 : i32
    %c0_i32_1 = arith.constant 0 : i32
    return %c0_i32, %c0_i32_0 : i32, i32
  }
  func.func @transform_5(%arg0: i32, %arg1: memref<3xi32, #tpu.memory_space<smem>>) -> (i32, i32) {
    %c0_i32 = arith.constant 0 : i32
    %c0_i32_0 = arith.constant 0 : i32
    %c0_i32_1 = arith.constant 0 : i32
    return %c0_i32, %c0_i32_0 : i32, i32
  }
  func.func @transform_6(%arg0: i32, %arg1: memref<3xi32, #tpu.memory_space<smem>>) -> (i32, i32) {
    %c0_i32 = arith.constant 0 : i32
    %c0_i32_0 = arith.constant 0 : i32
    %c0_i32_1 = arith.constant 0 : i32
    return %c0_i32, %c0_i32_0 : i32, i32
  }
  func.func @transform_7(%arg0: i32, %arg1: memref<3xi32, #tpu.memory_space<smem>>) -> (i32, i32) {
    %c0_i32 = arith.constant 0 : i32
    %c0_i32_0 = arith.constant 0 : i32
    %c0_i32_1 = arith.constant 0 : i32
    return %c0_i32, %c0_i32_0 : i32, i32
  }
  func.func @transform_8(%arg0: i32, %arg1: memref<3xi32, #tpu.memory_space<smem>>) -> (i32, i32) {
    %c0_i32 = arith.constant 0 : i32
    %c0_i32_0 = arith.constant 0 : i32
    %c0_i32_1 = arith.constant 0 : i32
    return %c0_i32, %c0_i32_0 : i32, i32
  }
  func.func @transform_9(%arg0: i32, %arg1: memref<3xi32, #tpu.memory_space<smem>>) -> (i32, i32) {
    %c0_i32 = arith.constant 0 : i32
    %c0_i32_0 = arith.constant 0 : i32
    %c0_i32_1 = arith.constant 0 : i32
    return %c0_i32, %c0_i32_0 : i32, i32
  }
  func.func @transform_10(%arg0: i32, %arg1: memref<3xi32, #tpu.memory_space<smem>>) -> (i32, i32) {
    %c0_i32 = arith.constant 0 : i32
    %c0_i32_0 = arith.constant 0 : i32
    %c0_i32_1 = arith.constant 0 : i32
    return %c0_i32, %c0_i32_0 : i32, i32
  }
  func.func @transform_11(%arg0: i32, %arg1: memref<3xi32, #tpu.memory_space<smem>>) -> (i32, i32) {
    %c0_i32 = arith.constant 0 : i32
    %c0_i32_0 = arith.constant 0 : i32
    %c0_i32_1 = arith.constant 0 : i32
    return %c0_i32, %c0_i32_0 : i32, i32
  }
  func.func @transform_12(%arg0: i32, %arg1: memref<3xi32, #tpu.memory_space<smem>>) -> (i32, i32) {
    %c0_i32 = arith.constant 0 : i32
    %c0_i32_0 = arith.constant 0 : i32
    %c0_i32_1 = arith.constant 0 : i32
    return %c0_i32, %c0_i32_0 : i32, i32
  }
  func.func @transform_13(%arg0: i32, %arg1: memref<3xi32, #tpu.memory_space<smem>>) -> (i32, i32) {
    %c0_i32 = arith.constant 0 : i32
    %c0_i32_0 = arith.constant 0 : i32
    %c0_i32_1 = arith.constant 0 : i32
    return %c0_i32, %c0_i32_0 : i32, i32
  }
  func.func @transform_14(%arg0: i32, %arg1: memref<3xi32, #tpu.memory_space<smem>>) -> (i32, i32) {
    %c0_i32 = arith.constant 0 : i32
    %c0_i32_0 = arith.constant 0 : i32
    %c0_i32_1 = arith.constant 0 : i32
    return %c0_i32, %c0_i32_0 : i32, i32
  }
  func.func @transform_15(%arg0: i32, %arg1: memref<3xi32, #tpu.memory_space<smem>>) -> (i32, i32) {
    %c0_i32 = arith.constant 0 : i32
    %c0_i32_0 = arith.constant 0 : i32
    %c0_i32_1 = arith.constant 0 : i32
    return %c0_i32, %c0_i32_0 : i32, i32
  }
  func.func @transform_16(%arg0: i32, %arg1: memref<3xi32, #tpu.memory_space<smem>>) -> (i32, i32) {
    %c0_i32 = arith.constant 0 : i32
    %c0_i32_0 = arith.constant 0 : i32
    %c0_i32_1 = arith.constant 0 : i32
    return %c0_i32, %c0_i32_0 : i32, i32
  }
  func.func @transform_17(%arg0: i32, %arg1: memref<3xi32, #tpu.memory_space<smem>>) -> (i32, i32, i32) {
    %c0_i32 = arith.constant 0 : i32
    %c0_i32_0 = arith.constant 0 : i32
    %c0_i32_1 = arith.constant 0 : i32
    return %arg0, %c0_i32, %c0_i32_0 : i32, i32, i32
  }
  func.func @transform_18(%arg0: i32, %arg1: memref<3xi32, #tpu.memory_space<smem>>) -> (i32, i32) {
    %c0_i32 = arith.constant 0 : i32
    %c0_i32_0 = arith.constant 0 : i32
    %c0_i32_1 = arith.constant 0 : i32
    return %c0_i32, %c0_i32_0 : i32, i32
  }
  func.func @transform_19(%arg0: i32, %arg1: memref<3xi32, #tpu.memory_space<smem>>) -> (i32, i32, i32) {
    %c0_i32 = arith.constant 0 : i32
    %c0_i32_0 = arith.constant 0 : i32
    %c0_i32_1 = arith.constant 0 : i32
    return %arg0, %c0_i32, %c0_i32_0 : i32, i32, i32
  }
  func.func @transform_20(%arg0: i32, %arg1: memref<3xi32, #tpu.memory_space<smem>>) -> (i32, i32, i32) {
    %c0_i32 = arith.constant 0 : i32
    %c0_i32_0 = arith.constant 0 : i32
    %c0_i32_1 = arith.constant 0 : i32
    return %arg0, %c0_i32, %c0_i32_0 : i32, i32, i32
  }
  func.func @transform_21(%arg0: i32, %arg1: memref<3xi32, #tpu.memory_space<smem>>) -> (i32, i32, i32) {
    %c0_i32 = arith.constant 0 : i32
    %c0_i32_0 = arith.constant 0 : i32
    %c0_i32_1 = arith.constant 0 : i32
    return %arg0, %c0_i32, %c0_i32_0 : i32, i32, i32
  }
}

</mosaic_0001>

<bundles_post_ra>
// kernel: _pallas_forward_impl.1
= control target key start
LH: loop header
LB: loop body
LE: loop exit
PB: predicated region body
PF: predicated region fallthrough
CT: control target
= control target key end

     0   :  { %s12053_s0 = inlined_call_operand.vmem [shape: s32[3], index: 0, kind: input, shape index: {}]   ;;  %s12054_s1 = inlined_call_operand.vmem [shape: bf16[3,16,16], index: 1, kind: input, shape index: {}]   ;;  %s12055_s2 = inlined_call_operand.vmem [shape: bf16[3,16,128], index: 2, kind: input, shape index: {}]   ;;  %s12056_s3 = inlined_call_operand.vmem [shape: bf16[128,1024], index: 3, kind: input, shape index: {}]   ;;  %s12057_s4 = inlined_call_operand.vmem [shape: f32[1,1024], index: 4, kind: input, shape index: {}]   ;;  %s12058_s5 = inlined_call_operand.vmem [shape: bf16[1024,512], index: 5, kind: input, shape index: {}]   ;;  %s12059_s6 = inlined_call_operand.vmem [shape: f32[1,512], index: 6, kind: input, shape index: {}]   ;;  %s12060_s7 = inlined_call_operand.vmem [shape: bf16[512,256], index: 7, kind: input, shape index: {}]   ;;  %s12061_s8 = inlined_call_operand.vmem [shape: f32[1,256], index: 8, kind: input, shape index: {}]   ;;  %s12062_s9 = inlined_call_operand.vmem [shape: bf16[256,512], index: 9, kind: input, shape index: {}]   ;;  %s12063_s10 = inlined_call_operand.vmem [shape: bf16[256,512], index: 10, kind: input, shape index: {}]   ;;  %s12064_s11 = inlined_call_operand.vmem [shape: f32[1,512], index: 11, kind: input, shape index: {}]   ;;  %s12065_s12 = inlined_call_operand.vmem [shape: f32[1,512], index: 12, kind: input, shape index: {}]   ;;  %s12066_s13 = inlined_call_operand.vmem [shape: bf16[512,640], index: 13, kind: input, shape index: {}]   ;;  %s12067_s14 = inlined_call_operand.vmem [shape: f32[1,640], index: 14, kind: input, shape index: {}]   ;;  %s12068_s15 = inlined_call_operand.vmem [shape: f32[1,640], index: 15, kind: input, shape index: {}]   ;;  %s12069_s16 = inlined_call_operand.vmem [shape: bf16[640,128], index: 16, kind: input, shape index: {}]   ;;  %s12070_s17 = inlined_call_operand.vmem [shape: f32[1,128], index: 17, kind: input, shape index: {}]   ;;  %s12071_s18 = inlined_call_operand.vmem [shape: f32[3,1,1], index: 18, kind: input, shape index: {}]   ;;  %s12072_s20 = inlined_call_operand.vmem [shape: f32[3,1,512], index: 20, kind: input, shape index: {}]   ;;  %s12073_s21 = inlined_call_operand.hbm [shape: f32[3,1,512], index: 21, kind: output, shape index: {0}]   ;;  %s12074_s22 = inlined_call_operand.hbm [shape: f32[3,1,128], index: 22, kind: output, shape index: {1}]   ;;  %s12075_s19 = inlined_call_operand.<no memory space> [shape: f32[1,1], index: 19, kind: input, shape index: {}]  }
   0x1   :  { %12085 = sst [smem:[#allocation18_spill]] %s12053_s0  ;;  %v32_v0 = vstv %s12075_s19 }
   0x2   :  { %12086 = sst [smem:[#allocation19_spill]] %s12054_s1  ;;  %s12095_s29 = sld [smem:[#allocation18_spill]]  ;;  %33 = vst [vmem:[#allocation4] sm:$0x1] %v32_v0 }
   0x3   :  { %12087 = sst [smem:[#allocation20_spill]] %s12055_s2 }
   0x4   :  { %12088 = sst [smem:[#allocation21_spill]] %s12056_s3 }
   0x5   :  { %12089 = sst [smem:[#allocation22_spill]] %s12057_s4 }
   0x6   :  { %12090 = sst [smem:[#allocation23_spill]] %s12058_s5 }
   0x7   :  { %12091 = sst [smem:[#allocation24_spill]] %s12059_s6 }
   0x8   :  { %12092 = sst [smem:[#allocation25_spill]] %s12068_s15  ;;  %s28_s15 = sshll.u32 %s12095_s29, 4  ;;  %s29_s15 = int_to_ptr.vmem [resolvable:$true] %s28_s15 }
   0x9   :  { %12093 = sst [smem:[#allocation26_spill]] %s12070_s17  ;;  %s9190_s0 = scalar_lea.vmem %s29_s15, 16 }
   0xa   :  { %12094 = sst [smem:[#allocation27_spill]] %s12074_s22  ;;  %p9191_p0 = scmp.ne.s32.totalorder %s29_s15, %s9190_s0 }
   0xb   :  { %p9195_p1 = scmp.lt.s32.totalorder %s29_s15, %s29_s15  ;;  %p9196_p2 = scmp.lt.s32.totalorder %s9190_s0, %s9190_s0 }
   0xd   :  { %p9197_p3 = por %p9196_p2, %p9195_p1 }
   0xf   :  { %p9198_p4 = pnand %p9197_p3, %p9191_p0 }
  0x11   :  { %9201 = shalt.err (!%p9198_p4)  }
  0x12   :  { %s9300_s23 = smov [#allocation3]  }
  0x13   :  { %31 = dma.vmem_to_smem %s29_s15, 16, %s9300_s23, [#allocation2] }
  0x14   :  { %9274 = dma.done.wait [#allocation2], 16 }
  0x15   :  { %9275 = vsyncadd [#allocation2], 4294967280 }
  0x16   :  { %35 = sfence }
  0x17   :  { %36 = vsyncpa [#allocation6], 0 }
  0x18   :  { %38 = vsyncpa [#allocation6 + $0x1], 0 }
  0x19   :  { %39 = vsyncpa [#allocation8], 0 }
  0x1a   :  { %41 = vsyncpa [#allocation8 + $0x1], 0  ;;  %s9428_s1 = smov 0   ;;  %s9430_s19 = smov 0  }
  0x1b   :  { %s9432_s5 = smov 0   ;;  %s9434_s24 = smov 0  }
  0x1c LB: > { %12096 = sst [smem:[#allocation12_spill]] %s9286_s1  ;;  %s9449_s15 = sadd.s32 4294967295, %s9298_s24   ;;  %s9298_s24 = sphi %s9434_s24, %s12116_s24   ;;  %s9294_s5 = sphi %s9432_s5, %s12118_s5   ;;  %s9290_s19 = sphi %s9430_s19, %s12120_s19   ;;  %s9286_s1 = sphi %s9428_s1, %s12119_s1  }
  0x1d   : > { %12097 = sst [smem:[#allocation13_spill]] %s9294_s5  ;;  %s7287_s6 = sadd.s32 4294967294, %s9298_s24  }
  0x1e   : > { %12098 = sst [smem:[#allocation14_spill]] %s9298_s24  ;;  %s9453_s25 = sadd.s32 1, %s9298_s24  }
  0x1f   : > { %12099 = sst [smem:[#allocation15_spill]] %s9453_s25  ;;  %s494_s26 = sadd.s32 1, %s9294_s5 }
  0x20   : > { %s491_s2 = ssub.s32 %s9298_s24, %s9453_s25  ;;  %p504_p5 = scmp.ne.s32.totalorder %s9294_s5, %s9290_s19 }
  0x21   : > { %p492_p6 = scmp.eq.s32.totalorder %s491_s2, 0  ;;  %p505_p7 = scmp.eq.s32.totalorder %s9449_s15, 2 }
  0x22   : > { %p510_p8 = scmp.ne.s32.totalorder %s9290_s19, %s9286_s1  ;;  %p511_p9 = scmp.eq.s32.totalorder %s7287_s6, 2 }
  0x23   : > { %s9464_s27 = scalar_select %p492_p6, %s9294_s5, %s494_s26  }
  0x24   : > { %p9466_p10 = por %p505_p7, %p504_p5  ;;  %p9470_p11 = por %p511_p9, %p510_p8 }
  0x25   : > { %12100 = sst [smem:[#allocation16_spill]] %s9464_s27  ;;  %p7290_p12 = scmp.ge.s32.totalorder %s9298_s24, 1 }
  0x26   : > { %s12102_s28 = scalar_select %p9470_p11, 1, 0 }
  0x27   : > { %p632_p13 = scmp.lt.s32.totalorder %s9298_s24, 4 }
  0x28   : > { %12103 = sst [smem:[#allocation17_spill]] %s12102_s28 }
  0x29   : > { %p633_p0 = pnand %p7290_p12, %p632_p13 }
  0x2a   : > { %s12104_s4 = sld [smem:[#allocation21_spill]] (!%p633_p0)  ;;  %p708_p1 = scmp.lt.s32.totalorder (!%p633_p0), %s9449_s15, 2  ;;  %v9301_v9 = vmov (!%p633_p0), 0   ;;  %vm1348_vm0 = vcmask (!%p633_p0), 130048   ;;  %vm9304_vm4 = vmmov (!%p633_p0), 0  }
  0x2b   : > { %636 = sbr.rel (%p633_p0) target bundleno = 3172 (0xc64), region = 100  ;;  %1153 = vmatprep.mubr.bf16.mxu0 (!%p633_p0), %v9301_v9  ;;  %1196 = vmatprep.mubr.bf16.mxu1 (!%p633_p0), %v9301_v9  ;;  %s12105_s28 = sld [smem:[#allocation19_spill]] (!%p633_p0) }
  0x2c   : > { %8223 = vset.pattern.permute.xlu0 (!%p633_p0), %v9301_v9  ;;  %8224 = vset.pattern.permute.xlu1 (!%p633_p0), %v9301_v9  ;;  %s12106_s17 = sld [smem:[#allocation20_spill]] (!%p633_p0)  ;;  %s12107_s26 = sld [smem:[#allocation23_spill]] (!%p633_p0) }
  0x2d   : > { %s8026_s27 = sshll.u32 (!%p633_p0), %s9449_s15, 6 }
  0x30   : > { %v731_v1 = vld [vmem:[%s12104_s4] sm:$0xff] (!%p633_p0)  ;;  %v732_v3 = vld [vmem:[%s12104_s4 + $0x8] sm:$0xff] (!%p633_p0)  ;;  %v733_v61 = vld [vmem:[%s12104_s4 + $0x10] sm:$0xff] (!%p633_p0) }
  0x31   : > { %v735_v2 = vld [vmem:[%s12104_s4 + $0x20] sm:$0xff] (!%p633_p0)  ;;  %v736_v5 = vld [vmem:[%s12104_s4 + $0x28] sm:$0xff] (!%p633_p0)  ;;  %v737_v62 = vld [vmem:[%s12104_s4 + $0x30] sm:$0xff] (!%p633_p0) }
  0x32   : > { %v7299_v4 = vcombine.high %v731_v1, %v735_v2  ;;  %v7298_v6 = vcombine.low %v731_v1, %v735_v2  ;;  %v739_v7 = vld [vmem:[%s12104_s4 + $0x40] sm:$0xff]  ;;  %v7301_v10 = vcombine.high %v732_v3, %v736_v5  ;;  %v7300_v11 = vcombine.low %v732_v3, %v736_v5  ;;  %v740_v13 = vld [vmem:[%s12104_s4 + $0x48] sm:$0xff]  ;;  %s9519_s5 = scalar_select %p708_p1, %s9449_s15, 2  ;;  %v734_v1 = vld [vmem:[%s12104_s4 + $0x18] sm:$0xff] }
  0x33   : > { %v743_v8 = vld [vmem:[%s12104_s4 + $0x60] sm:$0xff]  ;;  %v744_v14 = vld [vmem:[%s12104_s4 + $0x68] sm:$0xff]  ;;  %v738_v2 = vld [vmem:[%s12104_s4 + $0x38] sm:$0xff] }
  0x34   : > { %v7307_v12 = vcombine.high %v739_v7, %v743_v8  ;;  %v747_v15 = vld [vmem:[%s12104_s4 + $0x80] sm:$0xff]  ;;  %1121 = vmatprep.subr.bf16.mxu0 %v7299_v4  ;;  %v7309_v16 = vcombine.high %v740_v13, %v744_v14  ;;  %v748_v18 = vld [vmem:[%s12104_s4 + $0x88] sm:$0xff]  ;;  %1164 = vmatprep.subr.bf16.mxu1 %v7301_v10  ;;  %v7306_v20 = vcombine.low %v739_v7, %v743_v8  ;;  %s8024_s0 = sshll.u32 %s9519_s5, 3  ;;  %v741_v5 = vld [vmem:[%s12104_s4 + $0x50] sm:$0xff]  ;;  %s720_s22 = scalar_lea.vmem %s12071_s18, %s9519_s5 }
  0x35   : > { %v751_v17 = vld [vmem:[%s12104_s4 + $0xa0] sm:$0xff]  ;;  %v752_v19 = vld [vmem:[%s12104_s4 + $0xa8] sm:$0xff]  ;;  %1122 = vmatpush1.bf16.msra.mxu0 %v7298_v6  ;;  %1165 = vmatpush1.bf16.msra.mxu1 %v7300_v11  ;;  %v7308_v21 = vcombine.low %v740_v13, %v744_v14  ;;  %s9544_s30 = scalar_lea.vmem %s12105_s28, %s8024_s0  ;;  %s9555_s6 = scalar_lea.vmem %s12106_s17, %s8024_s0  ;;  %v745_v6 = vld [vmem:[%s12104_s4 + $0x70] sm:$0xff]  ;;  %v7303_v10 = vcombine.high %v733_v61, %v737_v62  ;;  %v7305_v13 = vcombine.high %v734_v1, %v738_v2 }
  0x36   : > { %1123 = vmatprep.subr.bf16.mxu0 %v7307_v12  ;;  %v7315_v22 = vcombine.high %v747_v15, %v751_v17  ;;  %1166 = vmatprep.subr.bf16.mxu1 %v7309_v16  ;;  %v7317_v23 = vcombine.high %v748_v18, %v752_v19  ;;  %v755_v24 = vld [vmem:[%s12104_s4 + $0xc0] sm:$0xff]  ;;  %v756_v26 = vld [vmem:[%s12104_s4 + $0xc8] sm:$0xff]  ;;  %v7314_v28 = vcombine.low %v747_v15, %v751_v17  ;;  %v742_v11 = vld [vmem:[%s12104_s4 + $0x58] sm:$0xff]  ;;  %s12109_s17 = sld [smem:[#allocation24_spill]]  ;;  %s7296_s29 = sshll.u32 %s9519_s5, 2 }
  0x37   : > { %v759_v25 = vld [vmem:[%s12104_s4 + $0xe0] sm:$0xff]  ;;  %v760_v27 = vld [vmem:[%s12104_s4 + $0xe8] sm:$0xff]  ;;  %v7316_v29 = vcombine.low %v748_v18, %v752_v19  ;;  %v746_v12 = vld [vmem:[%s12104_s4 + $0x78] sm:$0xff]  ;;  %v7302_v14 = vcombine.low %v733_v61, %v737_v62  ;;  %v7304_v17 = vcombine.low %v734_v1, %v738_v2  ;;  %v7311_v18 = vcombine.high %v741_v5, %v745_v6  ;;  %s724_s23 = scalar_lea.vmem %s12072_s20, %s7296_s29  ;;  %s11981_s5 = scalar_lea.hbm %s12073_s21, %s8026_s27 }
  0x38   : > { %v7323_v30 = vcombine.high %v755_v24, %v759_v25  ;;  %v763_v31 = vld [vmem:[%s12104_s4 + $0x100] sm:$0xff]  ;;  %v7325_v33 = vcombine.high %v756_v26, %v760_v27  ;;  %v764_v34 = vld [vmem:[%s12104_s4 + $0x108] sm:$0xff]  ;;  %v7322_v36 = vcombine.low %v755_v24, %v759_v25  ;;  %v7324_v37 = vcombine.low %v756_v26, %v760_v27  ;;  %v749_v15 = vld [vmem:[%s12104_s4 + $0x90] sm:$0xff] }
  0x39   : > { %1124 = vmatpush1.bf16.msra.mxu0 %v7306_v20  ;;  %1167 = vmatpush1.bf16.msra.mxu1 %v7308_v21  ;;  %v767_v32 = vld [vmem:[%s12104_s4 + $0x120] sm:$0xff]  ;;  %v768_v35 = vld [vmem:[%s12104_s4 + $0x128] sm:$0xff]  ;;  %v753_v16 = vld [vmem:[%s12104_s4 + $0xb0] sm:$0xff]  ;;  %v7313_v21 = vcombine.high %v742_v11, %v746_v12  ;;  %v7312_v25 = vcombine.low %v742_v11, %v746_v12 }
  0x3a   : > { %1125 = vmatprep.subr.bf16.mxu0 %v7315_v22  ;;  %1168 = vmatprep.subr.bf16.mxu1 %v7317_v23  ;;  %v7331_v38 = vcombine.high %v763_v31, %v767_v32  ;;  %v7333_v39 = vcombine.high %v764_v34, %v768_v35  ;;  %v771_v40 = vld [vmem:[%s12104_s4 + $0x140] sm:$0xff]  ;;  %v772_v42 = vld [vmem:[%s12104_s4 + $0x148] sm:$0xff]  ;;  %v7330_v44 = vcombine.low %v763_v31, %v767_v32  ;;  %v750_v19 = vld [vmem:[%s12104_s4 + $0x98] sm:$0xff] }
  0x3b   : > { %v775_v41 = vld [vmem:[%s12104_s4 + $0x160] sm:$0xff]  ;;  %v776_v43 = vld [vmem:[%s12104_s4 + $0x168] sm:$0xff]  ;;  %v7332_v45 = vcombine.low %v764_v34, %v768_v35  ;;  %v754_v20 = vld [vmem:[%s12104_s4 + $0xb8] sm:$0xff]  ;;  %v7310_v22 = vcombine.low %v741_v5, %v745_v6  ;;  %v7319_v26 = vcombine.high %v749_v15, %v753_v16 }
  0x3c   : > { %v7339_v46 = vcombine.high %v771_v40, %v775_v41  ;;  %v7341_v47 = vcombine.high %v772_v42, %v776_v43  ;;  %v779_v48 = vld [vmem:[%s12104_s4 + $0x180] sm:$0xff]  ;;  %v780_v50 = vld [vmem:[%s12104_s4 + $0x188] sm:$0xff]  ;;  %v7338_v52 = vcombine.low %v771_v40, %v775_v41  ;;  %v7340_v53 = vcombine.low %v772_v42, %v776_v43  ;;  %v757_v23 = vld [vmem:[%s12104_s4 + $0xd0] sm:$0xff] }
  0x3d   : > { %1126 = vmatpush1.bf16.msra.mxu0 %v7314_v28  ;;  %1169 = vmatpush1.bf16.msra.mxu1 %v7316_v29  ;;  %v783_v49 = vld [vmem:[%s12104_s4 + $0x1a0] sm:$0xff]  ;;  %v784_v51 = vld [vmem:[%s12104_s4 + $0x1a8] sm:$0xff]  ;;  %v761_v24 = vld [vmem:[%s12104_s4 + $0xf0] sm:$0xff]  ;;  %v7321_v29 = vcombine.high %v750_v19, %v754_v20 }
  0x3e   : > { %1127 = vmatprep.subr.bf16.mxu0 %v7323_v30  ;;  %1170 = vmatprep.subr.bf16.mxu1 %v7325_v33  ;;  %v7347_v54 = vcombine.high %v779_v48, %v783_v49  ;;  %v7349_v55 = vcombine.high %v780_v50, %v784_v51  ;;  %v787_v56 = vld [vmem:[%s12104_s4 + $0x1c0] sm:$0xff]  ;;  %v788_v58 = vld [vmem:[%s12104_s4 + $0x1c8] sm:$0xff]  ;;  %v7346_v60 = vcombine.low %v779_v48, %v783_v49  ;;  %v758_v27 = vld [vmem:[%s12104_s4 + $0xd8] sm:$0xff] }
  0x3f   : > { %v791_v57 = vld [vmem:[%s12104_s4 + $0x1e0] sm:$0xff]  ;;  %v792_v59 = vld [vmem:[%s12104_s4 + $0x1e8] sm:$0xff]  ;;  %v7348_v63 = vcombine.low %v780_v50, %v784_v51  ;;  %v762_v28 = vld [vmem:[%s12104_s4 + $0xf8] sm:$0xff]  ;;  %v7318_v30 = vcombine.low %v749_v15, %v753_v16  ;;  %v7320_v33 = vcombine.low %v750_v19, %v754_v20  ;;  %v7327_v34 = vcombine.high %v757_v23, %v761_v24 }
  0x40   : > { %v7355_v0 = vcombine.high %v787_v56, %v791_v57  ;;  %v7357_v3 = vcombine.high %v788_v58, %v792_v59  ;;  %v7354_v4 = vcombine.low %v787_v56, %v791_v57  ;;  %v7356_v7 = vcombine.low %v788_v58, %v792_v59  ;;  %v9612_v8 = vld [vmem:[%s9555_s6] sm:$0xff]   ;;  %v765_v31 = vld [vmem:[%s12104_s4 + $0x110] sm:$0xff]  ;;  %v766_v35 = vld [vmem:[%s12104_s4 + $0x118] sm:$0xff]  ;;  %s12108_s6 = sld [smem:[#allocation22_spill]] }
  0x41   : > { %1128 = vmatpush1.bf16.msra.mxu0 %v7322_v36  ;;  %1171 = vmatpush1.bf16.msra.mxu1 %v7324_v37  ;;  %v769_v32 = vld [vmem:[%s12104_s4 + $0x130] sm:$0xff]  ;;  %v770_v36 = vld [vmem:[%s12104_s4 + $0x138] sm:$0xff]  ;;  %v7329_v37 = vcombine.high %v758_v27, %v762_v28  ;;  %v7328_v41 = vcombine.low %v758_v27, %v762_v28 }
  0x42   : > { %1129 = vmatprep.subr.bf16.mxu0 %v7331_v38  ;;  %1172 = vmatprep.subr.bf16.mxu1 %v7333_v39  ;;  %v7326_v38 = vcombine.low %v757_v23, %v761_v24  ;;  %v773_v39 = vld [vmem:[%s12104_s4 + $0x150] sm:$0xff]  ;;  %v7335_v42 = vcombine.high %v765_v31, %v769_v32  ;;  %v774_v43 = vld [vmem:[%s12104_s4 + $0x158] sm:$0xff]  ;;  %v7336_v49 = vcombine.low %v766_v35, %v770_v36 }
  0x43   : > { %v777_v40 = vld [vmem:[%s12104_s4 + $0x170] sm:$0xff]  ;;  %v782_v51 = vld [vmem:[%s12104_s4 + $0x198] sm:$0xff] }
  0x44   : > { %v785_v48 = vld [vmem:[%s12104_s4 + $0x1b0] sm:$0xff]  ;;  %v7343_v50 = vcombine.high %v773_v39, %v777_v40  ;;  %v790_v59 = vld [vmem:[%s12104_s4 + $0x1d8] sm:$0xff] }
  0x45   : > { %1130 = vmatpush1.bf16.msra.mxu0 %v7330_v44  ;;  %1173 = vmatpush1.bf16.msra.mxu1 %v7332_v45  ;;  %v778_v44 = vld [vmem:[%s12104_s4 + $0x178] sm:$0xff]  ;;  %v7337_v45 = vcombine.high %v766_v35, %v770_v36  ;;  %v793_v56 = vld [vmem:[%s12104_s4 + $0x1f0] sm:$0xff] }
  0x46   : > { %1131 = vmatprep.subr.bf16.mxu0 %v7339_v46  ;;  %1174 = vmatprep.subr.bf16.mxu1 %v7341_v47  ;;  %v7334_v46 = vcombine.low %v765_v31, %v769_v32  ;;  %v781_v47 = vld [vmem:[%s12104_s4 + $0x190] sm:$0xff]  ;;  %v7344_v57 = vcombine.low %v774_v43, %v778_v44  ;;  %v8230_v32 = vld [vmem:[%s12107_s26 + $0x8] ss:$16 sps:$4 sm:$0xff]   ;;  %v8238_v35 = vld [vmem:[%s12107_s26 + $0x2c] ss:$16 sps:$4 sm:$0xff]  }
  0x47   : > { %v7351_v58 = vcombine.high %v781_v47, %v785_v48  ;;  %v7350_v62 = vcombine.low %v781_v47, %v785_v48  ;;  %v8229_v31 = vld [vmem:[%s12107_s26 + $0x4] ss:$16 sps:$4 sm:$0xff]   ;;  %v8233_v36 = vld [vmem:[%s12107_s26 + $0x20] ss:$16 sps:$4 sm:$0xff]   ;;  %v8256_v47 = vld [vmem:[%s12107_s26 + $0x8c] ss:$16 sps:$4 sm:$0xff]  }
  0x48   : > { %v8251_v48 = vld [vmem:[%s12107_s26 + $0x80] ss:$16 sps:$4 sm:$0xff]  }
  0x49   : > { %1132 = vmatpush1.bf16.msra.mxu0 %v7338_v52  ;;  %1175 = vmatpush1.bf16.msra.mxu1 %v7340_v53  ;;  %v786_v52 = vld [vmem:[%s12104_s4 + $0x1b8] sm:$0xff]  ;;  %v7345_v53 = vcombine.high %v774_v43, %v778_v44  ;;  %v8245_v44 = vld [vmem:[%s12107_s26 + $0x60] ss:$16 sps:$4 sm:$0xff]  }
  0x4a   : > { %1133 = vmatprep.subr.bf16.mxu0 %v7347_v54  ;;  %1176 = vmatprep.subr.bf16.mxu1 %v7349_v55  ;;  %v7342_v54 = vcombine.low %v773_v39, %v777_v40  ;;  %v789_v55 = vld [vmem:[%s12104_s4 + $0x1d0] sm:$0xff]  ;;  %v7353_v61 = vcombine.high %v782_v51, %v786_v52  ;;  %v8244_v39 = vld [vmem:[%s12107_s26 + $0x4c] ss:$16 sps:$4 sm:$0xff]  }
  0x4b   : > { %v7358_v2 = vcombine.low %v789_v55, %v793_v56  ;;  %v8239_v40 = vld [vmem:[%s12107_s26 + $0x40] ss:$16 sps:$4 sm:$0xff]   ;;  %v8250_v43 = vld [vmem:[%s12107_s26 + $0x6c] ss:$16 sps:$4 sm:$0xff]  }
  0x4d   : > { %1134 = vmatpush1.bf16.msra.mxu0 %v7346_v60  ;;  %1177 = vmatpush1.bf16.msra.mxu1 %v7348_v63  ;;  %v794_v60 = vld [vmem:[%s12104_s4 + $0x1f8] sm:$0xff]  ;;  %v7352_v63 = vcombine.low %v782_v51, %v786_v52  ;;  %v8257_v52 = vld [vmem:[%s12107_s26 + $0xa0] ss:$16 sps:$4 sm:$0xff]  }
  0x4e   : > { %1135 = vmatprep.subr.bf16.mxu0 %v7355_v0  ;;  %1178 = vmatprep.subr.bf16.mxu1 %v7357_v3  ;;  %v7359_v0 = vcombine.high %v789_v55, %v793_v56  ;;  %v7361_v1 = vcombine.high %v790_v59, %v794_v60  ;;  %v7360_v3 = vcombine.low %v790_v59, %v794_v60  ;;  %v8262_v51 = vld [vmem:[%s12107_s26 + $0xac] ss:$16 sps:$4 sm:$0xff]   ;;  %v8263_v56 = vld [vmem:[%s12107_s26 + $0xc0] ss:$16 sps:$4 sm:$0xff]  }
  0x4f   : > { %v8268_v55 = vld [vmem:[%s12107_s26 + $0xcc] ss:$16 sps:$4 sm:$0xff]   ;;  %v8269_v60 = vld [vmem:[%s12107_s26 + $0xe0] ss:$16 sps:$4 sm:$0xff]  }
  0x50   : > { %v8274_v59 = vld [vmem:[%s12107_s26 + $0xec] ss:$16 sps:$4 sm:$0xff]  }
  0x51   : > { %1136 = vmatpush1.bf16.msra.mxu0 %v7354_v4  ;;  %1179 = vmatpush1.bf16.msra.mxu1 %v7356_v7 }
  0x52   : > { %1207 = vmatprep.subr.bf16.mxu0 %v7303_v10  ;;  %1250 = vmatprep.subr.bf16.mxu1 %v7305_v13 }
  0x54   : > { %1154 = vmatmul.mubr.bf16.vlgmr.msra.gmra.mrb[0].mxu0 %v9612_v8  ;;  %1197 = vmatmul.mubr.bf16.vlgmr.msra.gmra.mrb[0].mxu1 %v9612_v8 }
  0x55   : > { %1208 = vmatpush1.bf16.msra.mxu0 %v7302_v14  ;;  %1251 = vmatpush1.bf16.msra.mxu1 %v7304_v17  ;;  %v8226_v14 = vld [vmem:[%s9544_s30] sm:$0xff]  }
  0x56   : > { %1209 = vmatprep.subr.bf16.mxu0 %v7311_v18  ;;  %1252 = vmatprep.subr.bf16.mxu1 %v7313_v21 }
  0x57   : > { %1239 = vmatprep.mubr.bf16.mxu0 %v9301_v9  ;;  %1282 = vmatprep.mubr.bf16.mxu1 %v9301_v9 }
  0x59   : > { %1210 = vmatpush1.bf16.msra.mxu0 %v7310_v22  ;;  %1253 = vmatpush1.bf16.msra.mxu1 %v7312_v25 }
  0x5a   : > { %1211 = vmatprep.subr.bf16.mxu0 %v7319_v26  ;;  %1254 = vmatprep.subr.bf16.mxu1 %v7321_v29 }
  0x5d   : > { %1212 = vmatpush1.bf16.msra.mxu0 %v7318_v30  ;;  %1255 = vmatpush1.bf16.msra.mxu1 %v7320_v33  ;;  %v8227_v30 = vld [vmem:[%s12107_s26] ss:$16 sps:$4 sm:$0xff]   ;;  %v8232_v33 = vld [vmem:[%s12107_s26 + $0xc] ss:$16 sps:$4 sm:$0xff]  }
  0x5e   : > { %1213 = vmatprep.subr.bf16.mxu0 %v7327_v34  ;;  %1256 = vmatprep.subr.bf16.mxu1 %v7329_v37  ;;  %v8235_v34 = vld [vmem:[%s12107_s26 + $0x24] ss:$16 sps:$4 sm:$0xff]   ;;  %v8236_v37 = vld [vmem:[%s12107_s26 + $0x28] ss:$16 sps:$4 sm:$0xff]  }
  0x61   : > { %1214 = vmatpush1.bf16.msra.mxu0 %v7326_v38  ;;  %1257 = vmatpush1.bf16.msra.mxu1 %v7328_v41  ;;  %v8241_v38 = vld [vmem:[%s12107_s26 + $0x44] ss:$16 sps:$4 sm:$0xff]   ;;  %v8242_v41 = vld [vmem:[%s12107_s26 + $0x48] ss:$16 sps:$4 sm:$0xff]  }
  0x62   : > { %1215 = vmatprep.subr.bf16.mxu0 %v7335_v42  ;;  %1258 = vmatprep.subr.bf16.mxu1 %v7337_v45  ;;  %v8247_v42 = vld [vmem:[%s12107_s26 + $0x64] ss:$16 sps:$4 sm:$0xff]   ;;  %v8248_v45 = vld [vmem:[%s12107_s26 + $0x68] ss:$16 sps:$4 sm:$0xff]  }
  0x65   : > { %1216 = vmatpush1.bf16.msra.mxu0 %v7334_v46  ;;  %1259 = vmatpush1.bf16.msra.mxu1 %v7336_v49  ;;  %v8253_v46 = vld [vmem:[%s12107_s26 + $0x84] ss:$16 sps:$4 sm:$0xff]   ;;  %v8254_v49 = vld [vmem:[%s12107_s26 + $0x88] ss:$16 sps:$4 sm:$0xff]  }
  0x66   : > { %1217 = vmatprep.subr.bf16.mxu0 %v7343_v50  ;;  %1260 = vmatprep.subr.bf16.mxu1 %v7345_v53  ;;  %v8259_v50 = vld [vmem:[%s12107_s26 + $0xa4] ss:$16 sps:$4 sm:$0xff]   ;;  %v8260_v53 = vld [vmem:[%s12107_s26 + $0xa8] ss:$16 sps:$4 sm:$0xff]  }
  0x69   : > { %1218 = vmatpush1.bf16.msra.mxu0 %v7342_v54  ;;  %1261 = vmatpush1.bf16.msra.mxu1 %v7344_v57  ;;  %v8265_v54 = vld [vmem:[%s12107_s26 + $0xc4] ss:$16 sps:$4 sm:$0xff]   ;;  %v8266_v57 = vld [vmem:[%s12107_s26 + $0xc8] ss:$16 sps:$4 sm:$0xff]  }
  0x6a   : > { %1219 = vmatprep.subr.bf16.mxu0 %v7351_v58  ;;  %1262 = vmatprep.subr.bf16.mxu1 %v7353_v61  ;;  %v8271_v58 = vld [vmem:[%s12107_s26 + $0xe4] ss:$16 sps:$4 sm:$0xff]   ;;  %v8272_v61 = vld [vmem:[%s12107_s26 + $0xe8] ss:$16 sps:$4 sm:$0xff]  }
  0x6d   : > { %1220 = vmatpush1.bf16.msra.mxu0 %v7350_v62  ;;  %1263 = vmatpush1.bf16.msra.mxu1 %v7352_v63  ;;  %v8277_v62 = vld [vmem:[%s12107_s26 + $0x104] ss:$16 sps:$4 sm:$0xff]   ;;  %v8280_v63 = vld [vmem:[%s12107_s26 + $0x10c] ss:$16 sps:$4 sm:$0xff]  }
  0x6e   : > { %1221 = vmatprep.subr.bf16.mxu0 %v7359_v0  ;;  %1264 = vmatprep.subr.bf16.mxu1 %v7361_v1  ;;  %v8275_v0 = vld [vmem:[%s12107_s26 + $0x100] ss:$16 sps:$4 sm:$0xff]   ;;  %v8278_v1 = vld [vmem:[%s12107_s26 + $0x108] ss:$16 sps:$4 sm:$0xff]  }
  0x71   : > { %1222 = vmatpush1.bf16.msra.mxu0 %v7358_v2  ;;  %1265 = vmatpush1.bf16.msra.mxu1 %v7360_v3  ;;  %v8283_v2 = vld [vmem:[%s12107_s26 + $0x124] ss:$16 sps:$4 sm:$0xff]   ;;  %v8286_v3 = vld [vmem:[%s12107_s26 + $0x12c] ss:$16 sps:$4 sm:$0xff]  }
  0x74   : > { %1240 = vmatmul.mubr.bf16.vlgmr.msra.gmra.mrb[4].mxu0 %v9612_v8  ;;  %1283 = vmatmul.mubr.bf16.vlgmr.msra.gmra.mrb[4].mxu1 %v9612_v8 }
  0x75   : > { %1470 = vmatprep.mubr.bf16.mxu0 %v9301_v9  ;;  %1384 = vmatprep.mubr.bf16.mxu1 %v9301_v9 }
 0x127   : > { %v1155_v4 = vpop.f32.mrb[0].mxu0  ;;  %v1198_v6 = vpop.f32.mrb[0].mxu1 }
 0x128   : > { %v1157_v5 = vpop.f32.mrb[1].mxu0  ;;  %v1200_v10 = vpop.f32.mrb[1].mxu1 }
 0x129   : > { %v1159_v7 = vpop.f32.mrb[2].mxu0  ;;  %v1202_v13 = vpop.f32.mrb[2].mxu1 }
 0x12a   : > { %v1293_v11 = vpack.c.bf16 %v1159_v7, %v1155_v4  ;;  %v1161_v12 = vpop.f32.mrb[3].mxu0  ;;  %v1295_v16 = vpack.c.bf16 %v1202_v13, %v1198_v6  ;;  %v1204_v17 = vpop.f32.mrb[3].mxu1  ;;  %v8281_v4 = vld [vmem:[%s12107_s26 + $0x120] ss:$16 sps:$4 sm:$0xff]   ;;  %v8289_v6 = vld [vmem:[%s12107_s26 + $0x144] ss:$16 sps:$4 sm:$0xff]  }
 0x12b   : > { %v1294_v15 = vpack.c.bf16 %v1161_v12, %v1157_v5  ;;  %v1296_v18 = vpack.c.bf16 %v1204_v17, %v1200_v10  ;;  %v8284_v5 = vld [vmem:[%s12107_s26 + $0x128] ss:$16 sps:$4 sm:$0xff]   ;;  %v8292_v7 = vld [vmem:[%s12107_s26 + $0x14c] ss:$16 sps:$4 sm:$0xff]   ;;  %v8287_v10 = vld [vmem:[%s12107_s26 + $0x140] ss:$16 sps:$4 sm:$0xff]  }
 0x12d   : > { %1352 = vmatprep.subr.bf16.mxu1 %v1294_v15  ;;  %v1303_v15 = vlaneseq }
 0x12e   : > { %1353 = vmatpush1.bf16.msra.mxu1 %v1293_v11  ;;  %v8290_v11 = vld [vmem:[%s12107_s26 + $0x148] ss:$16 sps:$4 sm:$0xff]  }
 0x12f   : > { %1395 = vmatprep.subr.bf16.mxu1 %v1296_v18  ;;  %v9840_v17 = vshrl.u32 %v1303_v15, 7  ;;  %vm5260_vm3 = vcmp.lt.s32.totalorder %v1303_v15, 512 }
 0x131   : > { %7363 = vmatmul.mubr.msk.bf16.vlgmr.msra.gmra.mrb[8].mxu1 %vm1348_vm0, %v8226_v14 }
 0x132   : > { %1396 = vmatpush1.bf16.msra.mxu1 %v1295_v16  ;;  %1427 = vmatprep.mubr.bf16.mxu1 %v9301_v9 }
 0x139   : > { %7364 = vmatmul.mubr.msk.bf16.vlgmr.msra.gmra.mrb[12].mxu1 %vm1348_vm0, %v8226_v14 }
 0x13a   : > { %1513 = vmatprep.mubr.bf16.mxu1 %v9301_v9 }
 0x147   : > { %v1241_v8 = vpop.f32.mrb[4].mxu0  ;;  %v1284_v19 = vpop.f32.mrb[4].mxu1 }
 0x148   : > { %v1243_v20 = vpop.f32.mrb[5].mxu0  ;;  %v1286_v21 = vpop.f32.mrb[5].mxu1 }
 0x149   : > { %v1245_v22 = vpop.f32.mrb[6].mxu0  ;;  %v1288_v24 = vpop.f32.mrb[6].mxu1 }
 0x14a   : > { %v1297_v23 = vpack.c.bf16 %v1245_v22, %v1241_v8  ;;  %v1247_v25 = vpop.f32.mrb[7].mxu0  ;;  %v1299_v26 = vpack.c.bf16 %v1288_v24, %v1284_v19  ;;  %v1290_v28 = vpop.f32.mrb[7].mxu1 }
 0x14b   : > { %v1298_v27 = vpack.c.bf16 %v1247_v25, %v1243_v20  ;;  %v1300_v29 = vpack.c.bf16 %v1290_v28, %v1286_v21  ;;  %v9843_v20 = vsub.s32 0, %v9840_v17  ;;  %v9846_v21 = vsub.s32 1, %v9840_v17 }
 0x14d   : > { %1438 = vmatprep.subr.bf16.mxu0 %v1298_v27  ;;  %1481 = vmatprep.subr.bf16.mxu1 %v1300_v29 }
 0x14e   : > { %1439 = vmatpush1.bf16.msra.mxu0 %v1297_v23  ;;  %1482 = vmatpush1.bf16.msra.mxu1 %v1299_v26  ;;  %v1301_v23 = vld [vmem:[%s12108_s6] sm:$0xff]  ;;  %v9854_v26 = vsub.s32 2, %v9840_v17 }
 0x14f   : > { %3138 = vmatprep.subr.bf16.mxu0 %v8229_v31  ;;  %3310 = vmatprep.subr.bf16.mxu1 %v8232_v33  ;;  %v1306_v24 = vrot.slane %v1301_v23, %v9843_v20  ;;  %v1310_v25 = vrot.slane %v1301_v23, %v9846_v21 }
 0x150   : > { %v1314_v29 = vrot.slane %v1301_v23, %v9854_v26 }
 0x151   : > { %7365 = vmatmul.mubr.msk.bf16.vlgmr.msra.gmra.mrb[8].mxu0 %vm1348_vm0, %v8226_v14  ;;  %7366 = vmatmul.mubr.msk.bf16.vlgmr.msra.gmra.mrb[16].mxu1 %vm1348_vm0, %v8226_v14 }
 0x152   : > { %3139 = vmatpush1.bf16.msra.mxu0 %v8227_v30  ;;  %3311 = vmatpush1.bf16.msra.mxu1 %v8230_v32  ;;  %v9862_v30 = vsub.s32 3, %v9840_v17 }
 0x153   : > { %3140 = vmatprep.subr.bf16.mxu0 %v8235_v34  ;;  %3312 = vmatprep.subr.bf16.mxu1 %v8238_v35 }
 0x156   : > { %3141 = vmatpush1.bf16.msra.mxu0 %v8233_v36  ;;  %3313 = vmatpush1.bf16.msra.mxu1 %v8236_v37  ;;  %v1318_v36 = vrot.slane %v1301_v23, %v9862_v30 }
 0x157   : > { %3142 = vmatprep.subr.bf16.mxu0 %v8241_v38  ;;  %3314 = vmatprep.subr.bf16.mxu1 %v8244_v39 }
 0x15a   : > { %3143 = vmatpush1.bf16.msra.mxu0 %v8239_v40  ;;  %3315 = vmatpush1.bf16.msra.mxu1 %v8242_v41  ;;  %v9882_v40 = vsub.s32 4, %v9840_v17  ;;  %v1325_v41 = vsub.s32 5, %v9840_v17 }
 0x15b   : > { %3144 = vmatprep.subr.bf16.mxu0 %v8247_v42  ;;  %3316 = vmatprep.subr.bf16.mxu1 %v8250_v43  ;;  %v1329_v42 = vsub.s32 6, %v9840_v17 }
 0x15e   : > { %3145 = vmatpush1.bf16.msra.mxu0 %v8245_v44  ;;  %3317 = vmatpush1.bf16.msra.mxu1 %v8248_v45 }
 0x15f   : > { %3146 = vmatprep.subr.bf16.mxu0 %v8253_v46  ;;  %3318 = vmatprep.subr.bf16.mxu1 %v8256_v47 }
 0x162   : > { %3147 = vmatpush1.bf16.msra.mxu0 %v8251_v48  ;;  %3319 = vmatpush1.bf16.msra.mxu1 %v8254_v49  ;;  %v1333_v49 = vsub.s32 7, %v9840_v17 }
 0x163   : > { %3148 = vmatprep.subr.bf16.mxu0 %v8259_v50  ;;  %3320 = vmatprep.subr.bf16.mxu1 %v8262_v51  ;;  %v1322_v50 = vrot.slane %v1301_v23, %v9882_v40  ;;  %v1326_v51 = vrot.slane %v1301_v23, %v1325_v41 }
 0x166   : > { %3149 = vmatpush1.bf16.msra.mxu0 %v8257_v52  ;;  %3321 = vmatpush1.bf16.msra.mxu1 %v8260_v53  ;;  %v1330_v52 = vrot.slane %v1301_v23, %v1329_v42  ;;  %v8293_v42 = vld [vmem:[%s12107_s26 + $0x160] ss:$16 sps:$4 sm:$0xff]  }
 0x167   : > { %3150 = vmatprep.subr.bf16.mxu0 %v8265_v54  ;;  %3322 = vmatprep.subr.bf16.mxu1 %v8268_v55 }
 0x16a   : > { %3151 = vmatpush1.bf16.msra.mxu0 %v8263_v56  ;;  %3323 = vmatpush1.bf16.msra.mxu1 %v8266_v57 }
 0x16b   : > { %3152 = vmatprep.subr.bf16.mxu0 %v8271_v58  ;;  %3324 = vmatprep.subr.bf16.mxu1 %v8274_v59  ;;  %v1334_v58 = vrot.slane %v1301_v23, %v1333_v49  ;;  %v8301_v49 = vld [vmem:[%s12107_s26 + $0x184] ss:$16 sps:$4 sm:$0xff]  }
 0x16e   : > { %3153 = vmatpush1.bf16.msra.mxu0 %v8269_v60  ;;  %3325 = vmatpush1.bf16.msra.mxu1 %v8272_v61 }
 0x16f   : > { %3154 = vmatprep.subr.bf16.mxu0 %v8277_v62  ;;  %3326 = vmatprep.subr.bf16.mxu1 %v8280_v63 }
 0x172   : > { %3155 = vmatpush1.bf16.msra.mxu0 %v8275_v0  ;;  %3327 = vmatpush1.bf16.msra.mxu1 %v8278_v1 }
 0x173   : > { %3156 = vmatprep.subr.bf16.mxu0 %v8283_v2  ;;  %3328 = vmatprep.subr.bf16.mxu1 %v8286_v3 }
 0x176   : > { %3157 = vmatpush1.bf16.msra.mxu0 %v8281_v4  ;;  %3329 = vmatpush1.bf16.msra.mxu1 %v8284_v5 }
 0x177   : > { %3158 = vmatprep.subr.bf16.mxu0 %v8289_v6  ;;  %3330 = vmatprep.subr.bf16.mxu1 %v8292_v7 }
 0x17a   : > { %3159 = vmatpush1.bf16.msra.mxu0 %v8287_v10  ;;  %3331 = vmatpush1.bf16.msra.mxu1 %v8290_v11 }
 0x204   : > { %v1386_v12 = vpop.f32.mrb[8].mxu1 }
 0x205   : > { %v1388_v13 = vpop.f32.mrb[9].mxu1  ;;  %v9856_v27 = vadd.f32 %v1386_v12, %v1306_v24 }
 0x206   : > { %v1390_v14 = vpop.f32.mrb[10].mxu1  ;;  %v9858_v28 = vadd.f32 %v1388_v13, %v1310_v25 }
 0x207   : > { %v1392_v16 = vpop.f32.mrb[11].mxu1  ;;  %v9864_v31 = vadd.f32 %v1390_v14, %v1306_v24  ;;  %v1524_v33 = vmul.f32 %v9856_v27, %v9856_v27 }
 0x208   : > { %v9866_v32 = vadd.f32 %v1392_v16, %v1310_v25  ;;  %v1525_v34 = vmul.f32 %v9858_v28, %v9858_v28 }
 0x209   : > { %v1532_v37 = vmul.f32 %v9864_v31, %v9864_v31 }
 0x20a   : > { %v1533_v38 = vmul.f32 %v9866_v32, %v9866_v32  ;;  %v1540_v43 = vadd.f32 %v1525_v34, %v1524_v33 }
 0x20c   : > { %v1429_v18 = vpop.f32.mrb[12].mxu1  ;;  %v1549_v46 = vadd.f32 %v1533_v38, %v1532_v37 }
 0x20d   : > { %v1431_v8 = vpop.f32.mrb[13].mxu1  ;;  %v9872_v35 = vadd.f32 %v1429_v18, %v1314_v29 }
 0x20e   : > { %v1433_v19 = vpop.f32.mrb[14].mxu1  ;;  %v9888_v45 = vadd.f32 %v1431_v8, %v1318_v36 }
 0x20f   : > { %v1435_v22 = vpop.f32.mrb[15].mxu1  ;;  %v9879_v39 = vadd.f32 %v1433_v19, %v1314_v29  ;;  %v1526_v44 = vmul.f32 %v9872_v35, %v9872_v35 }
 0x210   : > { %v9892_v48 = vadd.f32 %v1435_v22, %v1318_v36  ;;  %v1527_v54 = vmul.f32 %v9888_v45, %v9888_v45 }
 0x211   : > { %v1534_v47 = vmul.f32 %v9879_v39, %v9879_v39  ;;  %v1541_v53 = vadd.f32 %v1540_v43, %v1526_v44  ;;  %v8295_v43 = vld [vmem:[%s12107_s26 + $0x164] ss:$16 sps:$4 sm:$0xff]   ;;  %v8296_v44 = vld [vmem:[%s12107_s26 + $0x168] ss:$16 sps:$4 sm:$0xff]  }
 0x212   : > { %v1535_v56 = vmul.f32 %v9892_v48, %v9892_v48  ;;  %3160 = vmatprep.subr.bf16.mxu0 %v8295_v43 }
 0x213   : > { %v1550_v55 = vadd.f32 %v1549_v46, %v1534_v47  ;;  %v1542_v2 = vadd.f32 %v1541_v53, %v1527_v54  ;;  %v8298_v46 = vld [vmem:[%s12107_s26 + $0x16c] ss:$16 sps:$4 sm:$0xff]   ;;  %3161 = vmatpush1.bf16.msra.mxu0 %v8293_v42  ;;  %v8299_v47 = vld [vmem:[%s12107_s26 + $0x180] ss:$16 sps:$4 sm:$0xff]  }
 0x214   : > { %3332 = vmatprep.subr.bf16.mxu1 %v8298_v46  ;;  %3162 = vmatprep.subr.bf16.mxu0 %v8301_v49  ;;  %v8310_v53 = vld [vmem:[%s12107_s26 + $0x1ac] ss:$16 sps:$4 sm:$0xff]   ;;  %v8305_v54 = vld [vmem:[%s12107_s26 + $0x1a0] ss:$16 sps:$4 sm:$0xff]  }
 0x215   : > { %v1551_v7 = vadd.f32 %v1550_v55, %v1535_v56  ;;  %3333 = vmatpush1.bf16.msra.mxu1 %v8296_v44  ;;  %v8308_v55 = vld [vmem:[%s12107_s26 + $0x1a8] ss:$16 sps:$4 sm:$0xff]   ;;  %v8313_v56 = vld [vmem:[%s12107_s26 + $0x1c4] ss:$16 sps:$4 sm:$0xff]  }
 0x217   : > { %3163 = vmatpush1.bf16.msra.mxu0 %v8299_v47 }
 0x224   : > { %v1472_v57 = vpop.f32.mrb[8].mxu0  ;;  %v1515_v61 = vpop.f32.mrb[16].mxu1 }
 0x225   : > { %v9900_v59 = vadd.f32 %v1472_v57, %v1322_v50  ;;  %v1474_v60 = vpop.f32.mrb[9].mxu0  ;;  %v9904_v63 = vadd.f32 %v1515_v61, %v1330_v52  ;;  %v1517_v1 = vpop.f32.mrb[17].mxu1  ;;  %v8316_v57 = vld [vmem:[%s12107_s26 + $0x1cc] ss:$16 sps:$4 sm:$0xff]   ;;  %v8319_v61 = vld [vmem:[%s12107_s26 + $0x1e4] ss:$16 sps:$4 sm:$0xff]  }
 0x226   : > { %v9902_v62 = vadd.f32 %v1474_v60, %v1326_v51  ;;  %v1476_v0 = vpop.f32.mrb[10].mxu0  ;;  %v1519_v6 = vpop.f32.mrb[18].mxu1  ;;  %v9912_v11 = vadd.f32 %v1517_v1, %v1334_v58  ;;  %v8314_v60 = vld [vmem:[%s12107_s26 + $0x1c8] ss:$16 sps:$4 sm:$0xff]   ;;  %v8317_v1 = vld [vmem:[%s12107_s26 + $0x1e0] ss:$16 sps:$4 sm:$0xff]  }
 0x227   : > { %v1528_v3 = vmul.f32 %v9900_v59, %v9900_v59  ;;  %v9908_v4 = vadd.f32 %v1476_v0, %v1322_v50  ;;  %v1478_v5 = vpop.f32.mrb[11].mxu0  ;;  %v1521_v13 = vpop.f32.mrb[19].mxu1  ;;  %v1530_v16 = vmul.f32 %v9904_v63, %v9904_v63  ;;  %v9920_v8 = vadd.f32 %v1519_v6, %v1330_v52  ;;  %v8302_v50 = vld [vmem:[%s12107_s26 + $0x188] ss:$16 sps:$4 sm:$0xff]   ;;  %v8307_v52 = vld [vmem:[%s12107_s26 + $0x1a4] ss:$16 sps:$4 sm:$0xff]  }
 0x228   : > { %v1529_v10 = vmul.f32 %v9902_v62, %v9902_v62  ;;  %v9914_v12 = vadd.f32 %v1478_v5, %v1326_v51  ;;  %v9924_v24 = vadd.f32 %v1521_v13, %v1334_v58  ;;  %v1531_v33 = vmul.f32 %v9912_v11, %v9912_v11  ;;  %v8304_v51 = vld [vmem:[%s12107_s26 + $0x18c] ss:$16 sps:$4 sm:$0xff]   ;;  %3164 = vmatprep.subr.bf16.mxu0 %v8307_v52  ;;  %v8311_v58 = vld [vmem:[%s12107_s26 + $0x1c0] ss:$16 sps:$4 sm:$0xff]  }
 0x229   : > { %v1543_v14 = vadd.f32 %v1542_v2, %v1528_v3  ;;  %v1536_v18 = vmul.f32 %v9908_v4, %v9908_v4  ;;  %v1538_v29 = vmul.f32 %v9920_v8, %v9920_v8  ;;  %3334 = vmatprep.subr.bf16.mxu1 %v8304_v51  ;;  %3165 = vmatpush1.bf16.msra.mxu0 %v8305_v54  ;;  %v8322_v0 = vld [vmem:[%s12107_s26 + $0x1ec] ss:$16 sps:$4 sm:$0xff]   ;;  %v8320_v2 = vld [vmem:[%s12107_s26 + $0x1e8] ss:$16 sps:$4 sm:$0xff]   ;;  %v8325_v3 = vld [vmem:[%s12107_s26 + $0x204] ss:$16 sps:$4 sm:$0xff]  }
 0x22a   : > { %v1537_v19 = vmul.f32 %v9914_v12, %v9914_v12  ;;  %v1539_v38 = vmul.f32 %v9924_v24, %v9924_v24  ;;  %3335 = vmatpush1.bf16.msra.mxu1 %v8302_v50  ;;  %3166 = vmatprep.subr.bf16.mxu0 %v8313_v56  ;;  %v8328_v5 = vld [vmem:[%s12107_s26 + $0x20c] ss:$16 sps:$4 sm:$0xff]  }
 0x22b   : > { %v1552_v22 = vadd.f32 %v1551_v7, %v1536_v18  ;;  %v1544_v23 = vadd.f32 %v1543_v14, %v1529_v10  ;;  %3336 = vmatprep.subr.bf16.mxu1 %v8310_v53 }
 0x22d   : > { %v1553_v25 = vadd.f32 %v1552_v22, %v1537_v19  ;;  %v1545_v34 = vadd.f32 %v1544_v23, %v1530_v16  ;;  %3167 = vmatpush1.bf16.msra.mxu0 %v8311_v58  ;;  %v8334_v58 = vld [vmem:[%s12107_s26 + $0x22c] ss:$16 sps:$4 sm:$0xff]  }
 0x22e   : > { %3337 = vmatpush1.bf16.msra.mxu1 %v8308_v55  ;;  %3168 = vmatprep.subr.bf16.mxu0 %v8319_v61  ;;  %v8329_v61 = vld [vmem:[%s12107_s26 + $0x220] ss:$16 sps:$4 sm:$0xff]  }
 0x22f   : > { %v1546_v36 = vadd.f32 %v1545_v34, %v1531_v33  ;;  %v1554_v37 = vadd.f32 %v1553_v25, %v1538_v29  ;;  %3338 = vmatprep.subr.bf16.mxu1 %v8316_v57  ;;  %v8331_v57 = vld [vmem:[%s12107_s26 + $0x224] ss:$16 sps:$4 sm:$0xff]  }
 0x231   : > { %1547 = vadd.xlane.f32.xlu0 %v1546_v36  ;;  %v1555_v41 = vadd.f32 %v1554_v37, %v1539_v38  ;;  %3169 = vmatpush1.bf16.msra.mxu0 %v8317_v1  ;;  %v8337_v1 = vld [vmem:[%s12107_s26 + $0x244] ss:$16 sps:$4 sm:$0xff]  }
 0x232   : > { %3339 = vmatpush1.bf16.msra.mxu1 %v8314_v60  ;;  %3181 = vmatprep.subr.bf16.mxu0 %v8325_v3  ;;  %v8335_v3 = vld [vmem:[%s12107_s26 + $0x240] ss:$16 sps:$4 sm:$0xff]  }
 0x233   : > { %3340 = vmatprep.subr.bf16.mxu1 %v8322_v0  ;;  %v8332_v0 = vld [vmem:[%s12107_s26 + $0x228] ss:$16 sps:$4 sm:$0xff]  }
 0x235   : > { %1556 = vadd.xlane.f32.xlu0 %v1555_v41 }
 0x236   : > { %3341 = vmatpush1.bf16.msra.mxu1 %v8320_v2  ;;  %v8340_v2 = vld [vmem:[%s12107_s26 + $0x24c] ss:$16 sps:$4 sm:$0xff]  }
 0x237   : > { %3353 = vmatprep.subr.bf16.mxu1 %v8328_v5  ;;  %v8338_v5 = vld [vmem:[%s12107_s26 + $0x248] ss:$16 sps:$4 sm:$0xff]  }
 0x2be   : > { %v1548_v6 = vpop.xlane.xlu0 %1547 }
 0x2bf   : > { %v1558_v7 = vmax.f32 %v1548_v6, 1e-24  ;;  %v8343_v6 = vld [vmem:[%s12107_s26 + $0x264] ss:$16 sps:$4 sm:$0xff]  }
 0x2c1   : > { %9163 = vrsqrt.f32 %v1558_v7  ;;  %v8346_v7 = vld [vmem:[%s12107_s26 + $0x26c] ss:$16 sps:$4 sm:$0xff]  }
 0x2c2   : > { %v1557_v10 = vpop.xlane.xlu0 %1556 }
 0x2c3   : > { %v1559_v13 = vmax.f32 %v1557_v10, 1e-24  ;;  %v8341_v10 = vld [vmem:[%s12107_s26 + $0x260] ss:$16 sps:$4 sm:$0xff]  }
 0x2c5   : > { %9165 = vrsqrt.f32 %v1559_v13  ;;  %v8344_v13 = vld [vmem:[%s12107_s26 + $0x268] ss:$16 sps:$4 sm:$0xff]  }
 0x2cb   : > { %v9164_v14 = vpop.eup %9163 }
 0x2cc   : > { %v1563_v16 = vmul.f32 %v9164_v14, %v9858_v28  ;;  %v1562_v18 = vmul.f32 %v9164_v14, %v9856_v27  ;;  %v1564_v19 = vmul.f32 %v9164_v14, %v9872_v35  ;;  %v1567_v22 = vmul.f32 %v9164_v14, %v9902_v62 }
 0x2cd   : > { %v1566_v23 = vmul.f32 %v9164_v14, %v9900_v59  ;;  %v1569_v25 = vmul.f32 %v9164_v14, %v9912_v11  ;;  %v1568_v29 = vmul.f32 %v9164_v14, %v9904_v63  ;;  %v1565_v36 = vmul.f32 %v9164_v14, %v9888_v45  ;;  %v8349_v14 = vld [vmem:[%s12107_s26 + $0x284] ss:$16 sps:$4 sm:$0xff]  }
 0x2ce   : > { %v1579_v33 = vmax.f32 %v1563_v16, 0.0  ;;  %v1578_v34 = vmax.f32 %v1562_v18, 0.0  ;;  %v1580_v37 = vmax.f32 %v1564_v19, 0.0  ;;  %v1583_v41 = vmax.f32 %v1567_v22, 0.0  ;;  %v8352_v16 = vld [vmem:[%s12107_s26 + $0x28c] ss:$16 sps:$4 sm:$0xff]  }
 0x2cf   : > { %v9166_v38 = vpop.eup %9165  ;;  %v1582_v28 = vmax.f32 %v1566_v23, 0.0  ;;  %v1585_v42 = vmax.f32 %v1569_v25, 0.0  ;;  %v1584_v27 = vmax.f32 %v1568_v29, 0.0  ;;  %v8347_v18 = vld [vmem:[%s12107_s26 + $0x280] ss:$16 sps:$4 sm:$0xff]  }
 0x2d0   : > { %v1571_v35 = vmul.f32 %v9166_v38, %v9866_v32  ;;  %v1570_v62 = vmul.f32 %v9166_v38, %v9864_v31  ;;  %v1573_v59 = vmul.f32 %v9166_v38, %v9892_v48  ;;  %v1572_v11 = vmul.f32 %v9166_v38, %v9879_v39  ;;  %v8323_v39 = vld [vmem:[%s12107_s26 + $0x200] ss:$16 sps:$4 sm:$0xff]   ;;  %v8326_v48 = vld [vmem:[%s12107_s26 + $0x208] ss:$16 sps:$4 sm:$0xff]   ;;  %v8355_v22 = vld [vmem:[%s12107_s26 + $0x2a4] ss:$16 sps:$4 sm:$0xff]  }
 0x2d1   : > { %v1575_v63 = vmul.f32 %v9166_v38, %v9914_v12  ;;  %v1574_v43 = vmul.f32 %v9166_v38, %v9908_v4  ;;  %v1577_v45 = vmul.f32 %v9166_v38, %v9924_v24  ;;  %v1576_v44 = vmul.f32 %v9166_v38, %v9920_v8  ;;  %v8350_v19 = vld [vmem:[%s12107_s26 + $0x288] ss:$16 sps:$4 sm:$0xff]   ;;  %v8358_v23 = vld [vmem:[%s12107_s26 + $0x2ac] ss:$16 sps:$4 sm:$0xff]   ;;  %v8353_v25 = vld [vmem:[%s12107_s26 + $0x2a0] ss:$16 sps:$4 sm:$0xff]  }
 0x2d2   : > { %v1587_v46 = vmax.f32 %v1571_v35, 0.0  ;;  %v1586_v47 = vmax.f32 %v1570_v62, 0.0  ;;  %v1589_v49 = vmax.f32 %v1573_v59, 0.0  ;;  %v1588_v50 = vmax.f32 %v1572_v11, 0.0  ;;  %v8356_v29 = vld [vmem:[%s12107_s26 + $0x2a8] ss:$16 sps:$4 sm:$0xff]  }
 0x2d3   : > { %v1591_v51 = vmax.f32 %v1575_v63, 0.0  ;;  %v1590_v32 = vmax.f32 %v1574_v43, 0.0  ;;  %v1593_v52 = vmax.f32 %v1577_v45, 0.0  ;;  %v1592_v31 = vmax.f32 %v1576_v44, 0.0  ;;  %v8367_v38 = vld [vmem:[%s12107_s26 + $0x2e4] ss:$16 sps:$4 sm:$0xff]  }
 0x2d4   : > { %v1595_v53 = vpack.c.bf16 %v1587_v46, %v1579_v33  ;;  %v1594_v4 = vpack.c.bf16 %v1586_v47, %v1578_v34  ;;  %v1581_v12 = vmax.f32 %v1565_v36, 0.0  ;;  %v10020_v8 = vpack.c.bf16 %v1588_v50, %v1580_v37  ;;  %v8361_v33 = vld [vmem:[%s12107_s26 + $0x2c4] ss:$16 sps:$4 sm:$0xff]   ;;  %v8364_v34 = vld [vmem:[%s12107_s26 + $0x2cc] ss:$16 sps:$4 sm:$0xff]  }
 0x2d5   : > { %v10022_v24 = vpack.c.bf16 %v1591_v51, %v1583_v41  ;;  %v10024_v54 = vpack.c.bf16 %v1590_v32, %v1582_v28  ;;  %v10026_v55 = vpack.c.bf16 %v1593_v52, %v1585_v42  ;;  %v10028_v56 = vpack.c.bf16 %v1592_v31, %v1584_v27  ;;  %v8359_v36 = vld [vmem:[%s12107_s26 + $0x2c0] ss:$16 sps:$4 sm:$0xff]   ;;  %v8362_v37 = vld [vmem:[%s12107_s26 + $0x2c8] ss:$16 sps:$4 sm:$0xff]   ;;  %v8370_v41 = vld [vmem:[%s12107_s26 + $0x2ec] ss:$16 sps:$4 sm:$0xff]  }
 0x2d6   : > { %3170 = vmatprep.mubr.bf16.mxu0 %v1595_v53  ;;  %3342 = vmatprep.mubr.bf16.mxu1 %v1595_v53  ;;  %v1597_v60 = vpack.c.bf16 %v1589_v49, %v1581_v12  ;;  %v8365_v28 = vld [vmem:[%s12107_s26 + $0x2e0] ss:$16 sps:$4 sm:$0xff]   ;;  %v8368_v42 = vld [vmem:[%s12107_s26 + $0x2e8] ss:$16 sps:$4 sm:$0xff]   ;;  %v8373_v27 = vld [vmem:[%s12107_s26 + $0x304] ss:$16 sps:$4 sm:$0xff]  }
 0x2d7   : > { %3171 = vmatmul.mubr.bf16.vlgmr.msra.gmra.mrb[12].mxu0 %v1594_v4  ;;  %3343 = vmatmul.mubr.bf16.vlgmr.msra.gmra.mrb[20].mxu1 %v1594_v4  ;;  %v8376_v35 = vld [vmem:[%s12107_s26 + $0x30c] ss:$16 sps:$4 sm:$0xff]   ;;  %v8371_v62 = vld [vmem:[%s12107_s26 + $0x300] ss:$16 sps:$4 sm:$0xff]   ;;  %v8374_v59 = vld [vmem:[%s12107_s26 + $0x308] ss:$16 sps:$4 sm:$0xff]  }
 0x2d8   : > { %3182 = vmatpush1.bf16.msra.mxu0 %v8323_v39  ;;  %3354 = vmatpush1.bf16.msra.mxu1 %v8326_v48  ;;  %v8379_v11 = vld [vmem:[%s12107_s26 + $0x324] ss:$16 sps:$4 sm:$0xff]   ;;  %v8382_v63 = vld [vmem:[%s12107_s26 + $0x32c] ss:$16 sps:$4 sm:$0xff]   ;;  %v8377_v43 = vld [vmem:[%s12107_s26 + $0x320] ss:$16 sps:$4 sm:$0xff]  }
 0x2d9   : > { %3213 = vmatprep.mubr.bf16.mxu0 %v1597_v60  ;;  %3385 = vmatprep.mubr.bf16.mxu1 %v1597_v60  ;;  %v8380_v45 = vld [vmem:[%s12107_s26 + $0x328] ss:$16 sps:$4 sm:$0xff]   ;;  %v8385_v44 = vld [vmem:[%s12107_s26 + $0x344] ss:$16 sps:$4 sm:$0xff]   ;;  %v8388_v46 = vld [vmem:[%s12107_s26 + $0x34c] ss:$16 sps:$4 sm:$0xff]  }
 0x2da   : > { %3183 = vmatprep.subr.bf16.mxu0 %v8331_v57  ;;  %3355 = vmatprep.subr.bf16.mxu1 %v8334_v58  ;;  %v8383_v47 = vld [vmem:[%s12107_s26 + $0x340] ss:$16 sps:$4 sm:$0xff]   ;;  %v8386_v49 = vld [vmem:[%s12107_s26 + $0x348] ss:$16 sps:$4 sm:$0xff]   ;;  %v8391_v50 = vld [vmem:[%s12107_s26 + $0x364] ss:$16 sps:$4 sm:$0xff]  }
 0x2db   : > { %v8394_v51 = vld [vmem:[%s12107_s26 + $0x36c] ss:$16 sps:$4 sm:$0xff]   ;;  %v8389_v32 = vld [vmem:[%s12107_s26 + $0x360] ss:$16 sps:$4 sm:$0xff]   ;;  %v8392_v52 = vld [vmem:[%s12107_s26 + $0x368] ss:$16 sps:$4 sm:$0xff]  }
 0x2dc   : > { %3184 = vmatpush1.bf16.msra.mxu0 %v8329_v61  ;;  %3356 = vmatpush1.bf16.msra.mxu1 %v8332_v0  ;;  %v8397_v31 = vld [vmem:[%s12107_s26 + $0x384] ss:$16 sps:$4 sm:$0xff]   ;;  %v8400_v53 = vld [vmem:[%s12107_s26 + $0x38c] ss:$16 sps:$4 sm:$0xff]   ;;  %v8395_v39 = vld [vmem:[%s12107_s26 + $0x380] ss:$16 sps:$4 sm:$0xff]  }
 0x2dd   : > { %3185 = vmatprep.subr.bf16.mxu0 %v8337_v1  ;;  %3357 = vmatprep.subr.bf16.mxu1 %v8340_v2  ;;  %v8398_v48 = vld [vmem:[%s12107_s26 + $0x388] ss:$16 sps:$4 sm:$0xff]   ;;  %v8403_v4 = vld [vmem:[%s12107_s26 + $0x3a4] ss:$16 sps:$4 sm:$0xff]   ;;  %v8406_v12 = vld [vmem:[%s12107_s26 + $0x3ac] ss:$16 sps:$4 sm:$0xff]  }
 0x2de   : > { %v8401_v57 = vld [vmem:[%s12107_s26 + $0x3a0] ss:$16 sps:$4 sm:$0xff]   ;;  %v8404_v58 = vld [vmem:[%s12107_s26 + $0x3a8] ss:$16 sps:$4 sm:$0xff]   ;;  %v8409_v60 = vld [vmem:[%s12107_s26 + $0x3c4] ss:$16 sps:$4 sm:$0xff]  }
 0x2df   : > { %v8412_v61 = vld [vmem:[%s12107_s26 + $0x3cc] ss:$16 sps:$4 sm:$0xff]   ;;  %v8407_v0 = vld [vmem:[%s12107_s26 + $0x3c0] ss:$16 sps:$4 sm:$0xff]   ;;  %v8410_v1 = vld [vmem:[%s12107_s26 + $0x3c8] ss:$16 sps:$4 sm:$0xff]  }
 0x2e0   : > { %3186 = vmatpush1.bf16.msra.mxu0 %v8335_v3  ;;  %3358 = vmatpush1.bf16.msra.mxu1 %v8338_v5  ;;  %v8415_v2 = vld [vmem:[%s12107_s26 + $0x3e4] ss:$16 sps:$4 sm:$0xff]   ;;  %v8418_v3 = vld [vmem:[%s12107_s26 + $0x3ec] ss:$16 sps:$4 sm:$0xff]   ;;  %v8413_v5 = vld [vmem:[%s12107_s26 + $0x3e0] ss:$16 sps:$4 sm:$0xff]  }
 0x2e1   : > { %3187 = vmatprep.subr.bf16.mxu0 %v8343_v6  ;;  %3359 = vmatprep.subr.bf16.mxu1 %v8346_v7  ;;  %v8416_v6 = vld [vmem:[%s12107_s26 + $0x3e8] ss:$16 sps:$4 sm:$0xff]   ;;  %v8421_v7 = vld [vmem:[%s12107_s26 + $0x404] ss:$16 sps:$4 sm:$0xff]  }
 0x2e4   : > { %3188 = vmatpush1.bf16.msra.mxu0 %v8341_v10  ;;  %3360 = vmatpush1.bf16.msra.mxu1 %v8344_v13  ;;  %v8424_v10 = vld [vmem:[%s12107_s26 + $0x40c] ss:$16 sps:$4 sm:$0xff]   ;;  %v8419_v13 = vld [vmem:[%s12107_s26 + $0x400] ss:$16 sps:$4 sm:$0xff]  }
 0x2e5   : > { %3189 = vmatprep.subr.bf16.mxu0 %v8349_v14  ;;  %3361 = vmatprep.subr.bf16.mxu1 %v8352_v16  ;;  %v8422_v14 = vld [vmem:[%s12107_s26 + $0x408] ss:$16 sps:$4 sm:$0xff]   ;;  %v8427_v16 = vld [vmem:[%s12107_s26 + $0x424] ss:$16 sps:$4 sm:$0xff]  }
 0x2e8   : > { %3190 = vmatpush1.bf16.msra.mxu0 %v8347_v18  ;;  %3362 = vmatpush1.bf16.msra.mxu1 %v8350_v19  ;;  %v8430_v18 = vld [vmem:[%s12107_s26 + $0x42c] ss:$16 sps:$4 sm:$0xff]   ;;  %v8425_v19 = vld [vmem:[%s12107_s26 + $0x420] ss:$16 sps:$4 sm:$0xff]  }
 0x2e9   : > { %3191 = vmatprep.subr.bf16.mxu0 %v8355_v22  ;;  %3363 = vmatprep.subr.bf16.mxu1 %v8358_v23  ;;  %v8428_v22 = vld [vmem:[%s12107_s26 + $0x428] ss:$16 sps:$4 sm:$0xff]   ;;  %v8433_v23 = vld [vmem:[%s12107_s26 + $0x444] ss:$16 sps:$4 sm:$0xff]  }
 0x2ec   : > { %3192 = vmatpush1.bf16.msra.mxu0 %v8353_v25  ;;  %3364 = vmatpush1.bf16.msra.mxu1 %v8356_v29  ;;  %v8431_v25 = vld [vmem:[%s12107_s26 + $0x440] ss:$16 sps:$4 sm:$0xff]   ;;  %v8439_v29 = vld [vmem:[%s12107_s26 + $0x464] ss:$16 sps:$4 sm:$0xff]  }
 0x2ed   : > { %3193 = vmatprep.subr.bf16.mxu0 %v8361_v33  ;;  %3365 = vmatprep.subr.bf16.mxu1 %v8364_v34  ;;  %v8442_v33 = vld [vmem:[%s12107_s26 + $0x46c] ss:$16 sps:$4 sm:$0xff]   ;;  %v8437_v34 = vld [vmem:[%s12107_s26 + $0x460] ss:$16 sps:$4 sm:$0xff]  }
 0x2f0   : > { %3194 = vmatpush1.bf16.msra.mxu0 %v8359_v36  ;;  %3366 = vmatpush1.bf16.msra.mxu1 %v8362_v37  ;;  %v8440_v36 = vld [vmem:[%s12107_s26 + $0x468] ss:$16 sps:$4 sm:$0xff]   ;;  %v8445_v37 = vld [vmem:[%s12107_s26 + $0x484] ss:$16 sps:$4 sm:$0xff]  }
 0x2f1   : > { %3195 = vmatprep.subr.bf16.mxu0 %v8367_v38  ;;  %3367 = vmatprep.subr.bf16.mxu1 %v8370_v41  ;;  %v8448_v38 = vld [vmem:[%s12107_s26 + $0x48c] ss:$16 sps:$4 sm:$0xff]   ;;  %v8443_v41 = vld [vmem:[%s12107_s26 + $0x480] ss:$16 sps:$4 sm:$0xff]  }
 0x2f4   : > { %3196 = vmatpush1.bf16.msra.mxu0 %v8365_v28  ;;  %3368 = vmatpush1.bf16.msra.mxu1 %v8368_v42  ;;  %v8446_v28 = vld [vmem:[%s12107_s26 + $0x488] ss:$16 sps:$4 sm:$0xff]   ;;  %v8451_v42 = vld [vmem:[%s12107_s26 + $0x4a4] ss:$16 sps:$4 sm:$0xff]  }
 0x2f5   : > { %3197 = vmatprep.subr.bf16.mxu0 %v8373_v27  ;;  %3369 = vmatprep.subr.bf16.mxu1 %v8376_v35  ;;  %v8454_v27 = vld [vmem:[%s12107_s26 + $0x4ac] ss:$16 sps:$4 sm:$0xff]   ;;  %v8449_v35 = vld [vmem:[%s12107_s26 + $0x4a0] ss:$16 sps:$4 sm:$0xff]  }
 0x2f8   : > { %3198 = vmatpush1.bf16.msra.mxu0 %v8371_v62  ;;  %3370 = vmatpush1.bf16.msra.mxu1 %v8374_v59  ;;  %v8452_v62 = vld [vmem:[%s12107_s26 + $0x4a8] ss:$16 sps:$4 sm:$0xff]   ;;  %v8457_v59 = vld [vmem:[%s12107_s26 + $0x4c4] ss:$16 sps:$4 sm:$0xff]  }
 0x2f9   : > { %3199 = vmatprep.subr.bf16.mxu0 %v8379_v11  ;;  %3371 = vmatprep.subr.bf16.mxu1 %v8382_v63  ;;  %v8460_v11 = vld [vmem:[%s12107_s26 + $0x4cc] ss:$16 sps:$4 sm:$0xff]   ;;  %v8455_v63 = vld [vmem:[%s12107_s26 + $0x4c0] ss:$16 sps:$4 sm:$0xff]  }
 0x2fc   : > { %3200 = vmatpush1.bf16.msra.mxu0 %v8377_v43  ;;  %3372 = vmatpush1.bf16.msra.mxu1 %v8380_v45  ;;  %v8458_v43 = vld [vmem:[%s12107_s26 + $0x4c8] ss:$16 sps:$4 sm:$0xff]   ;;  %v8463_v45 = vld [vmem:[%s12107_s26 + $0x4e4] ss:$16 sps:$4 sm:$0xff]  }
 0x2fd   : > { %3201 = vmatprep.subr.bf16.mxu0 %v8385_v44  ;;  %3373 = vmatprep.subr.bf16.mxu1 %v8388_v46  ;;  %v8466_v44 = vld [vmem:[%s12107_s26 + $0x4ec] ss:$16 sps:$4 sm:$0xff]   ;;  %v8461_v46 = vld [vmem:[%s12107_s26 + $0x4e0] ss:$16 sps:$4 sm:$0xff]  }
 0x300   : > { %3202 = vmatpush1.bf16.msra.mxu0 %v8383_v47  ;;  %3374 = vmatpush1.bf16.msra.mxu1 %v8386_v49  ;;  %v8464_v47 = vld [vmem:[%s12107_s26 + $0x4e8] ss:$16 sps:$4 sm:$0xff]   ;;  %v8469_v49 = vld [vmem:[%s12107_s26 + $0x504] ss:$16 sps:$4 sm:$0xff]  }
 0x301   : > { %3203 = vmatprep.subr.bf16.mxu0 %v8391_v50  ;;  %3375 = vmatprep.subr.bf16.mxu1 %v8394_v51  ;;  %v8472_v50 = vld [vmem:[%s12107_s26 + $0x50c] ss:$16 sps:$4 sm:$0xff]   ;;  %v8467_v51 = vld [vmem:[%s12107_s26 + $0x500] ss:$16 sps:$4 sm:$0xff]  }
 0x304   : > { %3204 = vmatpush1.bf16.msra.mxu0 %v8389_v32  ;;  %3376 = vmatpush1.bf16.msra.mxu1 %v8392_v52  ;;  %v8470_v32 = vld [vmem:[%s12107_s26 + $0x508] ss:$16 sps:$4 sm:$0xff]   ;;  %v8475_v52 = vld [vmem:[%s12107_s26 + $0x524] ss:$16 sps:$4 sm:$0xff]  }
 0x305   : > { %3205 = vmatprep.subr.bf16.mxu0 %v8397_v31  ;;  %3377 = vmatprep.subr.bf16.mxu1 %v8400_v53  ;;  %v8478_v31 = vld [vmem:[%s12107_s26 + $0x52c] ss:$16 sps:$4 sm:$0xff]   ;;  %v8473_v53 = vld [vmem:[%s12107_s26 + $0x520] ss:$16 sps:$4 sm:$0xff]  }
 0x308   : > { %3206 = vmatpush1.bf16.msra.mxu0 %v8395_v39  ;;  %3378 = vmatpush1.bf16.msra.mxu1 %v8398_v48  ;;  %v8476_v39 = vld [vmem:[%s12107_s26 + $0x528] ss:$16 sps:$4 sm:$0xff]   ;;  %v8481_v48 = vld [vmem:[%s12107_s26 + $0x544] ss:$16 sps:$4 sm:$0xff]  }
 0x309   : > { %3207 = vmatprep.subr.bf16.mxu0 %v8403_v4  ;;  %3379 = vmatprep.subr.bf16.mxu1 %v8406_v12  ;;  %v8484_v4 = vld [vmem:[%s12107_s26 + $0x54c] ss:$16 sps:$4 sm:$0xff]   ;;  %v8479_v12 = vld [vmem:[%s12107_s26 + $0x540] ss:$16 sps:$4 sm:$0xff]  }
 0x30c   : > { %3208 = vmatpush1.bf16.msra.mxu0 %v8401_v57  ;;  %3380 = vmatpush1.bf16.msra.mxu1 %v8404_v58  ;;  %v8482_v57 = vld [vmem:[%s12107_s26 + $0x548] ss:$16 sps:$4 sm:$0xff]   ;;  %v8487_v58 = vld [vmem:[%s12107_s26 + $0x564] ss:$16 sps:$4 sm:$0xff]  }
 0x30d   : > { %3209 = vmatprep.subr.bf16.mxu0 %v8409_v60  ;;  %3381 = vmatprep.subr.bf16.mxu1 %v8412_v61  ;;  %v8490_v60 = vld [vmem:[%s12107_s26 + $0x56c] ss:$16 sps:$4 sm:$0xff]   ;;  %v8485_v61 = vld [vmem:[%s12107_s26 + $0x560] ss:$16 sps:$4 sm:$0xff]  }
 0x310   : > { %3210 = vmatpush1.bf16.msra.mxu0 %v8407_v0  ;;  %3382 = vmatpush1.bf16.msra.mxu1 %v8410_v1  ;;  %v8488_v0 = vld [vmem:[%s12107_s26 + $0x568] ss:$16 sps:$4 sm:$0xff]   ;;  %v8493_v1 = vld [vmem:[%s12107_s26 + $0x584] ss:$16 sps:$4 sm:$0xff]  }
 0x311   : > { %3211 = vmatprep.subr.bf16.mxu0 %v8415_v2  ;;  %3383 = vmatprep.subr.bf16.mxu1 %v8418_v3  ;;  %v8496_v2 = vld [vmem:[%s12107_s26 + $0x58c] ss:$16 sps:$4 sm:$0xff]   ;;  %v8491_v3 = vld [vmem:[%s12107_s26 + $0x580] ss:$16 sps:$4 sm:$0xff]  }
 0x314   : > { %3212 = vmatpush1.bf16.msra.mxu0 %v8413_v5  ;;  %3384 = vmatpush1.bf16.msra.mxu1 %v8416_v6  ;;  %v8494_v5 = vld [vmem:[%s12107_s26 + $0x588] ss:$16 sps:$4 sm:$0xff]   ;;  %v8499_v6 = vld [vmem:[%s12107_s26 + $0x5a4] ss:$16 sps:$4 sm:$0xff]  }
 0x315   : > { %3224 = vmatprep.subr.bf16.mxu0 %v8421_v7  ;;  %3396 = vmatprep.subr.bf16.mxu1 %v8424_v10  ;;  %v8502_v7 = vld [vmem:[%s12107_s26 + $0x5ac] ss:$16 sps:$4 sm:$0xff]   ;;  %v8497_v10 = vld [vmem:[%s12107_s26 + $0x5a0] ss:$16 sps:$4 sm:$0xff]  }
 0x317   : > { %3214 = vmatmul.mubr.bf16.vlgmr.msra.gmra.mrb[12].mxu0 %v10020_v8  ;;  %3386 = vmatmul.mubr.bf16.vlgmr.msra.gmra.mrb[20].mxu1 %v10020_v8  ;;  %v8436_v8 = vld [vmem:[%s12107_s26 + $0x44c] ss:$16 sps:$4 sm:$0xff]  }
 0x318   : > { %3225 = vmatpush1.bf16.msra.mxu0 %v8419_v13  ;;  %3256 = vmatprep.mubr.bf16.mxu0 %v10022_v24  ;;  %v8500_v13 = vld [vmem:[%s12107_s26 + $0x5a8] ss:$16 sps:$4 sm:$0xff]  }
 0x319   : > { %3397 = vmatpush1.bf16.msra.mxu1 %v8422_v14  ;;  %3428 = vmatprep.mubr.bf16.mxu1 %v10022_v24  ;;  %v8434_v24 = vld [vmem:[%s12107_s26 + $0x448] ss:$16 sps:$4 sm:$0xff]   ;;  %v8505_v14 = vld [vmem:[%s12107_s26 + $0x5c4] ss:$16 sps:$4 sm:$0xff]  }
 0x31a   : > { %3226 = vmatprep.subr.bf16.mxu0 %v8427_v16  ;;  %3398 = vmatprep.subr.bf16.mxu1 %v8430_v18  ;;  %v8508_v16 = vld [vmem:[%s12107_s26 + $0x5cc] ss:$16 sps:$4 sm:$0xff]   ;;  %v8503_v18 = vld [vmem:[%s12107_s26 + $0x5c0] ss:$16 sps:$4 sm:$0xff]  }
 0x31c   : > { %3227 = vmatpush1.bf16.msra.mxu0 %v8425_v19  ;;  %v8506_v19 = vld [vmem:[%s12107_s26 + $0x5c8] ss:$16 sps:$4 sm:$0xff]  }
 0x31d   : > { %3399 = vmatpush1.bf16.msra.mxu1 %v8428_v22  ;;  %3228 = vmatprep.subr.bf16.mxu0 %v8433_v23  ;;  %v8511_v22 = vld [vmem:[%s12107_s26 + $0x5e4] ss:$16 sps:$4 sm:$0xff]   ;;  %v8514_v23 = vld [vmem:[%s12107_s26 + $0x5ec] ss:$16 sps:$4 sm:$0xff]  }
 0x31e   : > { %3400 = vmatprep.subr.bf16.mxu1 %v8436_v8  ;;  %v8509_v8 = vld [vmem:[%s12107_s26 + $0x5e0] ss:$16 sps:$4 sm:$0xff]  }
 0x320   : > { %3229 = vmatpush1.bf16.msra.mxu0 %v8431_v25  ;;  %v8512_v25 = vld [vmem:[%s12107_s26 + $0x5e8] ss:$16 sps:$4 sm:$0xff]  }
 0x321   : > { %3401 = vmatpush1.bf16.msra.mxu1 %v8434_v24  ;;  %3230 = vmatprep.subr.bf16.mxu0 %v8439_v29  ;;  %v8517_v24 = vld [vmem:[%s12107_s26 + $0x604] ss:$16 sps:$4 sm:$0xff]   ;;  %v8520_v29 = vld [vmem:[%s12107_s26 + $0x60c] ss:$16 sps:$4 sm:$0xff]  }
 0x322   : > { %3402 = vmatprep.subr.bf16.mxu1 %v8442_v33  ;;  %v8515_v33 = vld [vmem:[%s12107_s26 + $0x600] ss:$16 sps:$4 sm:$0xff]  }
 0x324   : > { %3231 = vmatpush1.bf16.msra.mxu0 %v8437_v34  ;;  %v8518_v34 = vld [vmem:[%s12107_s26 + $0x608] ss:$16 sps:$4 sm:$0xff]  }
 0x325   : > { %3403 = vmatpush1.bf16.msra.mxu1 %v8440_v36  ;;  %3232 = vmatprep.subr.bf16.mxu0 %v8445_v37  ;;  %v8523_v36 = vld [vmem:[%s12107_s26 + $0x624] ss:$16 sps:$4 sm:$0xff]   ;;  %v8526_v37 = vld [vmem:[%s12107_s26 + $0x62c] ss:$16 sps:$4 sm:$0xff]  }
 0x326   : > { %3404 = vmatprep.subr.bf16.mxu1 %v8448_v38  ;;  %v8521_v38 = vld [vmem:[%s12107_s26 + $0x620] ss:$16 sps:$4 sm:$0xff]  }
 0x328   : > { %3233 = vmatpush1.bf16.msra.mxu0 %v8443_v41  ;;  %v8524_v41 = vld [vmem:[%s12107_s26 + $0x628] ss:$16 sps:$4 sm:$0xff]  }
 0x329   : > { %3405 = vmatpush1.bf16.msra.mxu1 %v8446_v28  ;;  %3234 = vmatprep.subr.bf16.mxu0 %v8451_v42  ;;  %v8529_v28 = vld [vmem:[%s12107_s26 + $0x644] ss:$16 sps:$4 sm:$0xff]   ;;  %v8527_v42 = vld [vmem:[%s12107_s26 + $0x640] ss:$16 sps:$4 sm:$0xff]  }
 0x32a   : > { %3406 = vmatprep.subr.bf16.mxu1 %v8454_v27  ;;  %v8530_v27 = vld [vmem:[%s12107_s26 + $0x648] ss:$16 sps:$4 sm:$0xff]  }
 0x32c   : > { %3235 = vmatpush1.bf16.msra.mxu0 %v8449_v35  ;;  %v8538_v35 = vld [vmem:[%s12107_s26 + $0x66c] ss:$16 sps:$4 sm:$0xff]  }
 0x32d   : > { %3407 = vmatpush1.bf16.msra.mxu1 %v8452_v62  ;;  %3236 = vmatprep.subr.bf16.mxu0 %v8457_v59  ;;  %v8533_v62 = vld [vmem:[%s12107_s26 + $0x660] ss:$16 sps:$4 sm:$0xff]   ;;  %v8536_v59 = vld [vmem:[%s12107_s26 + $0x668] ss:$16 sps:$4 sm:$0xff]  }
 0x32e   : > { %3408 = vmatprep.subr.bf16.mxu1 %v8460_v11  ;;  %v8541_v11 = vld [vmem:[%s12107_s26 + $0x684] ss:$16 sps:$4 sm:$0xff]  }
 0x330   : > { %3237 = vmatpush1.bf16.msra.mxu0 %v8455_v63  ;;  %v8544_v63 = vld [vmem:[%s12107_s26 + $0x68c] ss:$16 sps:$4 sm:$0xff]  }
 0x331   : > { %3409 = vmatpush1.bf16.msra.mxu1 %v8458_v43  ;;  %3238 = vmatprep.subr.bf16.mxu0 %v8463_v45  ;;  %v8539_v43 = vld [vmem:[%s12107_s26 + $0x680] ss:$16 sps:$4 sm:$0xff]   ;;  %v8542_v45 = vld [vmem:[%s12107_s26 + $0x688] ss:$16 sps:$4 sm:$0xff]  }
 0x332   : > { %3410 = vmatprep.subr.bf16.mxu1 %v8466_v44  ;;  %v8547_v44 = vld [vmem:[%s12107_s26 + $0x6a4] ss:$16 sps:$4 sm:$0xff]  }
 0x334   : > { %3239 = vmatpush1.bf16.msra.mxu0 %v8461_v46  ;;  %v8550_v46 = vld [vmem:[%s12107_s26 + $0x6ac] ss:$16 sps:$4 sm:$0xff]  }
 0x335   : > { %3411 = vmatpush1.bf16.msra.mxu1 %v8464_v47  ;;  %3240 = vmatprep.subr.bf16.mxu0 %v8469_v49  ;;  %v8545_v47 = vld [vmem:[%s12107_s26 + $0x6a0] ss:$16 sps:$4 sm:$0xff]   ;;  %v8548_v49 = vld [vmem:[%s12107_s26 + $0x6a8] ss:$16 sps:$4 sm:$0xff]  }
 0x336   : > { %3412 = vmatprep.subr.bf16.mxu1 %v8472_v50  ;;  %v8553_v50 = vld [vmem:[%s12107_s26 + $0x6c4] ss:$16 sps:$4 sm:$0xff]  }
 0x338   : > { %3241 = vmatpush1.bf16.msra.mxu0 %v8467_v51  ;;  %v8556_v51 = vld [vmem:[%s12107_s26 + $0x6cc] ss:$16 sps:$4 sm:$0xff]  }
 0x339   : > { %3413 = vmatpush1.bf16.msra.mxu1 %v8470_v32  ;;  %3242 = vmatprep.subr.bf16.mxu0 %v8475_v52  ;;  %v8551_v32 = vld [vmem:[%s12107_s26 + $0x6c0] ss:$16 sps:$4 sm:$0xff]   ;;  %v8554_v52 = vld [vmem:[%s12107_s26 + $0x6c8] ss:$16 sps:$4 sm:$0xff]  }
 0x33a   : > { %3414 = vmatprep.subr.bf16.mxu1 %v8478_v31  ;;  %v8559_v31 = vld [vmem:[%s12107_s26 + $0x6e4] ss:$16 sps:$4 sm:$0xff]  }
 0x33c   : > { %3243 = vmatpush1.bf16.msra.mxu0 %v8473_v53  ;;  %v8562_v53 = vld [vmem:[%s12107_s26 + $0x6ec] ss:$16 sps:$4 sm:$0xff]  }
 0x33d   : > { %3415 = vmatpush1.bf16.msra.mxu1 %v8476_v39  ;;  %3244 = vmatprep.subr.bf16.mxu0 %v8481_v48  ;;  %v8557_v39 = vld [vmem:[%s12107_s26 + $0x6e0] ss:$16 sps:$4 sm:$0xff]   ;;  %v8560_v48 = vld [vmem:[%s12107_s26 + $0x6e8] ss:$16 sps:$4 sm:$0xff]  }
 0x33e   : > { %3416 = vmatprep.subr.bf16.mxu1 %v8484_v4  ;;  %v8565_v4 = vld [vmem:[%s12107_s26 + $0x704] ss:$16 sps:$4 sm:$0xff]  }
 0x340   : > { %3245 = vmatpush1.bf16.msra.mxu0 %v8479_v12  ;;  %v8568_v12 = vld [vmem:[%s12107_s26 + $0x70c] ss:$16 sps:$4 sm:$0xff]  }
 0x341   : > { %3417 = vmatpush1.bf16.msra.mxu1 %v8482_v57  ;;  %3246 = vmatprep.subr.bf16.mxu0 %v8487_v58  ;;  %v8563_v57 = vld [vmem:[%s12107_s26 + $0x700] ss:$16 sps:$4 sm:$0xff]   ;;  %v8566_v58 = vld [vmem:[%s12107_s26 + $0x708] ss:$16 sps:$4 sm:$0xff]  }
 0x342   : > { %3418 = vmatprep.subr.bf16.mxu1 %v8490_v60  ;;  %v8571_v60 = vld [vmem:[%s12107_s26 + $0x724] ss:$16 sps:$4 sm:$0xff]  }
 0x344   : > { %3247 = vmatpush1.bf16.msra.mxu0 %v8485_v61  ;;  %v8574_v61 = vld [vmem:[%s12107_s26 + $0x72c] ss:$16 sps:$4 sm:$0xff]  }
 0x345   : > { %3419 = vmatpush1.bf16.msra.mxu1 %v8488_v0  ;;  %3248 = vmatprep.subr.bf16.mxu0 %v8493_v1  ;;  %v8569_v0 = vld [vmem:[%s12107_s26 + $0x720] ss:$16 sps:$4 sm:$0xff]   ;;  %v8572_v1 = vld [vmem:[%s12107_s26 + $0x728] ss:$16 sps:$4 sm:$0xff]  }
 0x346   : > { %3420 = vmatprep.subr.bf16.mxu1 %v8496_v2  ;;  %v8577_v2 = vld [vmem:[%s12107_s26 + $0x744] ss:$16 sps:$4 sm:$0xff]  }
 0x348   : > { %3249 = vmatpush1.bf16.msra.mxu0 %v8491_v3  ;;  %v8580_v3 = vld [vmem:[%s12107_s26 + $0x74c] ss:$16 sps:$4 sm:$0xff]  }
 0x349   : > { %3421 = vmatpush1.bf16.msra.mxu1 %v8494_v5  ;;  %3250 = vmatprep.subr.bf16.mxu0 %v8499_v6  ;;  %v8575_v5 = vld [vmem:[%s12107_s26 + $0x740] ss:$16 sps:$4 sm:$0xff]   ;;  %v8578_v6 = vld [vmem:[%s12107_s26 + $0x748] ss:$16 sps:$4 sm:$0xff]  }
 0x34a   : > { %3422 = vmatprep.subr.bf16.mxu1 %v8502_v7  ;;  %v8583_v7 = vld [vmem:[%s12107_s26 + $0x764] ss:$16 sps:$4 sm:$0xff]  }
 0x34c   : > { %3251 = vmatpush1.bf16.msra.mxu0 %v8497_v10  ;;  %v8586_v10 = vld [vmem:[%s12107_s26 + $0x76c] ss:$16 sps:$4 sm:$0xff]  }
 0x34d   : > { %3423 = vmatpush1.bf16.msra.mxu1 %v8500_v13  ;;  %3252 = vmatprep.subr.bf16.mxu0 %v8505_v14  ;;  %v8581_v13 = vld [vmem:[%s12107_s26 + $0x760] ss:$16 sps:$4 sm:$0xff]   ;;  %v8584_v14 = vld [vmem:[%s12107_s26 + $0x768] ss:$16 sps:$4 sm:$0xff]  }
 0x34e   : > { %3424 = vmatprep.subr.bf16.mxu1 %v8508_v16  ;;  %v8589_v16 = vld [vmem:[%s12107_s26 + $0x784] ss:$16 sps:$4 sm:$0xff]  }
 0x350   : > { %3253 = vmatpush1.bf16.msra.mxu0 %v8503_v18  ;;  %v8592_v18 = vld [vmem:[%s12107_s26 + $0x78c] ss:$16 sps:$4 sm:$0xff]  }
 0x351   : > { %3425 = vmatpush1.bf16.msra.mxu1 %v8506_v19  ;;  %3254 = vmatprep.subr.bf16.mxu0 %v8511_v22  ;;  %v8587_v19 = vld [vmem:[%s12107_s26 + $0x780] ss:$16 sps:$4 sm:$0xff]   ;;  %v8590_v22 = vld [vmem:[%s12107_s26 + $0x788] ss:$16 sps:$4 sm:$0xff]  }
 0x352   : > { %3426 = vmatprep.subr.bf16.mxu1 %v8514_v23  ;;  %v8595_v23 = vld [vmem:[%s12107_s26 + $0x7a4] ss:$16 sps:$4 sm:$0xff]  }
 0x354   : > { %3255 = vmatpush1.bf16.msra.mxu0 %v8509_v8  ;;  %v8598_v8 = vld [vmem:[%s12107_s26 + $0x7ac] ss:$16 sps:$4 sm:$0xff]  }
 0x355   : > { %3427 = vmatpush1.bf16.msra.mxu1 %v8512_v25  ;;  %3267 = vmatprep.subr.bf16.mxu0 %v8517_v24  ;;  %v8593_v25 = vld [vmem:[%s12107_s26 + $0x7a0] ss:$16 sps:$4 sm:$0xff]   ;;  %v8596_v24 = vld [vmem:[%s12107_s26 + $0x7a8] ss:$16 sps:$4 sm:$0xff]  }
 0x356   : > { %3439 = vmatprep.subr.bf16.mxu1 %v8520_v29  ;;  %v8601_v29 = vld [vmem:[%s12107_s26 + $0x7c4] ss:$16 sps:$4 sm:$0xff]  }
 0x357   : > { %3257 = vmatmul.mubr.bf16.vlgmr.msra.gmra.mrb[12].mxu0 %v10024_v54 }
 0x358   : > { %3429 = vmatmul.mubr.bf16.vlgmr.msra.gmra.mrb[20].mxu1 %v10024_v54  ;;  %3268 = vmatpush1.bf16.msra.mxu0 %v8515_v33  ;;  %v8532_v54 = vld [vmem:[%s12107_s26 + $0x64c] ss:$16 sps:$4 sm:$0xff]  }
 0x359   : > { %3299 = vmatprep.mubr.bf16.mxu0 %v10026_v55  ;;  %3440 = vmatpush1.bf16.msra.mxu1 %v8518_v34  ;;  %v8604_v33 = vld [vmem:[%s12107_s26 + $0x7cc] ss:$16 sps:$4 sm:$0xff]   ;;  %v8599_v34 = vld [vmem:[%s12107_s26 + $0x7c0] ss:$16 sps:$4 sm:$0xff]  }
 0x35a   : > { %3471 = vmatprep.mubr.bf16.mxu1 %v10026_v55  ;;  %3269 = vmatprep.subr.bf16.mxu0 %v8523_v36  ;;  %v8535_v55 = vld [vmem:[%s12107_s26 + $0x664] ss:$16 sps:$4 sm:$0xff]   ;;  %v8602_v36 = vld [vmem:[%s12107_s26 + $0x7c8] ss:$16 sps:$4 sm:$0xff]  }
 0x35b   : > { %3441 = vmatprep.subr.bf16.mxu1 %v8526_v37  ;;  %v8607_v37 = vld [vmem:[%s12107_s26 + $0x7e4] ss:$16 sps:$4 sm:$0xff]  }
 0x35c   : > { %3270 = vmatpush1.bf16.msra.mxu0 %v8521_v38  ;;  %v8610_v38 = vld [vmem:[%s12107_s26 + $0x7ec] ss:$16 sps:$4 sm:$0xff]  }
 0x35d   : > { %3442 = vmatpush1.bf16.msra.mxu1 %v8524_v41  ;;  %3271 = vmatprep.subr.bf16.mxu0 %v8529_v28  ;;  %v8605_v41 = vld [vmem:[%s12107_s26 + $0x7e0] ss:$16 sps:$4 sm:$0xff]   ;;  %v8608_v28 = vld [vmem:[%s12107_s26 + $0x7e8] ss:$16 sps:$4 sm:$0xff]  }
 0x35e   : > { %3443 = vmatprep.subr.bf16.mxu1 %v8532_v54 }
 0x360   : > { %3272 = vmatpush1.bf16.msra.mxu0 %v8527_v42 }
 0x361   : > { %3444 = vmatpush1.bf16.msra.mxu1 %v8530_v27  ;;  %3273 = vmatprep.subr.bf16.mxu0 %v8535_v55 }
 0x362   : > { %3445 = vmatprep.subr.bf16.mxu1 %v8538_v35 }
 0x364   : > { %3274 = vmatpush1.bf16.msra.mxu0 %v8533_v62 }
 0x365   : > { %3446 = vmatpush1.bf16.msra.mxu1 %v8536_v59  ;;  %3275 = vmatprep.subr.bf16.mxu0 %v8541_v11 }
 0x366   : > { %3447 = vmatprep.subr.bf16.mxu1 %v8544_v63 }
 0x368   : > { %3276 = vmatpush1.bf16.msra.mxu0 %v8539_v43 }
 0x369   : > { %3448 = vmatpush1.bf16.msra.mxu1 %v8542_v45  ;;  %3277 = vmatprep.subr.bf16.mxu0 %v8547_v44 }
 0x36a   : > { %3449 = vmatprep.subr.bf16.mxu1 %v8550_v46  ;;  %v8611_v46 = vld [vmem:[%s12060_s7] ss:$8 sps:$4 sm:$0xff]  }
 0x36c   : > { %3278 = vmatpush1.bf16.msra.mxu0 %v8545_v47  ;;  %v8613_v47 = vld [vmem:[%s12060_s7 + $0x4] ss:$8 sps:$4 sm:$0xff]  }
 0x36d   : > { %3450 = vmatpush1.bf16.msra.mxu1 %v8548_v49  ;;  %3279 = vmatprep.subr.bf16.mxu0 %v8553_v50  ;;  %v8616_v49 = vld [vmem:[%s12060_s7 + $0x14] ss:$8 sps:$4 sm:$0xff]   ;;  %v8614_v50 = vld [vmem:[%s12060_s7 + $0x10] ss:$8 sps:$4 sm:$0xff]  }
 0x36e   : > { %3451 = vmatprep.subr.bf16.mxu1 %v8556_v51  ;;  %v8617_v51 = vld [vmem:[%s12060_s7 + $0x20] ss:$8 sps:$4 sm:$0xff]  }
 0x370   : > { %3280 = vmatpush1.bf16.msra.mxu0 %v8551_v32  ;;  %v8622_v32 = vld [vmem:[%s12060_s7 + $0x34] ss:$8 sps:$4 sm:$0xff]  }
 0x371   : > { %3452 = vmatpush1.bf16.msra.mxu1 %v8554_v52  ;;  %3281 = vmatprep.subr.bf16.mxu0 %v8559_v31  ;;  %v8620_v52 = vld [vmem:[%s12060_s7 + $0x30] ss:$8 sps:$4 sm:$0xff]   ;;  %v8625_v31 = vld [vmem:[%s12060_s7 + $0x44] ss:$8 sps:$4 sm:$0xff]  }
 0x372   : > { %3453 = vmatprep.subr.bf16.mxu1 %v8562_v53  ;;  %v8623_v53 = vld [vmem:[%s12060_s7 + $0x40] ss:$8 sps:$4 sm:$0xff]  }
 0x374   : > { %3282 = vmatpush1.bf16.msra.mxu0 %v8557_v39  ;;  %v8628_v39 = vld [vmem:[%s12060_s7 + $0x54] ss:$8 sps:$4 sm:$0xff]  }
 0x375   : > { %3454 = vmatpush1.bf16.msra.mxu1 %v8560_v48  ;;  %3283 = vmatprep.subr.bf16.mxu0 %v8565_v4  ;;  %v8626_v48 = vld [vmem:[%s12060_s7 + $0x50] ss:$8 sps:$4 sm:$0xff]   ;;  %v8631_v4 = vld [vmem:[%s12060_s7 + $0x64] ss:$8 sps:$4 sm:$0xff]  }
 0x376   : > { %3455 = vmatprep.subr.bf16.mxu1 %v8568_v12  ;;  %v8629_v12 = vld [vmem:[%s12060_s7 + $0x60] ss:$8 sps:$4 sm:$0xff]  }
 0x378   : > { %3284 = vmatpush1.bf16.msra.mxu0 %v8563_v57  ;;  %v8634_v57 = vld [vmem:[%s12060_s7 + $0x74] ss:$8 sps:$4 sm:$0xff]  }
 0x379   : > { %3456 = vmatpush1.bf16.msra.mxu1 %v8566_v58  ;;  %3285 = vmatprep.subr.bf16.mxu0 %v8571_v60  ;;  %v8632_v58 = vld [vmem:[%s12060_s7 + $0x70] ss:$8 sps:$4 sm:$0xff]   ;;  %v8637_v60 = vld [vmem:[%s12060_s7 + $0x84] ss:$8 sps:$4 sm:$0xff]  }
 0x37a   : > { %3457 = vmatprep.subr.bf16.mxu1 %v8574_v61  ;;  %v8635_v61 = vld [vmem:[%s12060_s7 + $0x80] ss:$8 sps:$4 sm:$0xff]  }
 0x37c   : > { %3286 = vmatpush1.bf16.msra.mxu0 %v8569_v0  ;;  %v8640_v0 = vld [vmem:[%s12060_s7 + $0x94] ss:$8 sps:$4 sm:$0xff]  }
 0x37d   : > { %3458 = vmatpush1.bf16.msra.mxu1 %v8572_v1  ;;  %3287 = vmatprep.subr.bf16.mxu0 %v8577_v2  ;;  %v8638_v1 = vld [vmem:[%s12060_s7 + $0x90] ss:$8 sps:$4 sm:$0xff]   ;;  %v8643_v2 = vld [vmem:[%s12060_s7 + $0xa4] ss:$8 sps:$4 sm:$0xff]  }
 0x37e   : > { %3459 = vmatprep.subr.bf16.mxu1 %v8580_v3  ;;  %v8641_v3 = vld [vmem:[%s12060_s7 + $0xa0] ss:$8 sps:$4 sm:$0xff]  }
 0x380   : > { %3288 = vmatpush1.bf16.msra.mxu0 %v8575_v5  ;;  %v3486_v5 = vld [vmem:[%s12109_s17] sm:$0xf]  ;;  %s11500_s17 = sand.u32 1, %s9290_s19  }
 0x381   : > { %3460 = vmatpush1.bf16.msra.mxu1 %v8578_v6  ;;  %3289 = vmatprep.subr.bf16.mxu0 %v8583_v7  ;;  %v3491_v6 = vrot.slane %v3486_v5, %v9843_v20  ;;  %v3499_v7 = vrot.slane %v3486_v5, %v9854_v26  ;;  %s7291_s6 = sshll.u32 %s11500_s17, 2  ;;  %s7136_s1 = scalar_lea.sflag [#allocation6], %s11500_s17 }
 0x382   : > { %3461 = vmatprep.subr.bf16.mxu1 %v8586_v10  ;;  %v3495_v10 = vrot.slane %v3486_v5, %v9846_v21  ;;  %s11508_s0 = scalar_lea.vmem [#allocation5], %s7291_s6 }
 0x383   : > { %s7154_s28 = sshll.u32 %s11508_s0, 4  ;;  %s7155_s28 = int_to_ptr.vmem [resolvable:$true] %s7154_s28 }
 0x384   : > { %3290 = vmatpush1.bf16.msra.mxu0 %v8581_v13  ;;  %v3503_v13 = vrot.slane %v3486_v5, %v9862_v30 }
 0x385   : > { %3462 = vmatpush1.bf16.msra.mxu1 %v8584_v14  ;;  %3291 = vmatprep.subr.bf16.mxu0 %v8589_v16 }
 0x386   : > { %3463 = vmatprep.subr.bf16.mxu1 %v8592_v18 }
 0x388   : > { %3292 = vmatpush1.bf16.msra.mxu0 %v8587_v19 }
 0x389   : > { %3464 = vmatpush1.bf16.msra.mxu1 %v8590_v22  ;;  %3293 = vmatprep.subr.bf16.mxu0 %v8595_v23 }
 0x38a   : > { %3465 = vmatprep.subr.bf16.mxu1 %v8598_v8 }
 0x38c   : > { %3294 = vmatpush1.bf16.msra.mxu0 %v8593_v25 }
 0x38d   : > { %3466 = vmatpush1.bf16.msra.mxu1 %v8596_v24  ;;  %3295 = vmatprep.subr.bf16.mxu0 %v8601_v29 }
 0x38e   : > { %3467 = vmatprep.subr.bf16.mxu1 %v8604_v33 }
 0x390   : > { %3296 = vmatpush1.bf16.msra.mxu0 %v8599_v34 }
 0x391   : > { %3468 = vmatpush1.bf16.msra.mxu1 %v8602_v36  ;;  %3297 = vmatprep.subr.bf16.mxu0 %v8607_v37 }
 0x392   : > { %3469 = vmatprep.subr.bf16.mxu1 %v8610_v38 }
 0x394   : > { %3298 = vmatpush1.bf16.msra.mxu0 %v8605_v41 }
 0x395   : > { %3470 = vmatpush1.bf16.msra.mxu1 %v8608_v28 }
 0x397   : > { %3300 = vmatmul.mubr.bf16.vlgmr.msra.gmra.mrb[12].mxu0 %v10028_v56 }
 0x398   : > { %3472 = vmatmul.mubr.bf16.vlgmr.msra.gmra.mrb[20].mxu1 %v10028_v56  ;;  %3540 = vmatprep.mubr.bf16.mxu0 %v9301_v9  ;;  %v10607_v56 = vld [vmem:[%s9544_s30] sm:$0xff]   ;;  %s10846_s30 = sld [smem:[#allocation3 + %s9449_s15]] }
 0x399   : > { %3583 = vmatprep.mubr.bf16.mxu1 %v9301_v9 }
 0x39e   : > { %s4223_s24 = scvt.s32.f32 %s10846_s30 }
 0x46a   : > { %v3301_v54 = vpop.f32.mrb[12].mxu0 }
 0x46b   : > { %v3473_v42 = vpop.f32.mrb[20].mxu1  ;;  %v3303_v27 = vpop.f32.mrb[13].mxu0 }
 0x46c   : > { %v3475_v55 = vpop.f32.mrb[21].mxu1  ;;  %v3305_v35 = vpop.f32.mrb[14].mxu0 }
 0x46d   : > { %v3482_v62 = vpack.c.bf16 %v3305_v35, %v3301_v54  ;;  %v3477_v59 = vpop.f32.mrb[22].mxu1  ;;  %v3307_v11 = vpop.f32.mrb[15].mxu0 }
 0x46e   : > { %v3484_v63 = vpack.c.bf16 %v3477_v59, %v3473_v42  ;;  %v3483_v43 = vpack.c.bf16 %v3307_v11, %v3303_v27  ;;  %v3479_v45 = vpop.f32.mrb[23].mxu1 }
 0x46f   : > { %v3485_v44 = vpack.c.bf16 %v3479_v45, %v3475_v55 }
 0x470   : > { %3508 = vmatprep.subr.bf16.mxu0 %v3483_v43 }
 0x471   : > { %3551 = vmatprep.subr.bf16.mxu1 %v3485_v44  ;;  %3509 = vmatpush1.bf16.msra.mxu0 %v3482_v62 }
 0x472   : > { %3552 = vmatpush1.bf16.msra.mxu1 %v3484_v63  ;;  %4020 = vmatprep.subr.bf16.mxu0 %v8613_v47  ;;  %v8644_v47 = vld [vmem:[%s12060_s7 + $0xb0] ss:$8 sps:$4 sm:$0xff]  }
 0x474   : > { %7623 = vmatmul.mubr.msk.bf16.vlgmr.msra.gmra.mrb[16].mxu0 %vm1348_vm0, %v10607_v56 }
 0x475   : > { %7624 = vmatmul.mubr.msk.bf16.vlgmr.msra.gmra.mrb[24].mxu1 %vm1348_vm0, %v10607_v56  ;;  %4021 = vmatpush1.bf16.msra.mxu0 %v8611_v46 }
 0x476   : > { %4152 = vmatprep.mubr.bf16.mxu1 %v9301_v9  ;;  %4022 = vmatprep.subr.bf16.mxu0 %v8616_v49  ;;  %v8619_v9 = vld [vmem:[%s12060_s7 + $0x24] ss:$8 sps:$4 sm:$0xff]   ;;  %v8646_v49 = vld [vmem:[%s12060_s7 + $0xb4] ss:$8 sps:$4 sm:$0xff]  }
 0x479   : > { %4023 = vmatpush1.bf16.msra.mxu0 %v8614_v50  ;;  %v8647_v50 = vld [vmem:[%s12060_s7 + $0xc0] ss:$8 sps:$4 sm:$0xff]  }
 0x47a   : > { %4024 = vmatprep.subr.bf16.mxu0 %v8619_v9  ;;  %v8649_v9 = vld [vmem:[%s12060_s7 + $0xc4] ss:$8 sps:$4 sm:$0xff]  }
 0x47d   : > { %4025 = vmatpush1.bf16.msra.mxu0 %v8617_v51  ;;  %v8652_v51 = vld [vmem:[%s12060_s7 + $0xd4] ss:$8 sps:$4 sm:$0xff]  }
 0x47e   : > { %4026 = vmatprep.subr.bf16.mxu0 %v8622_v32  ;;  %v8650_v32 = vld [vmem:[%s12060_s7 + $0xd0] ss:$8 sps:$4 sm:$0xff]  }
 0x481   : > { %4027 = vmatpush1.bf16.msra.mxu0 %v8620_v52  ;;  %v8655_v52 = vld [vmem:[%s12060_s7 + $0xe4] ss:$8 sps:$4 sm:$0xff]  }
 0x482   : > { %4028 = vmatprep.subr.bf16.mxu0 %v8625_v31  ;;  %v8653_v31 = vld [vmem:[%s12060_s7 + $0xe0] ss:$8 sps:$4 sm:$0xff]  }
 0x485   : > { %4029 = vmatpush1.bf16.msra.mxu0 %v8623_v53  ;;  %v8658_v53 = vld [vmem:[%s12060_s7 + $0xf4] ss:$8 sps:$4 sm:$0xff]  }
 0x486   : > { %4030 = vmatprep.subr.bf16.mxu0 %v8628_v39  ;;  %v8656_v39 = vld [vmem:[%s12060_s7 + $0xf0] ss:$8 sps:$4 sm:$0xff]  }
 0x489   : > { %4031 = vmatpush1.bf16.msra.mxu0 %v8626_v48  ;;  %v8661_v48 = vld [vmem:[%s12060_s7 + $0x104] ss:$8 sps:$4 sm:$0xff]  }
 0x48a   : > { %4032 = vmatprep.subr.bf16.mxu0 %v8631_v4 }
 0x48d   : > { %4033 = vmatpush1.bf16.msra.mxu0 %v8629_v12 }
 0x48e   : > { %4034 = vmatprep.subr.bf16.mxu0 %v8634_v57 }
 0x491   : > { %4035 = vmatpush1.bf16.msra.mxu0 %v8632_v58 }
 0x492   : > { %4036 = vmatprep.subr.bf16.mxu0 %v8637_v60 }
 0x495   : > { %4037 = vmatpush1.bf16.msra.mxu0 %v8635_v61 }
 0x496   : > { %4038 = vmatprep.subr.bf16.mxu0 %v8640_v0 }
 0x499   : > { %4039 = vmatpush1.bf16.msra.mxu0 %v8638_v1 }
 0x49a   : > { %4040 = vmatprep.subr.bf16.mxu0 %v8643_v2 }
 0x49d   : > { %4041 = vmatpush1.bf16.msra.mxu0 %v8641_v3 }
 0x49e   : > { %4042 = vmatprep.subr.bf16.mxu0 %v8646_v49  ;;  %v8689_v49 = vld [vmem:[%s12060_s7 + $0x1a0] ss:$8 sps:$4 sm:$0xff]  }
 0x4a1   : > { %4043 = vmatpush1.bf16.msra.mxu0 %v8644_v47  ;;  %v8691_v47 = vld [vmem:[%s12060_s7 + $0x1a4] ss:$8 sps:$4 sm:$0xff]  }
 0x4a2   : > { %4044 = vmatprep.subr.bf16.mxu0 %v8649_v9  ;;  %v8692_v9 = vld [vmem:[%s12060_s7 + $0x1b0] ss:$8 sps:$4 sm:$0xff]  }
 0x4a5   : > { %4045 = vmatpush1.bf16.msra.mxu0 %v8647_v50  ;;  %v8694_v50 = vld [vmem:[%s12060_s7 + $0x1b4] ss:$8 sps:$4 sm:$0xff]  }
 0x4a6   : > { %4046 = vmatprep.subr.bf16.mxu0 %v8652_v51  ;;  %v8697_v51 = vld [vmem:[%s12060_s7 + $0x1c4] ss:$8 sps:$4 sm:$0xff]  }
 0x4a9   : > { %4047 = vmatpush1.bf16.msra.mxu0 %v8650_v32  ;;  %v8695_v32 = vld [vmem:[%s12060_s7 + $0x1c0] ss:$8 sps:$4 sm:$0xff]  }
 0x4aa   : > { %4048 = vmatprep.subr.bf16.mxu0 %v8655_v52  ;;  %v8700_v52 = vld [vmem:[%s12060_s7 + $0x1d4] ss:$8 sps:$4 sm:$0xff]  }
 0x4ad   : > { %4049 = vmatpush1.bf16.msra.mxu0 %v8653_v31  ;;  %v8698_v31 = vld [vmem:[%s12060_s7 + $0x1d0] ss:$8 sps:$4 sm:$0xff]  }
 0x4ae   : > { %4050 = vmatprep.subr.bf16.mxu0 %v8658_v53  ;;  %v8703_v53 = vld [vmem:[%s12060_s7 + $0x1e4] ss:$8 sps:$4 sm:$0xff]  }
 0x4b1   : > { %4051 = vmatpush1.bf16.msra.mxu0 %v8656_v39  ;;  %v8701_v39 = vld [vmem:[%s12060_s7 + $0x1e0] ss:$8 sps:$4 sm:$0xff]  }
 0x4b2   : > { %4063 = vmatprep.subr.bf16.mxu0 %v8661_v48  ;;  %v8706_v48 = vld [vmem:[%s12060_s7 + $0x1f4] ss:$8 sps:$4 sm:$0xff]  }
 0x547   : > { %v3542_v14 = vpop.f32.mrb[16].mxu0 }
 0x548   : > { %v3543_v16 = vadd.f32 %v3542_v14, %v3491_v6  ;;  %v3585_v18 = vpop.f32.mrb[24].mxu1  ;;  %v3544_v19 = vpop.f32.mrb[17].mxu0 }
 0x549   : > { %v3586_v22 = vadd.f32 %v3585_v18, %v3499_v7  ;;  %v3545_v23 = vadd.f32 %v3544_v19, %v3495_v10  ;;  %v3587_v8 = vpop.f32.mrb[25].mxu1  ;;  %v3546_v25 = vpop.f32.mrb[18].mxu0 }
 0x54a   : > { %v3594_v24 = vmul.f32 %v3543_v16, %v3543_v16  ;;  %v3588_v29 = vadd.f32 %v3587_v8, %v3503_v13  ;;  %v3547_v33 = vadd.f32 %v3546_v25, %v3491_v6  ;;  %v3589_v34 = vpop.f32.mrb[26].mxu1  ;;  %v3548_v36 = vpop.f32.mrb[19].mxu0 }
 0x54b   : > { %v3596_v37 = vmul.f32 %v3586_v22, %v3586_v22  ;;  %v3595_v38 = vmul.f32 %v3545_v23, %v3545_v23  ;;  %v3590_v41 = vadd.f32 %v3589_v34, %v3499_v7  ;;  %v3549_v28 = vadd.f32 %v3548_v36, %v3495_v10  ;;  %v3591_v54 = vpop.f32.mrb[27].mxu1 }
 0x54c   : > { %v3598_v42 = vmul.f32 %v3547_v33, %v3547_v33  ;;  %v3592_v35 = vadd.f32 %v3591_v54, %v3503_v13  ;;  %v3597_v11 = vmul.f32 %v3588_v29, %v3588_v29  ;;  %v8668_v54 = vld [vmem:[%s12060_s7 + $0x130] ss:$8 sps:$4 sm:$0xff]  }
 0x54d   : > { %v3599_v27 = vmul.f32 %v3549_v28, %v3549_v28  ;;  %v3602_v55 = vadd.f32 %v3595_v38, %v3594_v24  ;;  %v3600_v62 = vmul.f32 %v3590_v41, %v3590_v41  ;;  %v8667_v38 = vld [vmem:[%s12060_s7 + $0x124] ss:$8 sps:$4 sm:$0xff]  }
 0x54e   : > { %v3601_v44 = vmul.f32 %v3592_v35, %v3592_v35 }
 0x54f   : > { %v3607_v59 = vadd.f32 %v3599_v27, %v3598_v42  ;;  %v3603_v63 = vadd.f32 %v3602_v55, %v3596_v37  ;;  %v8662_v37 = vld [vmem:[%s12060_s7 + $0x110] ss:$8 sps:$4 sm:$0xff]   ;;  %v8673_v42 = vld [vmem:[%s12060_s7 + $0x144] ss:$8 sps:$4 sm:$0xff]   ;;  %v8671_v27 = vld [vmem:[%s12060_s7 + $0x140] ss:$8 sps:$4 sm:$0xff]  }
 0x550   : > { %v8676_v55 = vld [vmem:[%s12060_s7 + $0x154] ss:$8 sps:$4 sm:$0xff]  }
 0x551   : > { %v3604_v43 = vadd.f32 %v3603_v63, %v3597_v11  ;;  %v3608_v45 = vadd.f32 %v3607_v59, %v3600_v62  ;;  %v8679_v62 = vld [vmem:[%s12060_s7 + $0x164] ss:$8 sps:$4 sm:$0xff]   ;;  %v8677_v59 = vld [vmem:[%s12060_s7 + $0x160] ss:$8 sps:$4 sm:$0xff]   ;;  %v8682_v11 = vld [vmem:[%s12060_s7 + $0x174] ss:$8 sps:$4 sm:$0xff]  }
 0x552   : > { %v8680_v63 = vld [vmem:[%s12060_s7 + $0x170] ss:$8 sps:$4 sm:$0xff]  }
 0x553   : > { %3605 = vadd.xlane.f32.xlu1 %v3604_v43  ;;  %v3609_v46 = vadd.f32 %v3608_v45, %v3601_v44  ;;  %v8685_v43 = vld [vmem:[%s12060_s7 + $0x184] ss:$8 sps:$4 sm:$0xff]   ;;  %v8683_v45 = vld [vmem:[%s12060_s7 + $0x180] ss:$8 sps:$4 sm:$0xff]   ;;  %v8688_v44 = vld [vmem:[%s12060_s7 + $0x194] ss:$8 sps:$4 sm:$0xff]  }
 0x557   : > { %3610 = vadd.xlane.f32.xlu1 %v3609_v46  ;;  %v8686_v46 = vld [vmem:[%s12060_s7 + $0x190] ss:$8 sps:$4 sm:$0xff]  }
 0x5e0   : > { %v3606_v4 = vpop.xlane.xlu1 %3605 }
 0x5e1   : > { %v3612_v12 = vmax.f32 %v3606_v4, 1e-24  ;;  %v8704_v4 = vld [vmem:[%s12060_s7 + $0x1f0] ss:$8 sps:$4 sm:$0xff]  }
 0x5e3   : > { %9167 = vrsqrt.f32 %v3612_v12 }
 0x5e4   : > { %v3611_v57 = vpop.xlane.xlu1 %3610 }
 0x5e5   : > { %v3613_v58 = vmax.f32 %v3611_v57, 1e-24 }
 0x5e7   : > { %9169 = vrsqrt.f32 %v3613_v58 }
 0x5ed   : > { %v9168_v60 = vpop.eup %9167 }
 0x5ee   : > { %v3617_v61 = vmul.f32 %v9168_v60, %v3545_v23  ;;  %v3616_v0 = vmul.f32 %v9168_v60, %v3543_v16  ;;  %v3618_v1 = vmul.f32 %v9168_v60, %v3586_v22  ;;  %v3619_v3 = vmul.f32 %v9168_v60, %v3588_v29  ;;  %v8659_v23 = vld [vmem:[%s12060_s7 + $0x100] ss:$8 sps:$4 sm:$0xff]   ;;  %v8664_v29 = vld [vmem:[%s12060_s7 + $0x114] ss:$8 sps:$4 sm:$0xff]  }
 0x5f0   : > { %v3625_v13 = vmax.f32 %v3617_v61, 0.0  ;;  %v3624_v14 = vmax.f32 %v3616_v0, 0.0  ;;  %v3626_v18 = vmax.f32 %v3618_v1, 0.0  ;;  %v3627_v22 = vmax.f32 %v3619_v3, 0.0  ;;  %v8707_v1 = vld [vmem:[%s12062_s9] ss:$16 sps:$4 sm:$0xff]  }
 0x5f1   : > { %v9170_v2 = vpop.eup %9169  ;;  %v8710_v3 = vld [vmem:[%s12063_s10] ss:$16 sps:$4 sm:$0xff]  }
 0x5f2   : > { %v3621_v5 = vmul.f32 %v9170_v2, %v3549_v28  ;;  %v3620_v6 = vmul.f32 %v9170_v2, %v3547_v33  ;;  %v3623_v7 = vmul.f32 %v9170_v2, %v3592_v35  ;;  %v3622_v10 = vmul.f32 %v9170_v2, %v3590_v41  ;;  %v8665_v41 = vld [vmem:[%s12060_s7 + $0x120] ss:$8 sps:$4 sm:$0xff]   ;;  %v8670_v28 = vld [vmem:[%s12060_s7 + $0x134] ss:$8 sps:$4 sm:$0xff]   ;;  %v8674_v35 = vld [vmem:[%s12060_s7 + $0x150] ss:$8 sps:$4 sm:$0xff]  }
 0x5f3   : > { %v8709_v2 = vld [vmem:[%s12062_s9 + $0x4] ss:$16 sps:$4 sm:$0xff]  }
 0x5f4   : > { %v3629_v19 = vmax.f32 %v3621_v5, 0.0  ;;  %v3628_v8 = vmax.f32 %v3620_v6, 0.0  ;;  %v3631_v25 = vmax.f32 %v3623_v7, 0.0  ;;  %v3630_v24 = vmax.f32 %v3622_v10, 0.0  ;;  %v8712_v5 = vld [vmem:[%s12063_s10 + $0x4] ss:$16 sps:$4 sm:$0xff]  }
 0x5f5   : > { %v8718_v6 = vld [vmem:[%s12063_s10 + $0x24] ss:$16 sps:$4 sm:$0xff]   ;;  %v8713_v7 = vld [vmem:[%s12062_s9 + $0x20] ss:$16 sps:$4 sm:$0xff]  }
 0x5f6   : > { %v3633_v34 = vpack.c.bf16 %v3629_v19, %v3625_v13  ;;  %v3632_v16 = vpack.c.bf16 %v3628_v8, %v3624_v14  ;;  %v10723_v36 = vpack.c.bf16 %v3630_v24, %v3626_v18  ;;  %v3635_v33 = vpack.c.bf16 %v3631_v25, %v3627_v22  ;;  %v8716_v10 = vld [vmem:[%s12063_s10 + $0x20] ss:$16 sps:$4 sm:$0xff]   ;;  %v8721_v13 = vld [vmem:[%s12062_s9 + $0x44] ss:$16 sps:$4 sm:$0xff]  }
 0x5f7   : > { %v8724_v14 = vld [vmem:[%s12063_s10 + $0x44] ss:$16 sps:$4 sm:$0xff]   ;;  %v8719_v18 = vld [vmem:[%s12062_s9 + $0x40] ss:$16 sps:$4 sm:$0xff]  }
 0x5f8   : > { %4052 = vmatprep.mubr.bf16.mxu0 %v3633_v34  ;;  %v8722_v19 = vld [vmem:[%s12063_s10 + $0x40] ss:$16 sps:$4 sm:$0xff]   ;;  %v8727_v8 = vld [vmem:[%s12062_s9 + $0x64] ss:$16 sps:$4 sm:$0xff]   ;;  %v4224_v34 = vstv %s4223_s24 }
 0x5f9   : > { %4053 = vmatmul.mubr.bf16.vlgmr.msra.gmra.mrb[20].mxu0 %v3632_v16  ;;  %v8730_v25 = vld [vmem:[%s12063_s10 + $0x64] ss:$16 sps:$4 sm:$0xff]   ;;  %v8725_v24 = vld [vmem:[%s12062_s9 + $0x60] ss:$16 sps:$4 sm:$0xff]   ;;  %9171 = vrcp.f32 %v4224_v34 }
 0x5fa   : > { %4064 = vmatpush1.bf16.msra.mxu0 %v8659_v23  ;;  %4095 = vmatprep.mubr.bf16.mxu0 %v3635_v33  ;;  %v8728_v23 = vld [vmem:[%s12063_s10 + $0x60] ss:$16 sps:$4 sm:$0xff]   ;;  %v8733_v16 = vld [vmem:[%s12062_s9 + $0x84] ss:$16 sps:$4 sm:$0xff]  }
 0x5fb   : > { %4065 = vmatprep.subr.bf16.mxu0 %v8664_v29  ;;  %v8736_v22 = vld [vmem:[%s12063_s10 + $0x84] ss:$16 sps:$4 sm:$0xff]   ;;  %v8734_v29 = vld [vmem:[%s12063_s10 + $0x80] ss:$16 sps:$4 sm:$0xff]  }
 0x5fc   : > { %v8739_v33 = vld [vmem:[%s12062_s9 + $0xa4] ss:$16 sps:$4 sm:$0xff]  }
 0x5fd   : > { %v8790_v34 = vld [vmem:[%s12063_s10 + $0x1a4] ss:$16 sps:$4 sm:$0xff]  }
 0x5fe   : > { %4066 = vmatpush1.bf16.msra.mxu0 %v8662_v37  ;;  %v8742_v37 = vld [vmem:[%s12063_s10 + $0xa4] ss:$16 sps:$4 sm:$0xff]  }
 0x5ff   : > { %4067 = vmatprep.subr.bf16.mxu0 %v8667_v38  ;;  %v8737_v38 = vld [vmem:[%s12062_s9 + $0xa0] ss:$16 sps:$4 sm:$0xff]  }
 0x602   : > { %4068 = vmatpush1.bf16.msra.mxu0 %v8665_v41  ;;  %v8740_v41 = vld [vmem:[%s12063_s10 + $0xa0] ss:$16 sps:$4 sm:$0xff]  }
 0x603   : > { %4069 = vmatprep.subr.bf16.mxu0 %v8670_v28  ;;  %v8745_v28 = vld [vmem:[%s12062_s9 + $0xc4] ss:$16 sps:$4 sm:$0xff]  }
 0x606   : > { %4070 = vmatpush1.bf16.msra.mxu0 %v8668_v54  ;;  %v8748_v54 = vld [vmem:[%s12063_s10 + $0xc4] ss:$16 sps:$4 sm:$0xff]  }
 0x607   : > { %4071 = vmatprep.subr.bf16.mxu0 %v8673_v42  ;;  %v9172_v42 = vpop.eup %9171 }
 0x608   : > { %8172 = vpush %v9172_v42  ;;  %v4230_v42 = vld [vmem:[%s720_s22] sm:$0x1]  ;;  %s9202_s22 = scalar_lea.vmem %s7155_s28, 64 }
 0x609   : > { %p9203_p2 = scmp.ne.s32.totalorder %s7155_s28, %s9202_s22 }
 0x60a   : > { %4072 = vmatpush1.bf16.msra.mxu0 %v8671_v27  ;;  %v8743_v27 = vld [vmem:[%s12062_s9 + $0xc0] ss:$16 sps:$4 sm:$0xff]  }
 0x60b   : > { %4073 = vmatprep.subr.bf16.mxu0 %v8676_v55  ;;  %v8746_v55 = vld [vmem:[%s12063_s10 + $0xc0] ss:$16 sps:$4 sm:$0xff]   ;;  %p9204_p3 = pnand %p9203_p2, %p9466_p10 }
 0x60d   : > { %p9205_p4 = pneg %p9204_p3 }
 0x60e   : > { %4074 = vmatpush1.bf16.msra.mxu0 %v8674_v35  ;;  %v4108_v35 = vld [vmem:[%s12061_s8] sm:$0x3] }
 0x60f   : > { %4075 = vmatprep.subr.bf16.mxu0 %v8679_v62  ;;  %v4113_v62 = vrot.slane %v4108_v35, %v9843_v20 }
 0x612   : > { %4076 = vmatpush1.bf16.msra.mxu0 %v8677_v59  ;;  %v4117_v59 = vrot.slane %v4108_v35, %v9846_v21 }
 0x613   : > { %4077 = vmatprep.subr.bf16.mxu0 %v8682_v11 }
 0x616   : > { %4078 = vmatpush1.bf16.msra.mxu0 %v8680_v63 }
 0x617   : > { %4079 = vmatprep.subr.bf16.mxu0 %v8685_v43 }
 0x61a   : > { %4080 = vmatpush1.bf16.msra.mxu0 %v8683_v45 }
 0x61b   : > { %4081 = vmatprep.subr.bf16.mxu0 %v8688_v44 }
 0x61e   : > { %4082 = vmatpush1.bf16.msra.mxu0 %v8686_v46 }
 0x61f   : > { %4083 = vmatprep.subr.bf16.mxu0 %v8691_v47 }
 0x622   : > { %4084 = vmatpush1.bf16.msra.mxu0 %v8689_v49 }
 0x623   : > { %4085 = vmatprep.subr.bf16.mxu0 %v8694_v50 }
 0x626   : > { %4086 = vmatpush1.bf16.msra.mxu0 %v8692_v9 }
 0x627   : > { %4087 = vmatprep.subr.bf16.mxu0 %v8697_v51 }
 0x62a   : > { %4088 = vmatpush1.bf16.msra.mxu0 %v8695_v32 }
 0x62b   : > { %4089 = vmatprep.subr.bf16.mxu0 %v8700_v52 }
 0x62e   : > { %4090 = vmatpush1.bf16.msra.mxu0 %v8698_v31 }
 0x62f   : > { %4091 = vmatprep.subr.bf16.mxu0 %v8703_v53  ;;  %v8751_v53 = vld [vmem:[%s12062_s9 + $0xe4] ss:$16 sps:$4 sm:$0xff]  }
 0x632   : > { %4092 = vmatpush1.bf16.msra.mxu0 %v8701_v39  ;;  %v8749_v39 = vld [vmem:[%s12062_s9 + $0xe0] ss:$16 sps:$4 sm:$0xff]  }
 0x633   : > { %4093 = vmatprep.subr.bf16.mxu0 %v8706_v48  ;;  %v8754_v48 = vld [vmem:[%s12063_s10 + $0xe4] ss:$16 sps:$4 sm:$0xff]  }
 0x636   : > { %4094 = vmatpush1.bf16.msra.mxu0 %v8704_v4  ;;  %v8752_v4 = vld [vmem:[%s12063_s10 + $0xe0] ss:$16 sps:$4 sm:$0xff]  }
 0x637   : > { %5085 = vmatprep.subr.bf16.mxu0 %v8709_v2  ;;  %v8764_v2 = vld [vmem:[%s12063_s10 + $0x120] ss:$16 sps:$4 sm:$0xff]  }
 0x639   : > { %4096 = vmatmul.mubr.bf16.vlgmr.msra.gmra.mrb[20].mxu0 %v10723_v36  ;;  %v8731_v36 = vld [vmem:[%s12062_s9 + $0x80] ss:$16 sps:$4 sm:$0xff]  }
 0x63a   : > { %5086 = vmatpush1.bf16.msra.mxu0 %v8707_v1  ;;  %v8766_v1 = vld [vmem:[%s12063_s10 + $0x124] ss:$16 sps:$4 sm:$0xff]  }
 0x70c   : > { %v4097_v12 = vpop.f32.mrb[20].mxu0 }
 0x70d   : > { %v4099_v57 = vpop.f32.mrb[21].mxu0 }
 0x70e   : > { %v4101_v58 = vpop.f32.mrb[22].mxu0 }
 0x70f   : > { %v4106_v60 = vpack.c.bf16 %v4101_v58, %v4097_v12  ;;  %v4103_v61 = vpop.f32.mrb[23].mxu0  ;;  %v8757_v12 = vld [vmem:[%s12062_s9 + $0x104] ss:$16 sps:$4 sm:$0xff]  }
 0x710   : > { %v4107_v0 = vpack.c.bf16 %v4103_v61, %v4099_v57  ;;  %v8755_v57 = vld [vmem:[%s12062_s9 + $0x100] ss:$16 sps:$4 sm:$0xff]   ;;  %v8760_v58 = vld [vmem:[%s12063_s10 + $0x104] ss:$16 sps:$4 sm:$0xff]  }
 0x711   : > { %v8763_v61 = vld [vmem:[%s12062_s9 + $0x124] ss:$16 sps:$4 sm:$0xff]  }
 0x712   : > { %4120 = vmatprep.subr.bf16.mxu1 %v4107_v0  ;;  %v8761_v0 = vld [vmem:[%s12062_s9 + $0x120] ss:$16 sps:$4 sm:$0xff]  }
 0x713   : > { %4121 = vmatpush1.bf16.msra.mxu1 %v4106_v60  ;;  %v8758_v60 = vld [vmem:[%s12063_s10 + $0x100] ss:$16 sps:$4 sm:$0xff]  }
 0x714   : > { %4683 = vmatprep.subr.bf16.mxu1 %v8712_v5  ;;  %v8767_v5 = vld [vmem:[%s12062_s9 + $0x140] ss:$16 sps:$4 sm:$0xff]  }
 0x716   : > { %7689 = vmatmul.mubr.msk.bf16.vlgmr.msra.gmra.mrb[28].mxu1 %vm1348_vm0, %v10607_v56  ;;  %v8715_v56 = vld [vmem:[%s12062_s9 + $0x24] ss:$16 sps:$4 sm:$0xff]  }
 0x717   : > { %4684 = vmatpush1.bf16.msra.mxu1 %v8710_v3  ;;  %5087 = vmatprep.subr.bf16.mxu0 %v8715_v56  ;;  %v8769_v3 = vld [vmem:[%s12062_s9 + $0x144] ss:$16 sps:$4 sm:$0xff]  }
 0x718   : > { %4685 = vmatprep.subr.bf16.mxu1 %v8718_v6  ;;  %5088 = vmatpush1.bf16.msra.mxu0 %v8713_v7  ;;  %v8772_v56 = vld [vmem:[%s12063_s10 + $0x144] ss:$16 sps:$4 sm:$0xff]   ;;  %v8770_v6 = vld [vmem:[%s12063_s10 + $0x140] ss:$16 sps:$4 sm:$0xff]  }
 0x719   : > { %5089 = vmatprep.subr.bf16.mxu0 %v8721_v13  ;;  %v8773_v7 = vld [vmem:[%s12062_s9 + $0x160] ss:$16 sps:$4 sm:$0xff]  }
 0x71a   : > { %v8776_v13 = vld [vmem:[%s12063_s10 + $0x160] ss:$16 sps:$4 sm:$0xff]  }
 0x71b   : > { %4686 = vmatpush1.bf16.msra.mxu1 %v8716_v10  ;;  %v8775_v10 = vld [vmem:[%s12062_s9 + $0x164] ss:$16 sps:$4 sm:$0xff]  }
 0x71c   : > { %4687 = vmatprep.subr.bf16.mxu1 %v8724_v14  ;;  %5090 = vmatpush1.bf16.msra.mxu0 %v8719_v18  ;;  %v8778_v14 = vld [vmem:[%s12063_s10 + $0x164] ss:$16 sps:$4 sm:$0xff]  }
 0x71d   : > { %5091 = vmatprep.subr.bf16.mxu0 %v8727_v8  ;;  %v8781_v18 = vld [vmem:[%s12062_s9 + $0x184] ss:$16 sps:$4 sm:$0xff]   ;;  %v8779_v8 = vld [vmem:[%s12062_s9 + $0x180] ss:$16 sps:$4 sm:$0xff]  }
 0x71f   : > { %4688 = vmatpush1.bf16.msra.mxu1 %v8722_v19  ;;  %v8784_v19 = vld [vmem:[%s12063_s10 + $0x184] ss:$16 sps:$4 sm:$0xff]  }
 0x720   : > { %4689 = vmatprep.subr.bf16.mxu1 %v8730_v25  ;;  %5092 = vmatpush1.bf16.msra.mxu0 %v8725_v24  ;;  %v8782_v25 = vld [vmem:[%s12063_s10 + $0x180] ss:$16 sps:$4 sm:$0xff]   ;;  %v8787_v24 = vld [vmem:[%s12062_s9 + $0x1a4] ss:$16 sps:$4 sm:$0xff]  }
 0x721   : > { %5093 = vmatprep.subr.bf16.mxu0 %v8733_v16  ;;  %v8788_v16 = vld [vmem:[%s12063_s10 + $0x1a0] ss:$16 sps:$4 sm:$0xff]  }
 0x723   : > { %4690 = vmatpush1.bf16.msra.mxu1 %v8728_v23  ;;  %v8785_v23 = vld [vmem:[%s12062_s9 + $0x1a0] ss:$16 sps:$4 sm:$0xff]  }
 0x724   : > { %4691 = vmatprep.subr.bf16.mxu1 %v8736_v22  ;;  %5094 = vmatpush1.bf16.msra.mxu0 %v8731_v36  ;;  %v8793_v22 = vld [vmem:[%s12062_s9 + $0x1c4] ss:$16 sps:$4 sm:$0xff]  }
 0x725   : > { %5095 = vmatprep.subr.bf16.mxu0 %v8739_v33  ;;  %v8796_v36 = vld [vmem:[%s12063_s10 + $0x1c4] ss:$16 sps:$4 sm:$0xff]   ;;  %v8794_v33 = vld [vmem:[%s12063_s10 + $0x1c0] ss:$16 sps:$4 sm:$0xff]  }
 0x727   : > { %4692 = vmatpush1.bf16.msra.mxu1 %v8734_v29  ;;  %v8791_v29 = vld [vmem:[%s12062_s9 + $0x1c0] ss:$16 sps:$4 sm:$0xff]  }
 0x728   : > { %4693 = vmatprep.subr.bf16.mxu1 %v8742_v37  ;;  %5096 = vmatpush1.bf16.msra.mxu0 %v8737_v38  ;;  %v8799_v37 = vld [vmem:[%s12062_s9 + $0x1e4] ss:$16 sps:$4 sm:$0xff]   ;;  %v8797_v38 = vld [vmem:[%s12062_s9 + $0x1e0] ss:$16 sps:$4 sm:$0xff]  }
 0x729   : > { %5097 = vmatprep.subr.bf16.mxu0 %v8745_v28  ;;  %v8800_v28 = vld [vmem:[%s12063_s10 + $0x1e0] ss:$16 sps:$4 sm:$0xff]  }
 0x72b   : > { %4694 = vmatpush1.bf16.msra.mxu1 %v8740_v41  ;;  %v8802_v41 = vld [vmem:[%s12063_s10 + $0x1e4] ss:$16 sps:$4 sm:$0xff]  }
 0x72c   : > { %4695 = vmatprep.subr.bf16.mxu1 %v8748_v54  ;;  %5098 = vmatpush1.bf16.msra.mxu0 %v8743_v27  ;;  %v8805_v54 = vld [vmem:[%s12063_s10 + $0xc] ss:$16 sps:$4 sm:$0xff]   ;;  %v5263_v27 = vld [vmem:[#allocation4] sm:$0x1] }
 0x72d   : > { %5099 = vmatprep.subr.bf16.mxu0 %v8751_v53 }
 0x72f   : > { %4696 = vmatpush1.bf16.msra.mxu1 %v8746_v55 }
 0x730   : > { %4697 = vmatprep.subr.bf16.mxu1 %v8754_v48  ;;  %5100 = vmatpush1.bf16.msra.mxu0 %v8749_v39 }
 0x731   : > { %5101 = vmatprep.subr.bf16.mxu0 %v8757_v12 }
 0x733   : > { %4698 = vmatpush1.bf16.msra.mxu1 %v8752_v4 }
 0x734   : > { %4699 = vmatprep.subr.bf16.mxu1 %v8760_v58  ;;  %5102 = vmatpush1.bf16.msra.mxu0 %v8755_v57 }
 0x735   : > { %5103 = vmatprep.subr.bf16.mxu0 %v8763_v61 }
 0x737   : > { %4700 = vmatpush1.bf16.msra.mxu1 %v8758_v60 }
 0x738   : > { %4701 = vmatprep.subr.bf16.mxu1 %v8766_v1  ;;  %5104 = vmatpush1.bf16.msra.mxu0 %v8761_v0 }
 0x739   : > { %5105 = vmatprep.subr.bf16.mxu0 %v8769_v3 }
 0x73b   : > { %4702 = vmatpush1.bf16.msra.mxu1 %v8764_v2 }
 0x73c   : > { %4703 = vmatprep.subr.bf16.mxu1 %v8772_v56  ;;  %5106 = vmatpush1.bf16.msra.mxu0 %v8767_v5 }
 0x73d   : > { %5107 = vmatprep.subr.bf16.mxu0 %v8775_v10 }
 0x73f   : > { %4704 = vmatpush1.bf16.msra.mxu1 %v8770_v6 }
 0x740   : > { %4705 = vmatprep.subr.bf16.mxu1 %v8778_v14  ;;  %5108 = vmatpush1.bf16.msra.mxu0 %v8773_v7 }
 0x741   : > { %5109 = vmatprep.subr.bf16.mxu0 %v8781_v18 }
 0x743   : > { %4706 = vmatpush1.bf16.msra.mxu1 %v8776_v13 }
 0x744   : > { %4707 = vmatprep.subr.bf16.mxu1 %v8784_v19  ;;  %5110 = vmatpush1.bf16.msra.mxu0 %v8779_v8 }
 0x745   : > { %5111 = vmatprep.subr.bf16.mxu0 %v8787_v24 }
 0x747   : > { %4708 = vmatpush1.bf16.msra.mxu1 %v8782_v25 }
 0x748   : > { %4709 = vmatprep.subr.bf16.mxu1 %v8790_v34  ;;  %5112 = vmatpush1.bf16.msra.mxu0 %v8785_v23 }
 0x749   : > { %5113 = vmatprep.subr.bf16.mxu0 %v8793_v22 }
 0x74b   : > { %4710 = vmatpush1.bf16.msra.mxu1 %v8788_v16 }
 0x74c   : > { %4711 = vmatprep.subr.bf16.mxu1 %v8796_v36  ;;  %5114 = vmatpush1.bf16.msra.mxu0 %v8791_v29 }
 0x74d   : > { %5115 = vmatprep.subr.bf16.mxu0 %v8799_v37 }
 0x74f   : > { %4712 = vmatpush1.bf16.msra.mxu1 %v8794_v33 }
 0x750   : > { %4713 = vmatprep.subr.bf16.mxu1 %v8802_v41  ;;  %5116 = vmatpush1.bf16.msra.mxu0 %v8797_v38 }
 0x753   : > { %4714 = vmatpush1.bf16.msra.mxu1 %v8800_v28 }
 0x754   : > { %4724 = vmatprep.subr.bf16.mxu1 %v8805_v54 }
 0x7e9   : > { %v4154_v11 = vpop.f32.mrb[28].mxu1 }
 0x7ea   : > { %v10911_v63 = vadd.f32 %v4154_v11, %v4113_v62  ;;  %v4156_v43 = vpop.f32.mrb[29].mxu1 }
 0x7eb   : > { %v10913_v45 = vadd.f32 %v4156_v43, %v4117_v59  ;;  %v4158_v44 = vpop.f32.mrb[30].mxu1  ;;  %v4187_v43 = vadd.s32 8, %v9840_v17 }
 0x7ec   : > { %v4163_v46 = vmul.f32 %v10911_v63, %v10911_v63  ;;  %v10917_v47 = vadd.f32 %v4158_v44, %v4113_v62  ;;  %v4160_v49 = vpop.f32.mrb[31].mxu1 }
 0x7ed   : > { %v4164_v50 = vmul.f32 %v10913_v45, %v10913_v45  ;;  %v10921_v9 = vadd.f32 %v4160_v49, %v4117_v59  ;;  %v4188_v49 = vstv %s10846_s30  ;;  %s8173_s30 = spop %8172 }
 0x7ee   : > { %v4165_v51 = vmul.f32 %v10917_v47, %v10917_v47  ;;  %vm4189_vm1 = vcmp.lt.s32.totalorder %v9840_v17, %v4188_v49  ;;  %vm4190_vm2 = vcmp.lt.s32.totalorder %v4187_v43, %v4188_v49  ;;  %v4227_v23 = vstv %s8173_s30  ;;  %v8817_v43 = vld [vmem:[%s12063_s10 + $0x8c] ss:$16 sps:$4 sm:$0xff]   ;;  %v8818_v49 = vld [vmem:[%s12063_s10 + $0xa8] ss:$16 sps:$4 sm:$0xff]   ;;  %s12110_s30 = sld [smem:[#allocation25_spill]] }
 0x7ef   : > { %v4166_v32 = vmul.f32 %v10921_v9, %v10921_v9  ;;  %v4167_v52 = vadd.f32 %v4164_v50, %v4163_v46 }
 0x7f1   : > { %4168 = vadd.xlane.f32.xlu0 %v4167_v52  ;;  %v4170_v31 = vadd.f32 %v4166_v32, %v4165_v51 }
 0x7f3   : > { %4171 = vadd.xlane.f32.xlu1 %v4170_v31 }
 0x804   : > { %5266 = vperm.xlu1 %8224, %v5263_v27   ;;  %v8808_v27 = vld [vmem:[%s12063_s10 + $0x2c] ss:$16 sps:$4 sm:$0xff]  }
 0x807   : > { %5170 = vperm.xlu0 %8223, %v4230_v42   ;;  %v8803_v42 = vld [vmem:[%s12063_s10 + $0x8] ss:$16 sps:$4 sm:$0xff]  }
 0x87e   : > { %v4169_v55 = vpop.xlane.xlu0 %4168 }
 0x87f   : > { %v4173_v35 = vmax.f32 %v4169_v55, 1e-24  ;;  %v8806_v55 = vld [vmem:[%s12063_s10 + $0x28] ss:$16 sps:$4 sm:$0xff]  }
 0x880   : > { %v4172_v62 = vpop.xlane.xlu1 %4171 }
 0x881   : > { %9173 = vrsqrt.f32 %v4173_v35  ;;  %v4174_v59 = vmax.f32 %v4172_v62, 1e-24  ;;  %v8811_v35 = vld [vmem:[%s12063_s10 + $0x4c] ss:$16 sps:$4 sm:$0xff]   ;;  %v8809_v62 = vld [vmem:[%s12063_s10 + $0x48] ss:$16 sps:$4 sm:$0xff]  }
 0x883   : > { %9175 = vrsqrt.f32 %v4174_v59  ;;  %v8814_v59 = vld [vmem:[%s12063_s10 + $0x6c] ss:$16 sps:$4 sm:$0xff]  }
 0x88b   : > { %v9174_v11 = vpop.eup %9173 }
 0x88c   : > { %v4177_v44 = vmul.f32 %v9174_v11, %v10911_v63  ;;  %v4178_v46 = vmul.f32 %v9174_v11, %v10913_v45  ;;  %v8812_v11 = vld [vmem:[%s12063_s10 + $0x68] ss:$16 sps:$4 sm:$0xff]  }
 0x88d   : > { %v9176_v50 = vpop.eup %9175 }
 0x88e   : > { %v4179_v51 = vmul.f32 %v9176_v50, %v10917_v47  ;;  %v4180_v32 = vmul.f32 %v9176_v50, %v10921_v9  ;;  %v4181_v52 = vmax.f32 %v4177_v44, 0.0  ;;  %v4182_v31 = vmax.f32 %v4178_v46, 0.0  ;;  %v8815_v44 = vld [vmem:[%s12063_s10 + $0x88] ss:$16 sps:$4 sm:$0xff]   ;;  %v8820_v46 = vld [vmem:[%s12063_s10 + $0xac] ss:$16 sps:$4 sm:$0xff]  }
 0x88f   : > { %v8823_v50 = vld [vmem:[%s12063_s10 + $0xcc] ss:$16 sps:$4 sm:$0xff]  }
 0x890   : > { %v4183_v53 = vmax.f32 %v4179_v51, 0.0  ;;  %v4184_v39 = vmax.f32 %v4180_v32, 0.0  ;;  %v4191_v48 = vsel %vm4189_vm1, %v4181_v52, 0.0  ;;  %v4192_v4 = vsel %vm4189_vm1, %v4182_v31, 0.0  ;;  %v8821_v51 = vld [vmem:[%s12063_s10 + $0xc8] ss:$16 sps:$4 sm:$0xff]  }
 0x891   : > { %v8826_v32 = vld [vmem:[%s12063_s10 + $0xec] ss:$16 sps:$4 sm:$0xff]   ;;  %v8824_v52 = vld [vmem:[%s12063_s10 + $0xe8] ss:$16 sps:$4 sm:$0xff]  }
 0x892   : > { %v4193_v12 = vsel %vm4190_vm2, %v4183_v53, 0.0  ;;  %v4194_v57 = vsel %vm4190_vm2, %v4184_v39, 0.0  ;;  %v8829_v31 = vld [vmem:[%s12063_s10 + $0x10c] ss:$16 sps:$4 sm:$0xff]   ;;  %v8827_v53 = vld [vmem:[%s12063_s10 + $0x108] ss:$16 sps:$4 sm:$0xff]  }
 0x893   : > { %v4195_v63 = vmax.f32 %v4191_v48, %v4193_v12  ;;  %v4209_v58 = vadd.f32 %v4193_v12, %v4191_v48  ;;  %v4216_v45 = vadd.f32 %v4194_v57, %v4192_v4  ;;  %v4202_v60 = vmax.f32 %v4192_v4, %v4194_v57  ;;  %v8832_v39 = vld [vmem:[%s12063_s10 + $0x12c] ss:$16 sps:$4 sm:$0xff]   ;;  %v8830_v48 = vld [vmem:[%s12063_s10 + $0x128] ss:$16 sps:$4 sm:$0xff]  }
 0x894   : > { %v8835_v4 = vld [vmem:[%s12063_s10 + $0x14c] ss:$16 sps:$4 sm:$0xff]   ;;  %v8833_v12 = vld [vmem:[%s12063_s10 + $0x148] ss:$16 sps:$4 sm:$0xff]  }
 0x895   : > { %v4196_v61 = vrot.slane %v4195_v63, 4  ;;  %v4210_v0 = vrot.slane %v4209_v58, 4  ;;  %v4217_v47 = vrot.slane %v4216_v45, 4  ;;  %v4203_v1 = vrot.slane %v4202_v60, 4  ;;  %v8838_v57 = vld [vmem:[%s12063_s10 + $0x16c] ss:$16 sps:$4 sm:$0xff]  }
 0x897   : > { %v4211_v9 = vadd.f32 %v4210_v0, %v4209_v58  ;;  %v4218_v2 = vadd.f32 %v4217_v47, %v4216_v45  ;;  %v4204_v3 = vmax.f32 %v4202_v60, %v4203_v1  ;;  %v4197_v5 = vmax.f32 %v4195_v63, %v4196_v61  ;;  %v8836_v63 = vld [vmem:[%s12063_s10 + $0x168] ss:$16 sps:$4 sm:$0xff]   ;;  %v8841_v58 = vld [vmem:[%s12063_s10 + $0x18c] ss:$16 sps:$4 sm:$0xff]  }
 0x898   : > { %v8839_v45 = vld [vmem:[%s12063_s10 + $0x188] ss:$16 sps:$4 sm:$0xff]   ;;  %v8844_v60 = vld [vmem:[%s12063_s10 + $0x1ac] ss:$16 sps:$4 sm:$0xff]  }
 0x899   : > { %v4212_v56 = vrot.slane %v4211_v9, 2  ;;  %v4219_v6 = vrot.slane %v4218_v2, 2  ;;  %v4205_v7 = vrot.slane %v4204_v3, 2  ;;  %v4198_v10 = vrot.slane %v4197_v5, 2  ;;  %v8842_v61 = vld [vmem:[%s12063_s10 + $0x1a8] ss:$16 sps:$4 sm:$0xff]  }
 0x89a   : > { %v8847_v0 = vld [vmem:[%s12063_s10 + $0x1cc] ss:$16 sps:$4 sm:$0xff]   ;;  %v8845_v47 = vld [vmem:[%s12063_s10 + $0x1c8] ss:$16 sps:$4 sm:$0xff]  }
 0x89b   : > { %v4213_v13 = vadd.f32 %v4212_v56, %v4211_v9  ;;  %v4220_v14 = vadd.f32 %v4219_v6, %v4218_v2  ;;  %v4206_v18 = vmax.f32 %v4204_v3, %v4205_v7  ;;  %v4199_v19 = vmax.f32 %v4197_v5, %v4198_v10  ;;  %v8850_v1 = vld [vmem:[%s12063_s10 + $0x1ec] ss:$16 sps:$4 sm:$0xff]   ;;  %v8848_v9 = vld [vmem:[%s12063_s10 + $0x1e8] ss:$16 sps:$4 sm:$0xff]  }
 0x89c   : > { %v8853_v2 = vld [vmem:[%s12062_s9 + $0xc] ss:$16 sps:$4 sm:$0xff]   ;;  %v8851_v3 = vld [vmem:[%s12062_s9 + $0x8] ss:$16 sps:$4 sm:$0xff]  }
 0x89d   : > { %v4214_v8 = vrot.slane %v4213_v13, 1  ;;  %v4221_v25 = vrot.slane %v4220_v14, 1  ;;  %v4207_v24 = vrot.slane %v4206_v18, 1  ;;  %v4200_v34 = vrot.slane %v4199_v19, 1  ;;  %v8856_v5 = vld [vmem:[%s12062_s9 + $0x2c] ss:$16 sps:$4 sm:$0xff]  }
 0x89e   : > { %v8854_v56 = vld [vmem:[%s12062_s9 + $0x28] ss:$16 sps:$4 sm:$0xff]   ;;  %v8859_v6 = vld [vmem:[%s12062_s9 + $0x4c] ss:$16 sps:$4 sm:$0xff]  }
 0x89f   : > { %v4215_v16 = vadd.f32 %v4214_v8, %v4213_v13  ;;  %v4222_v22 = vadd.f32 %v4221_v25, %v4220_v14  ;;  %v4208_v36 = vmax.f32 %v4206_v18, %v4207_v24  ;;  %v4201_v29 = vmax.f32 %v4199_v19, %v4200_v34  ;;  %v8857_v7 = vld [vmem:[%s12062_s9 + $0x48] ss:$16 sps:$4 sm:$0xff]   ;;  %v8862_v10 = vld [vmem:[%s12062_s9 + $0x6c] ss:$16 sps:$4 sm:$0xff]  }
 0x8a0   : > { %v8860_v13 = vld [vmem:[%s12062_s9 + $0x68] ss:$16 sps:$4 sm:$0xff]   ;;  %v8865_v14 = vld [vmem:[%s12062_s9 + $0x8c] ss:$16 sps:$4 sm:$0xff]  }
 0x8a1   : > { %v4228_v33 = vmul.f32 %v4227_v23, %v4215_v16  ;;  %v4229_v37 = vmul.f32 %v4227_v23, %v4222_v22  ;;  %v11049_v38 = vpack.c.bf16 %v4208_v36, %v4208_v36  ;;  %v11051_v41 = vpack.c.bf16 %v4201_v29, %v4201_v29  ;;  %v8863_v18 = vld [vmem:[%s12062_s9 + $0x88] ss:$16 sps:$4 sm:$0xff]   ;;  %v8868_v19 = vld [vmem:[%s12062_s9 + $0xac] ss:$16 sps:$4 sm:$0xff]  }
 0x8a2   : > { %v8866_v8 = vld [vmem:[%s12062_s9 + $0xa8] ss:$16 sps:$4 sm:$0xff]   ;;  %v8871_v25 = vld [vmem:[%s12062_s9 + $0xcc] ss:$16 sps:$4 sm:$0xff]  }
 0x8a3   : > { %v11053_v28 = vpack.c.bf16 %v4228_v33, %v4228_v33  ;;  %v4298_v54 = vpack.c.bf16 %v4229_v37, %v4229_v37  ;;  %5117 = vmatprep.mubr.bf16.mxu0 %v11049_v38  ;;  %v8869_v24 = vld [vmem:[%s12062_s9 + $0xc8] ss:$16 sps:$4 sm:$0xff]   ;;  %v8874_v34 = vld [vmem:[%s12062_s9 + $0xec] ss:$16 sps:$4 sm:$0xff]  }
 0x8a4   : > { %5118 = vmatmul.mubr.bf16.vlgmr.msra.gmra.mrb[24].mxu0 %v11051_v41  ;;  %v8872_v23 = vld [vmem:[%s12062_s9 + $0xe8] ss:$16 sps:$4 sm:$0xff]   ;;  %v8877_v16 = vld [vmem:[%s12062_s9 + $0x10c] ss:$16 sps:$4 sm:$0xff]  }
 0x8a5   : > { %4715 = vmatprep.mubr.bf16.mxu1 %v4298_v54  ;;  %v8875_v22 = vld [vmem:[%s12062_s9 + $0x108] ss:$16 sps:$4 sm:$0xff]   ;;  %v8880_v36 = vld [vmem:[%s12062_s9 + $0x12c] ss:$16 sps:$4 sm:$0xff]  }
 0x8a6   : > { %4716 = vmatmul.mubr.bf16.vlgmr.msra.gmra.mrb[32].mxu1 %v11053_v28  ;;  %v8878_v29 = vld [vmem:[%s12062_s9 + $0x128] ss:$16 sps:$4 sm:$0xff]   ;;  %v8883_v33 = vld [vmem:[%s12062_s9 + $0x14c] ss:$16 sps:$4 sm:$0xff]  }
 0x8a7   : > { %4725 = vmatpush1.bf16.msra.mxu1 %v8803_v42  ;;  %4756 = vmatprep.mubr.bf16.mxu1 %v4298_v54  ;;  %v8881_v37 = vld [vmem:[%s12062_s9 + $0x148] ss:$16 sps:$4 sm:$0xff]   ;;  %v8889_v54 = vld [vmem:[%s12062_s9 + $0x18c] ss:$16 sps:$4 sm:$0xff]  }
 0x8a8   : > { %4726 = vmatprep.subr.bf16.mxu1 %v8808_v27  ;;  %v8887_v42 = vld [vmem:[%s12062_s9 + $0x188] ss:$16 sps:$4 sm:$0xff]   ;;  %v8892_v27 = vld [vmem:[%s12062_s9 + $0x1ac] ss:$16 sps:$4 sm:$0xff]  }
 0x8ab   : > { %4727 = vmatpush1.bf16.msra.mxu1 %v8806_v55  ;;  %v8890_v55 = vld [vmem:[%s12062_s9 + $0x1a8] ss:$16 sps:$4 sm:$0xff]  }
 0x8ac   : > { %4728 = vmatprep.subr.bf16.mxu1 %v8811_v35  ;;  %v8895_v35 = vld [vmem:[%s12062_s9 + $0x1cc] ss:$16 sps:$4 sm:$0xff]  }
 0x8af   : > { %4729 = vmatpush1.bf16.msra.mxu1 %v8809_v62  ;;  %v8893_v62 = vld [vmem:[%s12062_s9 + $0x1c8] ss:$16 sps:$4 sm:$0xff]  }
 0x8b0   : > { %4730 = vmatprep.subr.bf16.mxu1 %v8814_v59  ;;  %v8898_v59 = vld [vmem:[%s12062_s9 + $0x1ec] ss:$16 sps:$4 sm:$0xff]  }
 0x8b3   : > { %4731 = vmatpush1.bf16.msra.mxu1 %v8812_v11  ;;  %v8896_v11 = vld [vmem:[%s12062_s9 + $0x1e8] ss:$16 sps:$4 sm:$0xff]  }
 0x8b4   : > { %4732 = vmatprep.subr.bf16.mxu1 %v8817_v43  ;;  %v8899_v43 = vld [vmem:[%s12066_s13] ss:$20 sps:$4 sm:$0xff]  }
 0x8b7   : > { %4733 = vmatpush1.bf16.msra.mxu1 %v8815_v44  ;;  %v8901_v44 = vld [vmem:[%s12066_s13 + $0x4] ss:$20 sps:$4 sm:$0xff]  }
 0x8b8   : > { %4734 = vmatprep.subr.bf16.mxu1 %v8820_v46  ;;  %v8902_v46 = vld [vmem:[%s12066_s13 + $0x280] ss:$20 sps:$4 sm:$0xff]   ;;  %6402 = vmatprep.subr.bf16.mxu0 %v8901_v44  ;;  %v8949_v44 = vld [vmem:[%s12066_s13 + $0x144] ss:$20 sps:$4 sm:$0xff]  }
 0x8b9   : > { %6403 = vmatpush1.bf16.msra.mxu0 %v8899_v43 }
 0x8bb   : > { %4735 = vmatpush1.bf16.msra.mxu1 %v8818_v49  ;;  %v8904_v49 = vld [vmem:[%s12066_s13 + $0x284] ss:$20 sps:$4 sm:$0xff]  }
 0x8bc   : > { %4736 = vmatprep.subr.bf16.mxu1 %v8823_v50  ;;  %v8910_v50 = vld [vmem:[%s12066_s13 + $0x2ac] ss:$20 sps:$4 sm:$0xff]  }
 0x8bf   : > { %4737 = vmatpush1.bf16.msra.mxu1 %v8821_v51  ;;  %v8905_v51 = vld [vmem:[%s12066_s13 + $0x28] ss:$20 sps:$4 sm:$0xff]  }
 0x8c0   : > { %4738 = vmatprep.subr.bf16.mxu1 %v8826_v32  ;;  %v8908_v32 = vld [vmem:[%s12066_s13 + $0x2a8] ss:$20 sps:$4 sm:$0xff]  }
 0x8c3   : > { %4739 = vmatpush1.bf16.msra.mxu1 %v8824_v52  ;;  %v8913_v52 = vld [vmem:[%s12066_s13 + $0x54] ss:$20 sps:$4 sm:$0xff]  }
 0x8c4   : > { %4740 = vmatprep.subr.bf16.mxu1 %v8829_v31  ;;  %v8916_v31 = vld [vmem:[%s12066_s13 + $0x2d4] ss:$20 sps:$4 sm:$0xff]  }
 0x8c7   : > { %4741 = vmatpush1.bf16.msra.mxu1 %v8827_v53  ;;  %v8911_v53 = vld [vmem:[%s12066_s13 + $0x50] ss:$20 sps:$4 sm:$0xff]  }
 0x8c8   : > { %4742 = vmatprep.subr.bf16.mxu1 %v8832_v39  ;;  %v8914_v39 = vld [vmem:[%s12066_s13 + $0x2d0] ss:$20 sps:$4 sm:$0xff]  }
 0x8cb   : > { %4743 = vmatpush1.bf16.msra.mxu1 %v8830_v48  ;;  %v8919_v48 = vld [vmem:[%s12066_s13 + $0x7c] ss:$20 sps:$4 sm:$0xff]  }
 0x8cc   : > { %4744 = vmatprep.subr.bf16.mxu1 %v8835_v4  ;;  %v8922_v4 = vld [vmem:[%s12066_s13 + $0x2fc] ss:$20 sps:$4 sm:$0xff]  }
 0x8cf   : > { %4745 = vmatpush1.bf16.msra.mxu1 %v8833_v12  ;;  %v8917_v12 = vld [vmem:[%s12066_s13 + $0x78] ss:$20 sps:$4 sm:$0xff]  }
 0x8d0   : > { %4746 = vmatprep.subr.bf16.mxu1 %v8838_v57  ;;  %v8920_v57 = vld [vmem:[%s12066_s13 + $0x2f8] ss:$20 sps:$4 sm:$0xff]  }
 0x8d3   : > { %4747 = vmatpush1.bf16.msra.mxu1 %v8836_v63  ;;  %v8925_v63 = vld [vmem:[%s12066_s13 + $0xa4] ss:$20 sps:$4 sm:$0xff]  }
 0x8d4   : > { %4748 = vmatprep.subr.bf16.mxu1 %v8841_v58  ;;  %v8928_v58 = vld [vmem:[%s12066_s13 + $0x324] ss:$20 sps:$4 sm:$0xff]  }
 0x8d7   : > { %4749 = vmatpush1.bf16.msra.mxu1 %v8839_v45  ;;  %v8923_v45 = vld [vmem:[%s12066_s13 + $0xa0] ss:$20 sps:$4 sm:$0xff]  }
 0x8d8   : > { %4750 = vmatprep.subr.bf16.mxu1 %v8844_v60  ;;  %v8926_v60 = vld [vmem:[%s12066_s13 + $0x320] ss:$20 sps:$4 sm:$0xff]  }
 0x8db   : > { %4751 = vmatpush1.bf16.msra.mxu1 %v8842_v61  ;;  %v8931_v61 = vld [vmem:[%s12066_s13 + $0xcc] ss:$20 sps:$4 sm:$0xff]  }
 0x8dc   : > { %4752 = vmatprep.subr.bf16.mxu1 %v8847_v0  ;;  %v8934_v0 = vld [vmem:[%s12066_s13 + $0x34c] ss:$20 sps:$4 sm:$0xff]  }
 0x8df   : > { %4753 = vmatpush1.bf16.msra.mxu1 %v8845_v47  ;;  %v8929_v47 = vld [vmem:[%s12066_s13 + $0xc8] ss:$20 sps:$4 sm:$0xff]  }
 0x8e0   : > { %4754 = vmatprep.subr.bf16.mxu1 %v8850_v1  ;;  %v8932_v1 = vld [vmem:[%s12066_s13 + $0x348] ss:$20 sps:$4 sm:$0xff]  }
 0x8e3   : > { %4755 = vmatpush1.bf16.msra.mxu1 %v8848_v9  ;;  %v5171_v9 = vpop.permute.xlu0 %5170 }
 0x8e4   : > { %5126 = vmatprep.subr.bf16.mxu1 %v8853_v2  ;;  %v11323_v2 = vrot.slane %v5171_v9, %v9843_v20  ;;  %v8973_v9 = vld [vmem:[%s12066_s13 + $0x1e4] ss:$20 sps:$4 sm:$0xff]  }
 0x8e6   : > { %4757 = vmatmul.mubr.bf16.vlgmr.msra.gmra.mrb[36].mxu1 %v11053_v28  ;;  %v8884_v28 = vld [vmem:[%s12062_s9 + $0x168] ss:$16 sps:$4 sm:$0xff]  }
 0x8e7   : > { %5127 = vmatpush1.bf16.msra.mxu1 %v8851_v3  ;;  %5158 = vmatprep.mubr.bf16.mxu1 %v11049_v38  ;;  %v8886_v38 = vld [vmem:[%s12062_s9 + $0x16c] ss:$16 sps:$4 sm:$0xff]   ;;  %v5167_v3 = vld [vmem:[%s12064_s11] sm:$0xf] }
 0x8e8   : > { %5128 = vmatprep.subr.bf16.mxu1 %v8856_v5  ;;  %v11329_v5 = vmul.f32 %v11323_v2, %v5167_v3  ;;  %v8976_v3 = vld [vmem:[%s12066_s13 + $0x464] ss:$20 sps:$4 sm:$0xff]  }
 0x8eb   : > { %5129 = vmatpush1.bf16.msra.mxu1 %v8854_v56 }
 0x8ec   : > { %5130 = vmatprep.subr.bf16.mxu1 %v8859_v6  ;;  %v11334_v6 = vld [vmem:[%s12065_s12] sm:$0xf] }
 0x8ef   : > { %5131 = vmatpush1.bf16.msra.mxu1 %v8857_v7 }
 0x8f0   : > { %5132 = vmatprep.subr.bf16.mxu1 %v8862_v10  ;;  %v5182_v10 = vrot.slane %v11329_v5, %v9843_v20 }
 0x8f3   : > { %5133 = vmatpush1.bf16.msra.mxu1 %v8860_v13  ;;  %v5267_v13 = vpop.permute.xlu1 %5266 }
 0x8f4   : > { %5134 = vmatprep.subr.bf16.mxu1 %v8865_v14  ;;  %v8937_v14 = vld [vmem:[%s12066_s13 + $0xf4] ss:$20 sps:$4 sm:$0xff]  }
 0x8f7   : > { %5135 = vmatpush1.bf16.msra.mxu1 %v8863_v18  ;;  %v8940_v18 = vld [vmem:[%s12066_s13 + $0x374] ss:$20 sps:$4 sm:$0xff]  }
 0x8f8   : > { %5136 = vmatprep.subr.bf16.mxu1 %v8868_v19 }
 0x8fb   : > { %5137 = vmatpush1.bf16.msra.mxu1 %v8866_v8 }
 0x8fc   : > { %5138 = vmatprep.subr.bf16.mxu1 %v8871_v25  ;;  %v5186_v25 = vrot.slane %v11329_v5, %v9846_v21 }
 0x8ff   : > { %5139 = vmatpush1.bf16.msra.mxu1 %v8869_v24  ;;  %v8935_v24 = vld [vmem:[%s12066_s13 + $0xf0] ss:$20 sps:$4 sm:$0xff]  }
 0x900   : > { %5140 = vmatprep.subr.bf16.mxu1 %v8874_v34  ;;  %v8938_v34 = vld [vmem:[%s12066_s13 + $0x370] ss:$20 sps:$4 sm:$0xff]  }
 0x903   : > { %5141 = vmatpush1.bf16.msra.mxu1 %v8872_v23 }
 0x904   : > { %5142 = vmatprep.subr.bf16.mxu1 %v8877_v16  ;;  %v5208_v16 = vrot.slane %v11334_v6, %v9843_v20 }
 0x907   : > { %5143 = vmatpush1.bf16.msra.mxu1 %v8875_v22 }
 0x908   : > { %5144 = vmatprep.subr.bf16.mxu1 %v8880_v36 }
 0x90b   : > { %5145 = vmatpush1.bf16.msra.mxu1 %v8878_v29 }
 0x90c   : > { %5146 = vmatprep.subr.bf16.mxu1 %v8883_v33  ;;  %v5212_v33 = vrot.slane %v11334_v6, %v9846_v21 }
 0x90f   : > { %5147 = vmatpush1.bf16.msra.mxu1 %v8881_v37 }
 0x910   : > { %5148 = vmatprep.subr.bf16.mxu1 %v8886_v38 }
 0x913   : > { %5149 = vmatpush1.bf16.msra.mxu1 %v8884_v28 }
 0x914   : > { %5150 = vmatprep.subr.bf16.mxu1 %v8889_v54  ;;  %v11357_v54 = vrot.slane %v5267_v13, %v9843_v20 }
 0x917   : > { %5151 = vmatpush1.bf16.msra.mxu1 %v8887_v42  ;;  %v8943_v42 = vld [vmem:[%s12066_s13 + $0x11c] ss:$20 sps:$4 sm:$0xff]  }
 0x918   : > { %5152 = vmatprep.subr.bf16.mxu1 %v8892_v27  ;;  %v8946_v27 = vld [vmem:[%s12066_s13 + $0x39c] ss:$20 sps:$4 sm:$0xff]  }
 0x91b   : > { %5153 = vmatpush1.bf16.msra.mxu1 %v8890_v55 }
 0x91c   : > { %5154 = vmatprep.subr.bf16.mxu1 %v8895_v35  ;;  %v8941_v35 = vld [vmem:[%s12066_s13 + $0x118] ss:$20 sps:$4 sm:$0xff]  }
 0x91f   : > { %5155 = vmatpush1.bf16.msra.mxu1 %v8893_v62  ;;  %v8944_v62 = vld [vmem:[%s12066_s13 + $0x398] ss:$20 sps:$4 sm:$0xff]  }
 0x920   : > { %5156 = vmatprep.subr.bf16.mxu1 %v8898_v59 }
 0x923   : > { %5157 = vmatpush1.bf16.msra.mxu1 %v8896_v11 }
 0x924   : > { %6443 = vmatprep.subr.bf16.mxu1 %v8904_v49 }
 0x926   : > { %5159 = vmatmul.mubr.bf16.vlgmr.msra.gmra.mrb[40].mxu1 %v11051_v41  ;;  %v8907_v41 = vld [vmem:[%s12066_s13 + $0x2c] ss:$20 sps:$4 sm:$0xff]  }
 0x927   : > { %6444 = vmatpush1.bf16.msra.mxu1 %v8902_v46  ;;  %6404 = vmatprep.subr.bf16.mxu0 %v8907_v41  ;;  %v8952_v46 = vld [vmem:[%s12066_s13 + $0x3c4] ss:$20 sps:$4 sm:$0xff]  }
 0x928   : > { %6445 = vmatprep.subr.bf16.mxu1 %v8910_v50  ;;  %6405 = vmatpush1.bf16.msra.mxu0 %v8905_v51  ;;  %v8947_v50 = vld [vmem:[%s12066_s13 + $0x140] ss:$20 sps:$4 sm:$0xff]  }
 0x929   : > { %6406 = vmatprep.subr.bf16.mxu0 %v8913_v52  ;;  %v8950_v51 = vld [vmem:[%s12066_s13 + $0x3c0] ss:$20 sps:$4 sm:$0xff]  }
 0x92b   : > { %6446 = vmatpush1.bf16.msra.mxu1 %v8908_v32 }
 0x92c   : > { %6447 = vmatprep.subr.bf16.mxu1 %v8916_v31  ;;  %6407 = vmatpush1.bf16.msra.mxu0 %v8911_v53  ;;  %v8955_v53 = vld [vmem:[%s12066_s13 + $0x16c] ss:$20 sps:$4 sm:$0xff]  }
 0x92d   : > { %6408 = vmatprep.subr.bf16.mxu0 %v8919_v48 }
 0x92f   : > { %6448 = vmatpush1.bf16.msra.mxu1 %v8914_v39  ;;  %v8958_v39 = vld [vmem:[%s12066_s13 + $0x3ec] ss:$20 sps:$4 sm:$0xff]  }
 0x930   : > { %6449 = vmatprep.subr.bf16.mxu1 %v8922_v4  ;;  %6409 = vmatpush1.bf16.msra.mxu0 %v8917_v12  ;;  %v8953_v4 = vld [vmem:[%s12066_s13 + $0x168] ss:$20 sps:$4 sm:$0xff]  }
 0x931   : > { %6410 = vmatprep.subr.bf16.mxu0 %v8925_v63  ;;  %v8956_v12 = vld [vmem:[%s12066_s13 + $0x3e8] ss:$20 sps:$4 sm:$0xff]  }
 0x932   : > { %v8964_v63 = vld [vmem:[%s12066_s13 + $0x414] ss:$20 sps:$4 sm:$0xff]  }
 0x933   : > { %6450 = vmatpush1.bf16.msra.mxu1 %v8920_v57  ;;  %v8961_v57 = vld [vmem:[%s12066_s13 + $0x194] ss:$20 sps:$4 sm:$0xff]  }
 0x934   : > { %6451 = vmatprep.subr.bf16.mxu1 %v8928_v58  ;;  %6411 = vmatpush1.bf16.msra.mxu0 %v8923_v45  ;;  %v8959_v58 = vld [vmem:[%s12066_s13 + $0x190] ss:$20 sps:$4 sm:$0xff]  }
 0x935   : > { %6412 = vmatprep.subr.bf16.mxu0 %v8931_v61  ;;  %v8962_v45 = vld [vmem:[%s12066_s13 + $0x410] ss:$20 sps:$4 sm:$0xff]  }
 0x936   : > { %v8970_v61 = vld [vmem:[%s12066_s13 + $0x43c] ss:$20 sps:$4 sm:$0xff]  }
 0x937   : > { %6452 = vmatpush1.bf16.msra.mxu1 %v8926_v60  ;;  %v8967_v60 = vld [vmem:[%s12066_s13 + $0x1bc] ss:$20 sps:$4 sm:$0xff]  }
 0x938   : > { %6453 = vmatprep.subr.bf16.mxu1 %v8934_v0  ;;  %6413 = vmatpush1.bf16.msra.mxu0 %v8929_v47  ;;  %v8965_v0 = vld [vmem:[%s12066_s13 + $0x1b8] ss:$20 sps:$4 sm:$0xff]  }
 0x939   : > { %6414 = vmatprep.subr.bf16.mxu0 %v8937_v14  ;;  %v8968_v47 = vld [vmem:[%s12066_s13 + $0x438] ss:$20 sps:$4 sm:$0xff]  }
 0x93a   : > { %v8979_v14 = vld [vmem:[%s12066_s13 + $0x20c] ss:$20 sps:$4 sm:$0xff]  }
 0x93b   : > { %6454 = vmatpush1.bf16.msra.mxu1 %v8932_v1 }
 0x93c   : > { %6455 = vmatprep.subr.bf16.mxu1 %v8940_v18  ;;  %6415 = vmatpush1.bf16.msra.mxu0 %v8935_v24  ;;  %v8977_v18 = vld [vmem:[%s12066_s13 + $0x208] ss:$20 sps:$4 sm:$0xff]  }
 0x93d   : > { %6416 = vmatprep.subr.bf16.mxu0 %v8943_v42  ;;  %v8988_v24 = vld [vmem:[%s12066_s13 + $0x4b4] ss:$20 sps:$4 sm:$0xff]  }
 0x93f   : > { %6456 = vmatpush1.bf16.msra.mxu1 %v8938_v34  ;;  %v8983_v34 = vld [vmem:[%s12066_s13 + $0x230] ss:$20 sps:$4 sm:$0xff]  }
 0x940   : > { %6457 = vmatprep.subr.bf16.mxu1 %v8946_v27  ;;  %6417 = vmatpush1.bf16.msra.mxu0 %v8941_v35 }
 0x941   : > { %6418 = vmatprep.subr.bf16.mxu0 %v8949_v44  ;;  %v5194_v44 = vrot.slane %v11329_v5, %v9862_v30 }
 0x943   : > { %6458 = vmatpush1.bf16.msra.mxu1 %v8944_v62  ;;  %v5190_v62 = vrot.slane %v11329_v5, %v9854_v26 }
 0x944   : > { %6459 = vmatprep.subr.bf16.mxu1 %v8952_v46  ;;  %6419 = vmatpush1.bf16.msra.mxu0 %v8947_v50 }
 0x945   : > { %6420 = vmatprep.subr.bf16.mxu0 %v8955_v53 }
 0x947   : > { %6460 = vmatpush1.bf16.msra.mxu1 %v8950_v51 }
 0x948   : > { %6461 = vmatprep.subr.bf16.mxu1 %v8958_v39  ;;  %6421 = vmatpush1.bf16.msra.mxu0 %v8953_v4 }
 0x949   : > { %6422 = vmatprep.subr.bf16.mxu0 %v8961_v57 }
 0x94b   : > { %6462 = vmatpush1.bf16.msra.mxu1 %v8956_v12 }
 0x94c   : > { %6463 = vmatprep.subr.bf16.mxu1 %v8964_v63  ;;  %6423 = vmatpush1.bf16.msra.mxu0 %v8959_v58 }
 0x94d   : > { %6424 = vmatprep.subr.bf16.mxu0 %v8967_v60 }
 0x94f   : > { %6464 = vmatpush1.bf16.msra.mxu1 %v8962_v45 }
 0x950   : > { %6465 = vmatprep.subr.bf16.mxu1 %v8970_v61  ;;  %6425 = vmatpush1.bf16.msra.mxu0 %v8965_v0 }
 0x951   : > { %6426 = vmatprep.subr.bf16.mxu0 %v8973_v9 }
 0x953   : > { %6466 = vmatpush1.bf16.msra.mxu1 %v8968_v47 }
 0x954   : > { %6467 = vmatprep.subr.bf16.mxu1 %v8976_v3 }
 0x977   : > { %v5119_v56 = vpop.f32.mrb[24].mxu0 }
 0x978   : > { %v5121_v7 = vpop.f32.mrb[25].mxu0 }
 0x979   : > { %v4717_v19 = vpop.f32.mrb[32].mxu1  ;;  %v5123_v8 = vpop.f32.mrb[26].mxu0 }
 0x97a   : > { %v5120_v23 = vadd.f32 %v5119_v56, %v4717_v19  ;;  %v4719_v22 = vpop.f32.mrb[33].mxu1  ;;  %v5124_v36 = vpop.f32.mrb[27].mxu0  ;;  %v8980_v19 = vld [vmem:[%s12066_s13 + $0x488] ss:$20 sps:$4 sm:$0xff]   ;;  %v8982_v8 = vld [vmem:[%s12066_s13 + $0x48c] ss:$20 sps:$4 sm:$0xff]  }
 0x97b   : > { %v5122_v29 = vadd.f32 %v5121_v7, %v4719_v22  ;;  %v4721_v37 = vpop.f32.mrb[34].mxu1  ;;  %v8971_v7 = vld [vmem:[%s12066_s13 + $0x1e0] ss:$20 sps:$4 sm:$0xff]   ;;  %v8994_v22 = vld [vmem:[%s12066_s13 + $0x4dc] ss:$20 sps:$4 sm:$0xff]  }
 0x97c   : > { %v5199_v38 = vadd.f32 %v5182_v10, %v5120_v23  ;;  %v4722_v28 = vpop.f32.mrb[35].mxu1  ;;  %v8974_v10 = vld [vmem:[%s12066_s13 + $0x460] ss:$20 sps:$4 sm:$0xff]   ;;  %6427 = vmatpush1.bf16.msra.mxu0 %v8971_v7  ;;  %v8986_v23 = vld [vmem:[%s12066_s13 + $0x4b0] ss:$20 sps:$4 sm:$0xff]  }
 0x97d   : > { %v5200_v55 = vadd.f32 %v5186_v25, %v5122_v29  ;;  %6468 = vmatpush1.bf16.msra.mxu1 %v8974_v10  ;;  %6428 = vmatprep.subr.bf16.mxu0 %v8979_v14  ;;  %v8985_v25 = vld [vmem:[%s12066_s13 + $0x234] ss:$20 sps:$4 sm:$0xff]   ;;  %v8989_v36 = vld [vmem:[%s12066_s13 + $0x258] ss:$20 sps:$4 sm:$0xff]   ;;  %v5289_v7 = vld [vmem:[%s724_s23] sm:$0xf] }
 0x97e   : > { %v11371_v59 = vadd.f32 %v5208_v16, %v5199_v38  ;;  %6469 = vmatprep.subr.bf16.mxu1 %v8982_v8  ;;  %v8991_v16 = vld [vmem:[%s12066_s13 + $0x25c] ss:$20 sps:$4 sm:$0xff]   ;;  %v8992_v29 = vld [vmem:[%s12066_s13 + $0x4d8] ss:$20 sps:$4 sm:$0xff]   ;;  %v5290_v14 = vmul.f32 0.01, %v5289_v7 }
 0x97f   : > { %v11373_v11 = vadd.f32 %v5212_v33, %v5200_v55  ;;  %v8997_v33 = vld [vmem:[%s12066_s13 + $0xc] ss:$20 sps:$4 sm:$0xff]   ;;  %v9302_v55 = vmov 1966171168   ;;  %v9060_v7 = vld [vmem:[%s12066_s13 + $0x41c] ss:$20 sps:$4 sm:$0xff]  }
 0x980   : > { %v5273_v43 = vmul.f32 %v11357_v54, %v11371_v59  ;;  %6429 = vmatpush1.bf16.msra.mxu0 %v8977_v18  ;;  %v9000_v37 = vld [vmem:[%s12066_s13 + $0x28c] ss:$20 sps:$4 sm:$0xff]   ;;  %v5236_v35 = vunpack.c.l.s4 %v9302_v55  ;;  %v9012_v55 = vld [vmem:[%s12066_s13 + $0x2dc] ss:$20 sps:$4 sm:$0xff]  }
 0x981   : > { %v5233_v49 = vcombine.low %v11371_v59, %v11373_v11  ;;  %v5274_v41 = vmul.f32 %v11357_v54, %v11373_v11  ;;  %6470 = vmatpush1.bf16.msra.mxu1 %v8980_v19  ;;  %6430 = vmatprep.subr.bf16.mxu0 %v8985_v25 }
 0x982   : > { %v5277_v32 = vmul.f32 0.5, %v5273_v43  ;;  %6471 = vmatprep.subr.bf16.mxu1 %v8988_v24  ;;  %v5237_v51 = vunpack.c.0.s8 %v5236_v35  ;;  %v9007_v35 = vld [vmem:[%s12066_s13 + $0x58] ss:$20 sps:$4 sm:$0xff]  }
 0x983   : > { %v5278_v52 = vmul.f32 0.5, %v5274_v41  ;;  %v5216_v41 = vrot.slane %v11334_v6, %v9854_v26 }
 0x984   : > { %v5281_v31 = vmul.f32 1.442695, %v5277_v32  ;;  %6431 = vmatpush1.bf16.msra.mxu0 %v8983_v34  ;;  %v5240_v12 = vsub.s32 %v5237_v51, %v9840_v17  ;;  %v9024_v51 = vld [vmem:[%s12066_s13 + $0x32c] ss:$20 sps:$4 sm:$0xff]  }
 0x985   : > { %v5283_v48 = vmul.f32 1.442695, %v5278_v52  ;;  %6472 = vmatpush1.bf16.msra.mxu1 %v8986_v23  ;;  %6432 = vmatprep.subr.bf16.mxu0 %v8991_v16  ;;  %v5220_v52 = vrot.slane %v11334_v6, %v9862_v30 }
 0x986   : > { %9177 = vpow2.f32 %v5281_v31  ;;  %6473 = vmatprep.subr.bf16.mxu1 %v8994_v22  ;;  %v5241_v6 = vrot.slane %v5233_v49, %v5240_v12 }
 0x987   : > { %9179 = vpow2.f32 %v5283_v48 }
 0x988   : > { %6433 = vmatpush1.bf16.msra.mxu0 %v8989_v36 }
 0x989   : > { %6474 = vmatpush1.bf16.msra.mxu1 %v8992_v29  ;;  %6484 = vmatprep.subr.bf16.mxu0 %v8997_v33  ;;  %v8995_v29 = vld [vmem:[%s12066_s13 + $0x8] ss:$20 sps:$4 sm:$0xff]  }
 0x98a   : > { %6525 = vmatprep.subr.bf16.mxu1 %v9000_v37  ;;  %v8998_v33 = vld [vmem:[%s12066_s13 + $0x288] ss:$20 sps:$4 sm:$0xff]  }
 0x990   : > { %v11429_v1 = vpop.eup %9177 }
 0x991   : > { %v11437_v56 = vpop.eup %9179 }
 0x992   : > { %v5295_v13 = vcombine.low %v11429_v1, %v11437_v56 }
 0x994   : > { %v5303_v10 = vrot.slane %v5295_v13, %v5240_v12 }
 0x9b9   : > { %v4758_v38 = vpop.f32.mrb[36].mxu1 }
 0x9ba   : > { %v4760_v28 = vpop.f32.mrb[37].mxu1 }
 0x9bb   : > { %v4762_v42 = vpop.f32.mrb[38].mxu1 }
 0x9bc   : > { %v4763_v27 = vpop.f32.mrb[39].mxu1  ;;  %v9004_v42 = vld [vmem:[%s12066_s13 + $0x2b0] ss:$20 sps:$4 sm:$0xff]  }
 0x9bd   : > { %v9009_v27 = vld [vmem:[%s12066_s13 + $0x5c] ss:$20 sps:$4 sm:$0xff]  }
 0x9f9   : > { %v5160_v43 = vpop.f32.mrb[40].mxu1 }
 0x9fa   : > { %v5161_v46 = vadd.f32 %v5160_v43, %v4758_v38  ;;  %v5162_v50 = vpop.f32.mrb[41].mxu1  ;;  %v9015_v43 = vld [vmem:[%s12066_s13 + $0x84] ss:$20 sps:$4 sm:$0xff]  }
 0x9fb   : > { %v5163_v32 = vadd.f32 %v5162_v50, %v4760_v28  ;;  %v5164_v31 = vpop.f32.mrb[42].mxu1  ;;  %v9001_v28 = vld [vmem:[%s12066_s13 + $0x30] ss:$20 sps:$4 sm:$0xff]   ;;  %v9021_v50 = vld [vmem:[%s12066_s13 + $0xac] ss:$20 sps:$4 sm:$0xff]  }
 0x9fc   : > { %v5201_v53 = vadd.f32 %v5190_v62, %v5161_v46  ;;  %v5165_v39 = vpop.f32.mrb[43].mxu1  ;;  %v9010_v62 = vld [vmem:[%s12066_s13 + $0x2d8] ss:$20 sps:$4 sm:$0xff]   ;;  %v9013_v46 = vld [vmem:[%s12066_s13 + $0x80] ss:$20 sps:$4 sm:$0xff]  }
 0x9fd   : > { %v5202_v48 = vadd.f32 %v5194_v44, %v5163_v32  ;;  %v9018_v44 = vld [vmem:[%s12066_s13 + $0x304] ss:$20 sps:$4 sm:$0xff]   ;;  %v9019_v32 = vld [vmem:[%s12066_s13 + $0xa8] ss:$20 sps:$4 sm:$0xff]  }
 0x9fe   : > { %v5227_v4 = vadd.f32 %v5216_v41, %v5201_v53  ;;  %v9016_v41 = vld [vmem:[%s12066_s13 + $0x300] ss:$20 sps:$4 sm:$0xff]   ;;  %v9025_v39 = vld [vmem:[%s12066_s13 + $0xd0] ss:$20 sps:$4 sm:$0xff]  }
 0x9ff   : > { %v5228_v57 = vadd.f32 %v5220_v52, %v5202_v48  ;;  %v9022_v52 = vld [vmem:[%s12066_s13 + $0x328] ss:$20 sps:$4 sm:$0xff]   ;;  %v9028_v48 = vld [vmem:[%s12066_s13 + $0x350] ss:$20 sps:$4 sm:$0xff]  }
 0xa00   : > { %v5275_v5 = vmul.f32 %v11357_v54, %v5227_v4  ;;  %v9027_v31 = vld [vmem:[%s12066_s13 + $0xd4] ss:$20 sps:$4 sm:$0xff]  }
 0xa01   : > { %v5234_v63 = vcombine.low %v5227_v4, %v5228_v57  ;;  %v5276_v58 = vmul.f32 %v11357_v54, %v5228_v57  ;;  %v9030_v53 = vld [vmem:[%s12066_s13 + $0x354] ss:$20 sps:$4 sm:$0xff]  }
 0xa02   : > { %v5279_v45 = vmul.f32 0.5, %v5275_v5  ;;  %v9034_v5 = vld [vmem:[%s12066_s13 + $0x378] ss:$20 sps:$4 sm:$0xff]  }
 0xa03   : > { %v5248_v60 = vrot.slane %v5234_v63, %v5240_v12  ;;  %v5280_v61 = vmul.f32 0.5, %v5276_v58  ;;  %v9039_v63 = vld [vmem:[%s12066_s13 + $0x124] ss:$20 sps:$4 sm:$0xff]  }
 0xa04   : > { %v5285_v0 = vmul.f32 1.442695, %v5279_v45  ;;  %v9042_v58 = vld [vmem:[%s12066_s13 + $0x3a4] ss:$20 sps:$4 sm:$0xff]   ;;  %v9037_v45 = vld [vmem:[%s12066_s13 + $0x120] ss:$20 sps:$4 sm:$0xff]  }
 0xa05   : > { %v5287_v17 = vmul.f32 1.442695, %v5280_v61  ;;  %v5249_v47 = vcombine.low %v5241_v6, %v5248_v60  ;;  %v9040_v6 = vld [vmem:[%s12066_s13 + $0x3a0] ss:$20 sps:$4 sm:$0xff]  }
 0xa06   : > { %9181 = vpow2.f32 %v5285_v0  ;;  %v9045_v60 = vld [vmem:[%s12066_s13 + $0x14c] ss:$20 sps:$4 sm:$0xff]   ;;  %v9043_v0 = vld [vmem:[%s12066_s13 + $0x148] ss:$20 sps:$4 sm:$0xff]  }
 0xa07   : > { %9183 = vpow2.f32 %v5287_v17  ;;  %v5256_v9 = vrot.slane %v5249_v47, %v5240_v12  ;;  %v9048_v61 = vld [vmem:[%s12066_s13 + $0x3cc] ss:$20 sps:$4 sm:$0xff]   ;;  %v9046_v17 = vld [vmem:[%s12066_s13 + $0x3c8] ss:$20 sps:$4 sm:$0xff]  }
 0xa08   : > { %v9051_v47 = vld [vmem:[%s12066_s13 + $0x174] ss:$20 sps:$4 sm:$0xff]  }
 0xa09   : > { %5262 = vst.msk [vmem:[%s11508_s0] sm:$0xf] %vm5260_vm3, %v5256_v9  ;;  %v9054_v9 = vld [vmem:[%s12066_s13 + $0x3f4] ss:$20 sps:$4 sm:$0xff]  }
 0xa10   : > { %v9182_v54 = vpop.eup %9181 }
 0xa11   : > { %v9184_v49 = vpop.eup %9183 }
 0xa12   : > { %v5296_v3 = vcombine.low %v9182_v54, %v9184_v49  ;;  %v9049_v54 = vld [vmem:[%s12066_s13 + $0x170] ss:$20 sps:$4 sm:$0xff]  }
 0xa13   : > { %v9052_v49 = vld [vmem:[%s12066_s13 + $0x3f0] ss:$20 sps:$4 sm:$0xff]  }
 0xa14   : > { %v5310_v15 = vrot.slane %v5296_v3, %v5240_v12  ;;  %v9057_v3 = vld [vmem:[%s12066_s13 + $0x19c] ss:$20 sps:$4 sm:$0xff]  }
 0xa16   : > { %v5311_v18 = vcombine.low %v5303_v10, %v5310_v15  ;;  %v9055_v10 = vld [vmem:[%s12066_s13 + $0x198] ss:$20 sps:$4 sm:$0xff]  }
 0xa17   : > { %v9058_v15 = vld [vmem:[%s12066_s13 + $0x418] ss:$20 sps:$4 sm:$0xff]  }
 0xa18   : > { %v5318_v19 = vrot.slane %v5311_v18, %v5240_v12  ;;  %v9036_v12 = vld [vmem:[%s12066_s13 + $0x37c] ss:$20 sps:$4 sm:$0xff]   ;;  %v9066_v18 = vld [vmem:[%s12066_s13 + $0x444] ss:$20 sps:$4 sm:$0xff]  }
 0xa1a   : > { %v5320_v8 = vmul.f32 %v5318_v19, %v5290_v14  ;;  %v9063_v14 = vld [vmem:[%s12066_s13 + $0x1c4] ss:$20 sps:$4 sm:$0xff]   ;;  %v9061_v19 = vld [vmem:[%s12066_s13 + $0x1c0] ss:$20 sps:$4 sm:$0xff]  }
 0xa1c   : > { %v5329_v25 = vrot.slane %v5320_v8, %v9846_v21  ;;  %v5337_v24 = vrot.slane %v5320_v8, %v9862_v30  ;;  %v5325_v34 = vrot.slane %v5320_v8, %v9843_v20  ;;  %v5333_v23 = vrot.slane %v5320_v8, %v9854_v26  ;;  %v9064_v8 = vld [vmem:[%s12066_s13 + $0x440] ss:$20 sps:$4 sm:$0xff]  }
 0xa1e   : > { %v5343_v16 = vadd.f32 %v5329_v25, %v11373_v11  ;;  %v5345_v22 = vadd.f32 %v5337_v24, %v5228_v57  ;;  %v5342_v36 = vadd.f32 %v5325_v34, %v11371_v59  ;;  %v5344_v1 = vadd.f32 %v5333_v23, %v5227_v4  ;;  %v9003_v59 = vld [vmem:[%s12066_s13 + $0x34] ss:$20 sps:$4 sm:$0xff]   ;;  %v9033_v4 = vld [vmem:[%s12066_s13 + $0xfc] ss:$20 sps:$4 sm:$0xff]   ;;  %v9031_v57 = vld [vmem:[%s12066_s13 + $0xf8] ss:$20 sps:$4 sm:$0xff]  }
 0xa1f   : > { %v9006_v11 = vld [vmem:[%s12066_s13 + $0x2b4] ss:$20 sps:$4 sm:$0xff]   ;;  %v9069_v25 = vld [vmem:[%s12066_s13 + $0x1ec] ss:$20 sps:$4 sm:$0xff]  }
 0xa20   : > { %v11524_v56 = vpack.c.bf16 %v5343_v16, %v5343_v16  ;;  %v11526_v13 = vpack.c.bf16 %v5345_v22, %v5345_v22  ;;  %v11534_v37 = vpack.c.bf16 %v5342_v36, %v5342_v36  ;;  %v11536_v38 = vpack.c.bf16 %v5344_v1, %v5344_v1  ;;  %v9072_v24 = vld [vmem:[%s12066_s13 + $0x46c] ss:$20 sps:$4 sm:$0xff]   ;;  %v9067_v34 = vld [vmem:[%s12066_s13 + $0x1e8] ss:$20 sps:$4 sm:$0xff]   ;;  %v9073_v36 = vld [vmem:[%s12066_s13 + $0x210] ss:$20 sps:$4 sm:$0xff]  }
 0xa21   : > { %v9070_v23 = vld [vmem:[%s12066_s13 + $0x468] ss:$20 sps:$4 sm:$0xff]   ;;  %v9076_v1 = vld [vmem:[%s12066_s13 + $0x490] ss:$20 sps:$4 sm:$0xff]  }
 0xa22   : > { %6434 = vmatprep.mubr.bf16.mxu0 %v11524_v56  ;;  %6475 = vmatprep.mubr.bf16.mxu1 %v11526_v13  ;;  %v9075_v16 = vld [vmem:[%s12066_s13 + $0x214] ss:$20 sps:$4 sm:$0xff]  }
 0xa23   : > { %6435 = vmatmul.mubr.bf16.vlgmr.msra.gmra.mrb[28].mxu0 %v11534_v37  ;;  %6476 = vmatmul.mubr.bf16.vlgmr.msra.gmra.mrb[44].mxu1 %v11536_v38  ;;  %v9078_v22 = vld [vmem:[%s12066_s13 + $0x494] ss:$20 sps:$4 sm:$0xff]  }
 0xa24   : > { %6485 = vmatpush1.bf16.msra.mxu0 %v8995_v29  ;;  %6526 = vmatpush1.bf16.msra.mxu1 %v8998_v33  ;;  %v9081_v29 = vld [vmem:[%s12066_s13 + $0x23c] ss:$20 sps:$4 sm:$0xff]  }
 0xa25   : > { %6516 = vmatprep.mubr.bf16.mxu0 %v11524_v56  ;;  %6557 = vmatprep.mubr.bf16.mxu1 %v11526_v13  ;;  %v9084_v33 = vld [vmem:[%s12066_s13 + $0x4bc] ss:$20 sps:$4 sm:$0xff]  }
 0xa26   : > { %6486 = vmatprep.subr.bf16.mxu0 %v9003_v59  ;;  %6527 = vmatprep.subr.bf16.mxu1 %v9006_v11  ;;  %v9079_v59 = vld [vmem:[%s12066_s13 + $0x238] ss:$20 sps:$4 sm:$0xff]  }
 0xa27   : > { %v9082_v11 = vld [vmem:[%s12066_s13 + $0x4b8] ss:$20 sps:$4 sm:$0xff]  }
 0xa28   : > { %6487 = vmatpush1.bf16.msra.mxu0 %v9001_v28  ;;  %6528 = vmatpush1.bf16.msra.mxu1 %v9004_v42  ;;  %v9087_v28 = vld [vmem:[%s12066_s13 + $0x264] ss:$20 sps:$4 sm:$0xff]  }
 0xa29   : > { %6488 = vmatprep.subr.bf16.mxu0 %v9009_v27  ;;  %6529 = vmatprep.subr.bf16.mxu1 %v9012_v55  ;;  %v9090_v42 = vld [vmem:[%s12066_s13 + $0x4e4] ss:$20 sps:$4 sm:$0xff]   ;;  %v9085_v27 = vld [vmem:[%s12066_s13 + $0x260] ss:$20 sps:$4 sm:$0xff]  }
 0xa2a   : > { %v9088_v55 = vld [vmem:[%s12066_s13 + $0x4e0] ss:$20 sps:$4 sm:$0xff]  }
 0xa2c   : > { %6489 = vmatpush1.bf16.msra.mxu0 %v9007_v35  ;;  %6530 = vmatpush1.bf16.msra.mxu1 %v9010_v62  ;;  %v9091_v35 = vld [vmem:[%s12066_s13 + $0x150] ss:$20 sps:$4 sm:$0xff]  }
 0xa2d   : > { %6490 = vmatprep.subr.bf16.mxu0 %v9015_v43  ;;  %6531 = vmatprep.subr.bf16.mxu1 %v9018_v44  ;;  %v9092_v62 = vld [vmem:[%s12066_s13 + $0x3d0] ss:$20 sps:$4 sm:$0xff]  }
 0xa2e   : > { %v9093_v43 = vld [vmem:[%s12066_s13 + $0x10] ss:$20 sps:$4 sm:$0xff]  }
 0xa2f   : > { %v9094_v44 = vld [vmem:[%s12066_s13 + $0x290] ss:$20 sps:$4 sm:$0xff]  }
 0xa30   : > { %6491 = vmatpush1.bf16.msra.mxu0 %v9013_v46  ;;  %6532 = vmatpush1.bf16.msra.mxu1 %v9016_v41  ;;  %v9095_v46 = vld [vmem:[%s12066_s13 + $0x178] ss:$20 sps:$4 sm:$0xff]  }
 0xa31   : > { %6492 = vmatprep.subr.bf16.mxu0 %v9021_v50  ;;  %6533 = vmatprep.subr.bf16.mxu1 %v9024_v51  ;;  %v9096_v41 = vld [vmem:[%s12066_s13 + $0x3f8] ss:$20 sps:$4 sm:$0xff]  }
 0xa32   : > { %v9097_v50 = vld [vmem:[%s12066_s13 + $0x38] ss:$20 sps:$4 sm:$0xff]  }
 0xa33   : > { %v9098_v51 = vld [vmem:[%s12066_s13 + $0x2b8] ss:$20 sps:$4 sm:$0xff]  }
 0xa34   : > { %6493 = vmatpush1.bf16.msra.mxu0 %v9019_v32  ;;  %6534 = vmatpush1.bf16.msra.mxu1 %v9022_v52  ;;  %v9099_v32 = vld [vmem:[%s12066_s13 + $0x1a0] ss:$20 sps:$4 sm:$0xff]  }
 0xa35   : > { %6494 = vmatprep.subr.bf16.mxu0 %v9027_v31  ;;  %6535 = vmatprep.subr.bf16.mxu1 %v9030_v53  ;;  %v9101_v52 = vld [vmem:[%s12066_s13 + $0x60] ss:$20 sps:$4 sm:$0xff]   ;;  %v9103_v31 = vld [vmem:[%s12066_s13 + $0x1c8] ss:$20 sps:$4 sm:$0xff]  }
 0xa36   : > { %v9104_v53 = vld [vmem:[%s12066_s13 + $0x448] ss:$20 sps:$4 sm:$0xff]  }
 0xa38   : > { %6495 = vmatpush1.bf16.msra.mxu0 %v9025_v39  ;;  %6536 = vmatpush1.bf16.msra.mxu1 %v9028_v48  ;;  %v9105_v39 = vld [vmem:[%s12066_s13 + $0x88] ss:$20 sps:$4 sm:$0xff]  }
 0xa39   : > { %6496 = vmatprep.subr.bf16.mxu0 %v9033_v4  ;;  %6537 = vmatprep.subr.bf16.mxu1 %v9036_v12  ;;  %v9106_v48 = vld [vmem:[%s12066_s13 + $0x308] ss:$20 sps:$4 sm:$0xff]   ;;  %v9107_v4 = vld [vmem:[%s12066_s13 + $0x1f0] ss:$20 sps:$4 sm:$0xff]  }
 0xa3a   : > { %v9108_v12 = vld [vmem:[%s12066_s13 + $0x470] ss:$20 sps:$4 sm:$0xff]  }
 0xa3c   : > { %6497 = vmatpush1.bf16.msra.mxu0 %v9031_v57  ;;  %6538 = vmatpush1.bf16.msra.mxu1 %v9034_v5  ;;  %v9109_v57 = vld [vmem:[%s12066_s13 + $0xb0] ss:$20 sps:$4 sm:$0xff]  }
 0xa3d   : > { %6498 = vmatprep.subr.bf16.mxu0 %v9039_v63  ;;  %6539 = vmatprep.subr.bf16.mxu1 %v9042_v58  ;;  %v9110_v5 = vld [vmem:[%s12066_s13 + $0x330] ss:$20 sps:$4 sm:$0xff]   ;;  %v9111_v63 = vld [vmem:[%s12066_s13 + $0x218] ss:$20 sps:$4 sm:$0xff]  }
 0xa3e   : > { %v9112_v58 = vld [vmem:[%s12066_s13 + $0x498] ss:$20 sps:$4 sm:$0xff]  }
 0xa40   : > { %6499 = vmatpush1.bf16.msra.mxu0 %v9037_v45  ;;  %6540 = vmatpush1.bf16.msra.mxu1 %v9040_v6  ;;  %v9113_v45 = vld [vmem:[%s12066_s13 + $0xd8] ss:$20 sps:$4 sm:$0xff]  }
 0xa41   : > { %6500 = vmatprep.subr.bf16.mxu0 %v9045_v60  ;;  %6541 = vmatprep.subr.bf16.mxu1 %v9048_v61  ;;  %v9114_v6 = vld [vmem:[%s12066_s13 + $0x358] ss:$20 sps:$4 sm:$0xff]   ;;  %v9115_v60 = vld [vmem:[%s12066_s13 + $0x240] ss:$20 sps:$4 sm:$0xff]  }
 0xa42   : > { %v9116_v61 = vld [vmem:[%s12066_s13 + $0x4c0] ss:$20 sps:$4 sm:$0xff]  }
 0xa44   : > { %6501 = vmatpush1.bf16.msra.mxu0 %v9043_v0  ;;  %6542 = vmatpush1.bf16.msra.mxu1 %v9046_v17  ;;  %v9117_v0 = vld [vmem:[%s12066_s13 + $0x100] ss:$20 sps:$4 sm:$0xff]  }
 0xa45   : > { %6502 = vmatprep.subr.bf16.mxu0 %v9051_v47  ;;  %6543 = vmatprep.subr.bf16.mxu1 %v9054_v9  ;;  %v9118_v17 = vld [vmem:[%s12066_s13 + $0x380] ss:$20 sps:$4 sm:$0xff]   ;;  %v9119_v47 = vld [vmem:[%s12066_s13 + $0x268] ss:$20 sps:$4 sm:$0xff]  }
 0xa46   : > { %v9120_v9 = vld [vmem:[%s12066_s13 + $0x4e8] ss:$20 sps:$4 sm:$0xff]  }
 0xa48   : > { %6503 = vmatpush1.bf16.msra.mxu0 %v9049_v54  ;;  %6544 = vmatpush1.bf16.msra.mxu1 %v9052_v49  ;;  %v9121_v54 = vld [vmem:[%s12066_s13 + $0x128] ss:$20 sps:$4 sm:$0xff]  }
 0xa49   : > { %6504 = vmatprep.subr.bf16.mxu0 %v9057_v3  ;;  %6545 = vmatprep.subr.bf16.mxu1 %v9060_v7  ;;  %v9122_v49 = vld [vmem:[%s12066_s13 + $0x3a8] ss:$20 sps:$4 sm:$0xff]   ;;  %v9123_v3 = vld [vmem:[%s12069_s16 + $0x40] sm:$0xff]  }
 0xa4a   : > { %v9124_v7 = vld [vmem:[%s12069_s16] sm:$0xff]  }
 0xa4c   : > { %6505 = vmatpush1.bf16.msra.mxu0 %v9055_v10  ;;  %6546 = vmatpush1.bf16.msra.mxu1 %v9058_v15  ;;  %v9125_v10 = vld [vmem:[%s12069_s16 + $0x48] sm:$0xff]   ;;  %v9139_v15 = vld [vmem:[%s12069_s16 + $0xc0] sm:$0xff]  }
 0xa4d   : > { %6506 = vmatprep.subr.bf16.mxu0 %v9063_v14  ;;  %6547 = vmatprep.subr.bf16.mxu1 %v9066_v18  ;;  %v9140_v14 = vld [vmem:[%s12069_s16 + $0x80] sm:$0xff]   ;;  %v9141_v18 = vld [vmem:[%s12069_s16 + $0xc8] sm:$0xff]  }
 0xa50   : > { %6507 = vmatpush1.bf16.msra.mxu0 %v9061_v19  ;;  %6548 = vmatpush1.bf16.msra.mxu1 %v9064_v8  ;;  %v9126_v19 = vld [vmem:[%s12069_s16 + $0x8] sm:$0xff]  }
 0xa51   : > { %6508 = vmatprep.subr.bf16.mxu0 %v9069_v25  ;;  %6549 = vmatprep.subr.bf16.mxu1 %v9072_v24  ;;  %v9142_v8 = vld [vmem:[%s12069_s16 + $0x88] sm:$0xff]   ;;  %v9128_v25 = vld [vmem:[%s12069_s16 + $0x10] sm:$0xff]   ;;  %v9129_v24 = vld [vmem:[%s12069_s16 + $0x58] sm:$0xff]  }
 0xa54   : > { %6509 = vmatpush1.bf16.msra.mxu0 %v9067_v34  ;;  %6550 = vmatpush1.bf16.msra.mxu1 %v9070_v23  ;;  %v9144_v34 = vld [vmem:[%s12069_s16 + $0x90] sm:$0xff]   ;;  %v9145_v23 = vld [vmem:[%s12069_s16 + $0xd8] sm:$0xff]  }
 0xa55   : > { %6510 = vmatprep.subr.bf16.mxu0 %v9075_v16  ;;  %6551 = vmatprep.subr.bf16.mxu1 %v9078_v22  ;;  %v9130_v16 = vld [vmem:[%s12069_s16 + $0x18] sm:$0xff]   ;;  %v9131_v22 = vld [vmem:[%s12069_s16 + $0x60] sm:$0xff]  }
 0xa58   : > { %6511 = vmatpush1.bf16.msra.mxu0 %v9073_v36  ;;  %6552 = vmatpush1.bf16.msra.mxu1 %v9076_v1  ;;  %v9146_v36 = vld [vmem:[%s12069_s16 + $0x98] sm:$0xff]   ;;  %v9147_v1 = vld [vmem:[%s12069_s16 + $0xe0] sm:$0xff]  }
 0xa59   : > { %6512 = vmatprep.subr.bf16.mxu0 %v9081_v29  ;;  %6553 = vmatprep.subr.bf16.mxu1 %v9084_v33  ;;  %v9132_v29 = vld [vmem:[%s12069_s16 + $0x20] sm:$0xff]   ;;  %v9133_v33 = vld [vmem:[%s12069_s16 + $0x68] sm:$0xff]  }
 0xa5c   : > { %6513 = vmatpush1.bf16.msra.mxu0 %v9079_v59  ;;  %6554 = vmatpush1.bf16.msra.mxu1 %v9082_v11  ;;  %v9148_v59 = vld [vmem:[%s12069_s16 + $0xa0] sm:$0xff]   ;;  %v9134_v11 = vld [vmem:[%s12069_s16 + $0x28] sm:$0xff]  }
 0xa5d   : > { %6514 = vmatprep.subr.bf16.mxu0 %v9087_v28  ;;  %6555 = vmatprep.subr.bf16.mxu1 %v9090_v42  ;;  %v9135_v28 = vld [vmem:[%s12069_s16 + $0x70] sm:$0xff]  }
 0xa5e   : > { %v9136_v42 = vld [vmem:[%s12069_s16 + $0x30] sm:$0xff]  }
 0xa60   : > { %6515 = vmatpush1.bf16.msra.mxu0 %v9085_v27  ;;  %6556 = vmatpush1.bf16.msra.mxu1 %v9088_v55  ;;  %v9137_v27 = vld [vmem:[%s12069_s16 + $0x78] sm:$0xff]  }
 0xa61   : > { %8027 = vmatprep.subr.bf16.mxu0 %v9091_v35  ;;  %8049 = vmatprep.subr.bf16.mxu1 %v9092_v62  ;;  %v9138_v55 = vld [vmem:[%s12069_s16 + $0x38] sm:$0xff]   ;;  %v9149_v35 = vld [vmem:[%s12069_s16 + $0xe8] sm:$0xff]  }
 0xa62   : > { %v9150_v62 = vld [vmem:[%s12069_s16 + $0xa8] sm:$0xff]  }
 0xa63   : > { %6517 = vmatmul.mubr.bf16.vlgmr.msra.gmra.mrb[32].mxu0 %v11534_v37  ;;  %6558 = vmatmul.mubr.bf16.vlgmr.msra.gmra.mrb[48].mxu1 %v11536_v38 }
 0xa64   : > { %8028 = vmatpush3.bf16.msra.mxu0 %v9093_v43  ;;  %6598 = vmatprep.mubr.bf16.mxu0 %v11524_v56  ;;  %v9100_v56 = vld [vmem:[%s12066_s13 + $0x420] ss:$20 sps:$4 sm:$0xff]  }
 0xa65   : > { %8050 = vmatpush3.bf16.msra.mxu1 %v9094_v44  ;;  %6638 = vmatprep.mubr.bf16.mxu1 %v11526_v13  ;;  %v9102_v13 = vld [vmem:[%s12066_s13 + $0x2e0] ss:$20 sps:$4 sm:$0xff]  }
 0xa66   : > { %8029 = vmatprep.subr.bf16.mxu0 %v9095_v46  ;;  %8051 = vmatprep.subr.bf16.mxu1 %v9096_v41  ;;  %v9151_v43 = vld [vmem:[%s12069_s16 + $0xf0] sm:$0xff]   ;;  %v9153_v46 = vld [vmem:[%s12069_s16 + $0xf8] sm:$0xff]  }
 0xa67   : > { %v9152_v44 = vld [vmem:[%s12069_s16 + $0xb0] sm:$0xff]   ;;  %v9154_v41 = vld [vmem:[%s12069_s16 + $0xb8] sm:$0xff]  }
 0xa68   : > { %8030 = vmatpush3.bf16.msra.mxu0 %v9097_v50  ;;  %v9303_v50 = vmov 0.0  }
 0xa69   : > { %8052 = vmatpush3.bf16.msra.mxu1 %v9098_v51  ;;  %8031 = vmatprep.subr.bf16.mxu0 %v9099_v32  ;;  %v5542_v51 = vld [vmem:[%s12067_s14] sm:$0x1f] }
 0xa6a   : > { %8053 = vmatprep.subr.bf16.mxu1 %v9100_v56  ;;  %v11926_v32 = vmul.f32 %v5542_v51, %v11323_v2  ;;  %v11931_v56 = vld [vmem:[%s12110_s30] sm:$0x1f]  ;;  %s9305_s30 = smov [#allocation5]  }
 0xa6b   : > { %s9206_s24 = sshll.u32 %s9305_s30, 4  ;;  %s9207_s24 = int_to_ptr.vmem [resolvable:$false] %s9206_s24 }
 0xa6c   : > { %8032 = vmatpush3.bf16.msra.mxu0 %v9101_v52  ;;  %v6380_v52 = vrot.slane %v11926_v32, %v9843_v20  ;;  %s9208_s2 = scalar_lea.vmem %s9207_s24, 128  ;;  %p9209_p5 = scmp.lt.s32.totalorder %s7155_s28, %s9207_s24 }
 0xa6d   : > { %8054 = vmatpush3.bf16.msra.mxu1 %v9102_v13  ;;  %8033 = vmatprep.subr.bf16.mxu0 %v9103_v31  ;;  %p9210_p6 = scmp.lt.s32.totalorder %s9208_s2, %s9202_s22 }
 0xa6e   : > { %8055 = vmatprep.subr.bf16.mxu1 %v9104_v53  ;;  %v6384_v53 = vrot.slane %v11926_v32, %v9846_v21 }
 0xa6f   : > { %p9211_p7 = por %p9210_p6, %p9209_p5 }
 0xa70   : > { %8034 = vmatpush3.bf16.msra.mxu0 %v9105_v39 }
 0xa71   : > { %8056 = vmatpush3.bf16.msra.mxu1 %v9106_v48  ;;  %8035 = vmatprep.subr.bf16.mxu0 %v9107_v4  ;;  %v6651_v48 = vrot.slane %v11931_v56, %v9843_v20  ;;  %v9155_v20 = vld [vmem:[%s12069_s16 + $0x100] sm:$0xff]   ;;  %p9212_p8 = pnand %p9211_p7, %p9205_p4 }
 0xa72   : > { %8057 = vmatprep.subr.bf16.mxu1 %v9108_v12 }
 0xa74   : > { %8036 = vmatpush3.bf16.msra.mxu0 %v9109_v57  ;;  %v6655_v57 = vrot.slane %v11931_v56, %v9846_v21  ;;  %v9156_v21 = vld [vmem:[%s12069_s16 + $0x108] sm:$0xff]  }
 0xa75   : > { %8058 = vmatpush3.bf16.msra.mxu1 %v9110_v5  ;;  %8037 = vmatprep.subr.bf16.mxu0 %v9111_v63 }
 0xa76   : > { %8059 = vmatprep.subr.bf16.mxu1 %v9112_v58 }
 0xa78   : > { %8038 = vmatpush3.bf16.msra.mxu0 %v9113_v45 }
 0xa79   : > { %8060 = vmatpush3.bf16.msra.mxu1 %v9114_v6  ;;  %8039 = vmatprep.subr.bf16.mxu0 %v9115_v60 }
 0xa7a   : > { %8061 = vmatprep.subr.bf16.mxu1 %v9116_v61 }
 0xa7c   : > { %8040 = vmatpush3.bf16.msra.mxu0 %v9117_v0 }
 0xa7d   : > { %8062 = vmatpush3.bf16.msra.mxu1 %v9118_v17  ;;  %8041 = vmatprep.subr.bf16.mxu0 %v9119_v47 }
 0xa7e   : > { %8063 = vmatprep.subr.bf16.mxu1 %v9120_v9 }
 0xa80   : > { %8042 = vmatpush3.bf16.msra.mxu0 %v9121_v54 }
 0xa81   : > { %8064 = vmatpush3.bf16.msra.mxu1 %v9122_v49  ;;  %8071 = vmatprep.subr.bf16.mxu0 %v9123_v3  ;;  %v9157_v49 = vld [vmem:[%s12069_s16 + $0x110] sm:$0xff]   ;;  %v9158_v3 = vld [vmem:[%s12069_s16 + $0x118] sm:$0xff]  }
 0xa82   : > { %8093 = vmatprep.subr.bf16.mxu1 %v9139_v15  ;;  %v9161_v15 = vld [vmem:[%s12069_s16 + $0x130] sm:$0xff]  }
 0xa83   : > { %6599 = vmatmul.mubr.bf16.vlgmr.msra.gmra.mrb[36].mxu0 %v11534_v37  ;;  %v9127_v37 = vld [vmem:[%s12069_s16 + $0x50] sm:$0xff]  }
 0xa84   : > { %6639 = vmatmul.mubr.bf16.vlgmr.msra.gmra.mrb[52].mxu1 %v11536_v38  ;;  %8072 = vmatpush3.bf16.msra.mxu0 %v9124_v7  ;;  %v9143_v38 = vld [vmem:[%s12069_s16 + $0xd0] sm:$0xff]   ;;  %v9159_v7 = vld [vmem:[%s12069_s16 + $0x120] sm:$0xff]  }
 0xa85   : > { %8073 = vmatprep.subr.bf16.mxu0 %v9125_v10  ;;  %8094 = vmatpush3.bf16.msra.mxu1 %v9140_v14  ;;  %v9160_v10 = vld [vmem:[%s12069_s16 + $0x128] sm:$0xff]   ;;  %v9162_v14 = vld [vmem:[%s12069_s16 + $0x138] sm:$0xff]  }
 0xa86   : > { %8095 = vmatprep.subr.bf16.mxu1 %v9141_v18  ;;  %v6388_v18 = vrot.slane %v11926_v32, %v9854_v26 }
 0xa88   : > { %8074 = vmatpush3.bf16.msra.mxu0 %v9126_v19 }
 0xa89   : > { %8075 = vmatprep.subr.bf16.mxu0 %v9127_v37  ;;  %8096 = vmatpush3.bf16.msra.mxu1 %v9142_v8  ;;  %v6392_v8 = vrot.slane %v11926_v32, %v9862_v30 }
 0xa8a   : > { %8097 = vmatprep.subr.bf16.mxu1 %v9143_v38 }
 0xa8c   : > { %8076 = vmatpush3.bf16.msra.mxu0 %v9128_v25  ;;  %v6659_v25 = vrot.slane %v11931_v56, %v9854_v26 }
 0xa8d   : > { %8077 = vmatprep.subr.bf16.mxu0 %v9129_v24  ;;  %8098 = vmatpush3.bf16.msra.mxu1 %v9144_v34 }
 0xa8e   : > { %8099 = vmatprep.subr.bf16.mxu1 %v9145_v23 }
 0xa90   : > { %8078 = vmatpush3.bf16.msra.mxu0 %v9130_v16  ;;  %v6663_v16 = vrot.slane %v11931_v56, %v9862_v30  ;;  %v6396_v30 = vrot.slane %v11926_v32, %v9882_v40 }
 0xa91   : > { %8079 = vmatprep.subr.bf16.mxu0 %v9131_v22  ;;  %8100 = vmatpush3.bf16.msra.mxu1 %v9146_v36 }
 0xa92   : > { %8101 = vmatprep.subr.bf16.mxu1 %v9147_v1 }
 0xa94   : > { %8080 = vmatpush3.bf16.msra.mxu0 %v9132_v29 }
 0xa95   : > { %8081 = vmatprep.subr.bf16.mxu0 %v9133_v33  ;;  %8102 = vmatpush3.bf16.msra.mxu1 %v9148_v59 }
 0xa96   : > { %8103 = vmatprep.subr.bf16.mxu1 %v9149_v35 }
 0xa98   : > { %8082 = vmatpush3.bf16.msra.mxu0 %v9134_v11 }
 0xa99   : > { %8083 = vmatprep.subr.bf16.mxu0 %v9135_v28  ;;  %8104 = vmatpush3.bf16.msra.mxu1 %v9150_v62 }
 0xa9a   : > { %8105 = vmatprep.subr.bf16.mxu1 %v9151_v43 }
 0xa9c   : > { %8084 = vmatpush3.bf16.msra.mxu0 %v9136_v42 }
 0xa9d   : > { %8085 = vmatprep.subr.bf16.mxu0 %v9137_v27  ;;  %8106 = vmatpush3.bf16.msra.mxu1 %v9152_v44 }
 0xa9e   : > { %8107 = vmatprep.subr.bf16.mxu1 %v9153_v46 }
 0xaa0   : > { %8086 = vmatpush3.bf16.msra.mxu0 %v9138_v55 }
 0xaa1   : > { %8108 = vmatpush3.bf16.msra.mxu1 %v9154_v41  ;;  %8124 = vmatprep.subr.bf16.mxu0 %v9303_v50 }
 0xaf6   : > { %v6436_v13 = vpop.f32.mrb[28].mxu0  ;;  %v6477_v31 = vpop.f32.mrb[44].mxu1 }
 0xaf7   : > { %v6437_v39 = vadd.f32 %v6436_v13, %v6380_v52  ;;  %v6438_v4 = vpop.f32.mrb[29].mxu0  ;;  %v6479_v2 = vpop.f32.mrb[45].mxu1 }
 0xaf8   : > { %v6439_v12 = vadd.f32 %v6438_v4, %v6384_v53  ;;  %v6440_v5 = vpop.f32.mrb[30].mxu0  ;;  %v6481_v63 = vpop.f32.mrb[46].mxu1 }
 0xaf9   : > { %v6478_v58 = vadd.f32 %v6477_v31, %v6437_v39  ;;  %v6441_v45 = vpop.f32.mrb[31].mxu0  ;;  %v6482_v6 = vpop.f32.mrb[47].mxu1  ;;  %v6667_v31 = vrot.slane %v11931_v56, %v9882_v40 }
 0xafa   : > { %v6480_v60 = vadd.f32 %v6479_v2, %v6439_v12 }
 0xafb   : > { %v6673_v61 = vadd.f32 %v6651_v48, %v6478_v58 }
 0xafc   : > { %v6674_v0 = vadd.f32 %v6655_v57, %v6480_v60 }
 0xafd   : > { %v6678_v17 = vmax.f32 %v6673_v61, 0.0 }
 0xafe   : > { %v6679_v47 = vmax.f32 %v6674_v0, 0.0 }
 0xaff   : > { %v6683_v54 = vpack.c.bf16 %v6678_v17, %v6678_v17 }
 0xb00   : > { %v6684_v9 = vpack.c.bf16 %v6679_v47, %v6679_v47 }
 0xb02   : > { %7041 = vmatprep.mubr.bf16.mxu0 %v6684_v9 }
 0xb03   : > { %7042 = vmatmul.mubr.bf16.vlgmr.msra.gmra.mrb[40].mxu0 %v6683_v54 }
 0xb04   : > { %8125 = vmatpush3.bf16.msra.mxu0 %v9155_v20  ;;  %8140 = vmatprep.mubr.msk.bf16.mxu0 %vm9304_vm4, %v9303_v50 }
 0xb05   : > { %8126 = vmatprep.subr.bf16.mxu0 %v9303_v50 }
 0xb08   : > { %8127 = vmatpush3.bf16.msra.mxu0 %v9156_v21 }
 0xb09   : > { %8128 = vmatprep.subr.bf16.mxu0 %v9303_v50 }
 0xb0c   : > { %8129 = vmatpush3.bf16.msra.mxu0 %v9157_v49 }
 0xb0d   : > { %8130 = vmatprep.subr.bf16.mxu0 %v9303_v50 }
 0xb10   : > { %8131 = vmatpush3.bf16.msra.mxu0 %v9158_v3 }
 0xb11   : > { %8132 = vmatprep.subr.bf16.mxu0 %v9303_v50 }
 0xb14   : > { %8133 = vmatpush3.bf16.msra.mxu0 %v9159_v7 }
 0xb15   : > { %8134 = vmatprep.subr.bf16.mxu0 %v9303_v50 }
 0xb18   : > { %8135 = vmatpush3.bf16.msra.mxu0 %v9160_v10 }
 0xb19   : > { %8136 = vmatprep.subr.bf16.mxu0 %v9303_v50 }
 0xb1c   : > { %8137 = vmatpush3.bf16.msra.mxu0 %v9161_v15 }
 0xb1d   : > { %8138 = vmatprep.subr.bf16.mxu0 %v9303_v50 }
 0xb20   : > { %8139 = vmatpush3.bf16.msra.mxu0 %v9162_v14 }
 0xb36   : > { %v6518_v19 = vpop.f32.mrb[32].mxu0  ;;  %v6559_v37 = vpop.f32.mrb[48].mxu1 }
 0xb37   : > { %v6519_v38 = vadd.f32 %v6518_v19, %v6388_v18  ;;  %v6520_v24 = vpop.f32.mrb[33].mxu0  ;;  %v6561_v34 = vpop.f32.mrb[49].mxu1 }
 0xb38   : > { %v6521_v23 = vadd.f32 %v6520_v24, %v6392_v8  ;;  %v6522_v22 = vpop.f32.mrb[34].mxu0  ;;  %v6563_v36 = vpop.f32.mrb[50].mxu1 }
 0xb39   : > { %v6560_v1 = vadd.f32 %v6559_v37, %v6519_v38  ;;  %v6523_v29 = vpop.f32.mrb[35].mxu0  ;;  %v6564_v33 = vpop.f32.mrb[51].mxu1 }
 0xb3a   : > { %v6562_v59 = vadd.f32 %v6561_v34, %v6521_v23 }
 0xb3b   : > { %v6675_v11 = vadd.f32 %v6659_v25, %v6560_v1 }
 0xb3c   : > { %v6676_v28 = vadd.f32 %v6663_v16, %v6562_v59 }
 0xb3d   : > { %v6680_v42 = vmax.f32 %v6675_v11, 0.0 }
 0xb3e   : > { %v6681_v27 = vmax.f32 %v6676_v28, 0.0 }
 0xb3f   : > { %v6685_v35 = vpack.c.bf16 %v6680_v42, %v6680_v42 }
 0xb40   : > { %v6686_v55 = vpack.c.bf16 %v6681_v27, %v6681_v27 }
 0xb42   : > { %7081 = vmatprep.mubr.bf16.mxu1 %v6686_v55 }
 0xb43   : > { %7082 = vmatmul.mubr.bf16.vlgmr.msra.gmra.mrb[56].mxu1 %v6685_v35 }
 0xb56   : > { %v8043_v26 = vpop.f32.mrb[36].mxu0 }
 0xb57   : > { %v8065_v62 = vpop.f32.mrb[52].mxu1  ;;  %v8044_v43 = vpop.f32.mrb[37].mxu0 }
 0xb58   : > { %v8045_v44 = vadd.f32 %v8044_v43, %v8043_v26  ;;  %v8066_v46 = vpop.f32.mrb[53].mxu1  ;;  %v8046_v41 = vpop.f32.mrb[38].mxu0 }
 0xb59   : > { %v8067_v50 = vadd.f32 %v8066_v46, %v8065_v62  ;;  %v8068_v51 = vpop.f32.mrb[54].mxu1  ;;  %v8047_v52 = vpop.f32.mrb[39].mxu0 }
 0xb5a   : > { %v6601_v13 = vadd.f32 %v8045_v44, %v6396_v30  ;;  %v8069_v53 = vpop.f32.mrb[55].mxu1 }
 0xb5c   : > { %v6641_v39 = vadd.f32 %v8067_v50, %v6601_v13 }
 0xb5e   : > { %v6677_v48 = vadd.f32 %v6667_v31, %v6641_v39 }
 0xb60   : > { %v6682_v4 = vmax.f32 %v6677_v48, 0.0 }
 0xb62   : > { %v6687_v2 = vpack.c.bf16 %v6682_v4, %v6682_v4 }
 0xb64   : > { %8141 = vmatmul.mubr.bf16.vlgmr.msra.gmra.mrb[44].mxu0 %v6687_v2 }
 0xb65   : > { %9215 = shalt.err (!%p9212_p8)
}
 0xb66   : > { %s9216_s0 = scalar_lea.hbm %s11981_s5, 64  ;;  %s9220_s27 = scalar_lea.hbm %s12073_s21, 192 }
 0xb67   : > { %p9217_p9 = scmp.ne.s32.totalorder %s11981_s5, %s9216_s0  ;;  %p9221_p0 = scmp.lt.u32.totalorder %s11981_s5, %s12073_s21 }
 0xb68   : > { %p9222_p1 = scmp.lt.u32.totalorder %s9220_s27, %s9216_s0  ;;  %p9224_p3 = scmp.lt.u32.totalorder %s9216_s0, %s11981_s5 }
 0xb69   : > { %p9218_p12 = pnand %p9217_p9, %p9466_p10 }
 0xb6a   : > { %p9223_p2 = por %p9222_p1, %p9221_p0 }
 0xb6b   : > { %p9219_p13 = pneg %p9218_p12 }
 0xb6c   : > { %p9225_p4 = por %p9224_p3, %p9223_p2 }
 0xb6e   : > { %p9226_p5 = pnand %p9225_p4, %p9219_p13 }
 0xb70   : > { %9229 = shalt.err (!%p9226_p5)
}
 0xb71   : > { %8174 = dma.vmem_to_hbm [thread:$0]  (%p9466_p10), %s7155_s28, 64, %s11981_s5, %s7136_s1  }
 0xb72   : > { %s12111_s24 = sld [smem:[#allocation26_spill]]  ;;  %s8021_s5 = sshll.u32 %s9449_s15, 4 }
 0xb73   : > { %s707_s28 = scalar_lea.vmem [#allocation7], %s11500_s17  ;;  %s12112_s6 = sld [smem:[#allocation27_spill]] }
 0xb74   : > { %s7167_s1 = sshll.u32 %s707_s28, 4  ;;  %s7141_s27 = scalar_lea.sflag [#allocation8], %s11500_s17  ;;  %s12012_s1 = int_to_ptr.vmem [resolvable:$true] %s7167_s1 }
 0xb75   : > { %s9230_s25 = scalar_lea.vmem %s12012_s1, 16  ;;  %s9306_s15 = smov [#allocation7]  }
 0xb76   : > { %p9231_p6 = scmp.ne.s32.totalorder %s12012_s1, %s9230_s25  ;;  %s9234_s23 = sshll.u32 %s9306_s15, 4  ;;  %s9235_s23 = int_to_ptr.vmem [resolvable:$false] %s9234_s23 }
 0xb77   : > { %s9236_s22 = scalar_lea.vmem %s9235_s23, 32  ;;  %p9237_p9 = scmp.lt.s32.totalorder %s12012_s1, %s9235_s23 }
 0xb78   : > { %v6768_v5 = vld [vmem:[%s12111_s24] sm:$0x1]  ;;  %p9232_p7 = pnand %p9231_p6, %p9466_p10  ;;  %p9238_p12 = scmp.lt.s32.totalorder %s9236_s22, %s9230_s25 }
 0xb79   : > { %s12010_s29 = scalar_lea.hbm %s12112_s6, %s8021_s5 }
 0xb7a   : > { %p9233_p8 = pneg %p9232_p7  ;;  %p9239_p13 = por %p9238_p12, %p9237_p9 }
 0xb7c   : > { %p9240_p0 = pnand %p9239_p13, %p9233_p8 }
 0xbd6   : > { %v8087_v40 = vpop.f32.mrb[40].mxu0 }
 0xbd7   : > { %v8088_v32 = vpop.f32.mrb[41].mxu0 }
 0xbd8   : > { %v8089_v56 = vadd.f32 %v8088_v32, %v8087_v40  ;;  %v8090_v12 = vpop.f32.mrb[42].mxu0 }
 0xbd9   : > { %v8091_v57 = vpop.f32.mrb[43].mxu0 }
 0xbda   : > { %v7044_v45 = vadd.f32 %v8089_v56, %v6768_v5 }
 0xc16   : > { %v8109_v63 = vpop.f32.mrb[56].mxu1 }
 0xc17   : > { %v8110_v58 = vpop.f32.mrb[57].mxu1 }
 0xc18   : > { %v8111_v6 = vadd.f32 %v8110_v58, %v8109_v63  ;;  %v8112_v60 = vpop.f32.mrb[58].mxu1 }
 0xc19   : > { %v8113_v61 = vpop.f32.mrb[59].mxu1 }
 0xc1a   : > { %v7084_v0 = vadd.f32 %v8111_v6, %v7044_v45 }
 0xc37   : > { %v7123_v17 = vpop.f32.mrb[44].mxu0 }
 0xc38   : > { %v7124_v47 = vadd.f32 %v7123_v17, %v7084_v0  ;;  %v8142_v9 = vpop.f32.mrb[45].mxu0 }
 0xc39   : > { %v7126_v20 = vpop.f32.mrb[46].mxu0 }
 0xc3a   : > { %v7129_v54 = vsub.f32 0.0, %v7124_v47  ;;  %v8143_v21 = vpop.f32.mrb[47].mxu0 }
 0xc3c   : > { %v7130_v49 = vmul.f32 1.442695, %v7129_v54 }
 0xc3e   : > { %9185 = vpow2.f32 %v7130_v49 }
 0xc48   : > { %v9186_v3 = vpop.eup %9185 }
 0xc49   : > { %v7132_v7 = vadd.f32 1.0, %v9186_v3 }
 0xc4b   : > { %9187 = vrcp.f32 %v7132_v7 }
 0xc55   : > { %v9188_v10 = vpop.eup %9187 }
 0xc56   : > { %7134 = vst [vmem:[%s707_s28] sm:$0x1] %v9188_v10 }
 0xc57   : > { %9243 = shalt.err (!%p9240_p0)
}
 0xc58   : > { %s9244_s17 = scalar_lea.hbm %s12010_s29, 16  ;;  %s9248_s5 = scalar_lea.hbm %s12112_s6, 48 }
 0xc59   : > { %p9245_p1 = scmp.ne.s32.totalorder %s12010_s29, %s9244_s17  ;;  %p9249_p4 = scmp.lt.u32.totalorder %s12010_s29, %s12112_s6 }
 0xc5a   : > { %p9250_p5 = scmp.lt.u32.totalorder %s9248_s5, %s9244_s17  ;;  %p9252_p7 = scmp.lt.u32.totalorder %s9244_s17, %s12010_s29 }
 0xc5b   : > { %p9246_p2 = pnand %p9245_p1, %p9466_p10 }
 0xc5c   : > { %p9251_p6 = por %p9250_p5, %p9249_p4 }
 0xc5d   : > { %p9247_p3 = pneg %p9246_p2 }
 0xc5e   : > { %p9253_p8 = por %p9252_p7, %p9251_p6 }
 0xc60   : > { %p9254_p9 = pnand %p9253_p8, %p9247_p3 }
 0xc62   : > { %9257 = shalt.err (!%p9254_p9)
}
 0xc63   : > { %8175 = dma.vmem_to_hbm [thread:$0]  (%p9466_p10), %s12012_s1, 16, %s12010_s29, %s7141_s27  }
 0xc64 PF: > { %s12113_s0 = sld [smem:[#allocation14_spill]]  ;;  %s12114_s25 = sld [smem:[#allocation12_spill]] }
 0xc6a   : > { %p8185_p12 = scmp.ge.s32.totalorder %s12113_s0, 2  ;;  %s7179_s23 = sand.u32 1, %s12114_s25  }
 0xc6b   : > { %s7180_s22 = scalar_lea.sflag [#allocation6], %s7179_s23 }
 0xc6c   : > { %p8179_p13 = pnand %p8185_p12, %p9470_p11 }
 0xc6e   : > { %9277 = dma.done.wait (!%p8179_p13), %s7180_s22, 64  }
 0xc6f   : > { %9279 = vsyncadd (!%p8179_p13), %s7180_s22, 4294967232  ;;  %s7189_s17 = scalar_lea.sflag [#allocation8], %s7179_s23 }
 0xc70   : > { %9281 = dma.done.wait (!%p8179_p13), %s7189_s17, 16  }
 0xc71   : > { %9283 = vsyncadd (!%p8179_p13), %s7189_s17, 4294967280  ;;  %s12116_s24 = sld [smem:[#allocation15_spill]]  ;;  %s12117_s3 = sld [smem:[#allocation13_spill]] }
 0xc72   : > { %s12118_s5 = sld [smem:[#allocation16_spill]]  ;;  %s12119_s1 = smov %s9290_s19 }
 0xc77   : > { %p44_p10 = scmp.ge.s32.totalorder %s12116_s24, 5   ;;  %s12120_s19 = smov %s12117_s3 }
 0xc79   :  { %46 = sbr.rel (!%p44_p10) target bundleno = 28 (0x1c), region = 161 }
 0xc80   :  { %7193 = vsyncpa [#allocation6], 1 }
 0xc81   :  { %7195 = vsyncpa [#allocation6 + $0x1], 1 }
 0xc82   :  { %7196 = vsyncpa [#allocation8], 1 }
 0xc83   :  { %7198 = vsyncpa [#allocation8 + $0x1], 1 }

</bundles_post_ra>
